<compile_context>
chip_gen: v7x
topology: tpu7x:2x2x1
jax: 0.10.0
libtpu: 0.0.40
codegen_flags: <defaults>
</compile_context>

<pallas_src>
import functools

import jax
import jax.numpy as jnp
from jax import lax
from jax.experimental import pallas as pl
from jax.experimental.pallas import tpu as pltpu


def _round_up(x, m):
    return (x + m - 1) // m * m


def _build_patches(apad_ref, patch_ref, mask_l, mask_r, *, H, W, Cp, pad, cdtype):
    """im2col: write the 9 shifted taps (each a lane-aligned 128-wide column
    block) into patch_ref[:, k*Cp:(k+1)*Cp].  Vertical out-of-range taps read
    the zero halo rows of apad_ref; horizontal row-wrap is masked."""
    n = H * W
    k = 0
    for dy in (-1, 0, 1):
        for dx in (-1, 0, 1):
            off = pad + dy * W + dx                      # static python int
            tap = apad_ref[off:off + n, :].astype(cdtype)
            if dx == -1:
                tap = jnp.where(mask_l, tap, jnp.zeros_like(tap))
            elif dx == 1:
                tap = jnp.where(mask_r, tap, jnp.zeros_like(tap))
            patch_ref[:, k * Cp:(k + 1) * Cp] = tap
            k += 1


def _rcu_kernel(x_ref, w1_ref, b1_ref, w2_ref, b2_ref, o_ref,
                apad_ref, patch_ref, *, H, W, Cp, pad, cdtype):
    n = H * W

    # Clear only the halo strips (the interior is fully overwritten below).
    # Done every grid step (not under program_id == 0) so the "parallel" batch
    # axis stays correct when the grid is sharded across TensorCores.
    apad_ref[:pad, :] = jnp.zeros((pad, Cp), jnp.float32)
    apad_ref[pad + n:, :] = jnp.zeros((pad, Cp), jnp.float32)

    # Horizontal-boundary masks (column index of every flattened pixel).
    col = lax.broadcasted_iota(jnp.int32, (n, Cp), 0) % W
    mask_l = col > 0            # tap at dx = -1 is invalid in column 0
    mask_r = col < (W - 1)      # tap at dx = +1 is invalid in column W-1

    build = functools.partial(_build_patches, apad_ref, patch_ref,
                              mask_l, mask_r, H=H, W=W, Cp=Cp, pad=pad,
                              cdtype=cdtype)

    # ---- conv1(relu(x)): ReLU fused into the single aligned interior store.
    apad_ref[pad:pad + n, :] = jnp.maximum(x_ref[0], 0.0).astype(jnp.float32)
    build()
    y1 = jnp.dot(patch_ref[...], w1_ref[...],
                 preferred_element_type=jnp.float32) + b1_ref[...]

    # ---- conv2(relu(y1))
    apad_ref[pad:pad + n, :] = jnp.maximum(y1, 0.0)
    build()
    y2 = jnp.dot(patch_ref[...], w2_ref[...],
                 preferred_element_type=jnp.float32) + b2_ref[...]

    # ---- residual add in f32, lane-dense store.
    o_ref[0] = (y2 + x_ref[0].astype(jnp.float32)).astype(o_ref.dtype)


def residual_conv_unit_nhwc(x, w1, b1, w2, b2, *, compute_dtype=jnp.bfloat16):
    """NHWC entry point (preferred: NHWC callers skip two HBM transposes).
    w1/w2 are HWIO (3, 3, C, C); b1/b2 are (C,)."""
    B, H, W, C = x.shape
    Cp = max(128, _round_up(C, 128))
    if Cp != C:
        # Pad channels so the lane dim is dense: padded input channels are zero
        # and padded weight rows/cols are zero, so results are unchanged.
        x = jnp.pad(x, ((0, 0), (0, 0), (0, 0), (0, Cp - C)))
        w1 = jnp.pad(w1, ((0, 0), (0, 0), (0, Cp - C), (0, Cp - C)))
        w2 = jnp.pad(w2, ((0, 0), (0, 0), (0, Cp - C), (0, Cp - C)))
        b1 = jnp.pad(b1, ((0, Cp - C),))
        b2 = jnp.pad(b2, ((0, Cp - C),))

    n = H * W
    pad = _round_up(W + 1, 8)        # flat halo rows; keeps interior store aligned

    xf = x.reshape(B, n, Cp)
    w1f = w1.reshape(9 * Cp, Cp).astype(compute_dtype)
    w2f = w2.reshape(9 * Cp, Cp).astype(compute_dtype)
    b1f = b1.reshape(1, Cp).astype(jnp.float32)
    b2f = b2.reshape(1, Cp).astype(jnp.float32)

    kernel = functools.partial(_rcu_kernel, H=H, W=W, Cp=Cp, pad=pad,
                               cdtype=compute_dtype)

    # TODO(synk): for production DPT sizes (e.g. 96x96x256) add a row-tile grid
    # axis with a 1-row halo so the im2col scratch fits v7x's 64 MiB VMEM.
    out = pl.pallas_call(
        kernel,
        out_shape=jax.ShapeDtypeStruct((B, n, Cp), x.dtype),
        grid_spec=pltpu.PrefetchScalarGridSpec(
            num_scalar_prefetch=0,
            grid=(B,),
            in_specs=[
                pl.BlockSpec((1, n, Cp), lambda b: (b, 0, 0)),
                pl.BlockSpec((9 * Cp, Cp), lambda b: (0, 0)),
                pl.BlockSpec((1, Cp), lambda b: (0, 0)),
                pl.BlockSpec((9 * Cp, Cp), lambda b: (0, 0)),
                pl.BlockSpec((1, Cp), lambda b: (0, 0)),
            ],
            out_specs=pl.BlockSpec((1, n, Cp), lambda b: (b, 0, 0)),
            scratch_shapes=[
                pltpu.VMEM((2 * pad + n, Cp), jnp.float32),   # zero-haloed act
                pltpu.VMEM((n, 9 * Cp), compute_dtype),       # im2col patches
            ],
        ),
        compiler_params=pltpu.CompilerParams(
            dimension_semantics=("parallel",),
            vmem_limit_bytes=64 * 1024 * 1024,
        ),
    )(xf, w1f, b1f, w2f, b2f)

    return out.reshape(B, H, W, Cp)[..., :C]


def residual_conv_unit(x_nchw, w1, b1, w2, b2, *, compute_dtype=jnp.bfloat16):
    """PyTorch-semantics entry point: x is NCHW, weights are HWIO."""
    x_nhwc = jnp.transpose(x_nchw, (0, 2, 3, 1))
    y_nhwc = residual_conv_unit_nhwc(x_nhwc, w1, b1, w2, b2,
                                     compute_dtype=compute_dtype)
    return jnp.transpose(y_nhwc, (0, 3, 1, 2))


def _reference_nchw(x_nchw, w1, b1, w2, b2):
    """Pure-JAX reference mirroring the PyTorch forward."""
    x = jnp.transpose(x_nchw, (0, 2, 3, 1))  # NHWC

    def conv(h, w, b):
        y = lax.conv_general_dilated(
            h, w, window_strides=(1, 1), padding="SAME",
            dimension_numbers=("NHWC", "HWIO", "NHWC"))
        return y + b.reshape(1, 1, 1, -1)

    h = jnp.maximum(x, 0.0)
    h = conv(h, w1, b1)
    h = jnp.maximum(h, 0.0)
    h = conv(h, w2, b2)
    out = h + x
    return jnp.transpose(out, (0, 3, 1, 2))


if __name__ == "__main__":
    B, C, H, W = 2, 4, 16, 16
    key = jax.random.PRNGKey(0)
    kx, kw1, kb1, kw2, kb2 = jax.random.split(key, 5)

    x = jax.random.normal(kx, (B, C, H, W), dtype=jnp.float32)
    w1 = 0.1 * jax.random.normal(kw1, (3, 3, C, C), dtype=jnp.float32)  # HWIO
    b1 = 0.05 * jax.random.normal(kb1, (C,), dtype=jnp.float32)
    w2 = 0.1 * jax.random.normal(kw2, (3, 3, C, C), dtype=jnp.float32)  # HWIO
    b2 = 0.05 * jax.random.normal(kb2, (C,), dtype=jnp.float32)

    ref = jax.block_until_ready(_reference_nchw(x, w1, b1, w2, b2))

    # Default bf16 MXU path (f32 accumulation) -- bf16-appropriate tolerance.
    out_bf16 = jax.block_until_ready(residual_conv_unit(x, w1, b1, w2, b2))
    assert out_bf16.shape == (B, C, H, W)
    assert jnp.allclose(out_bf16, ref, atol=3e-2, rtol=3e-2), "bf16 path mismatch"

    # f32 compute path -- tight check of the tap/mask/weight-reshape indexing.
    out_f32 = jax.block_until_ready(
        residual_conv_unit(x, w1, b1, w2, b2, compute_dtype=jnp.float32))
    assert jnp.allclose(out_f32, ref, atol=5e-3, rtol=5e-3), "f32 path mismatch"

    print("KERNEL_OK")
</pallas_src>

<mosaic_0001>
module attributes {stable_mosaic.version = 11 : i64} {
  func.func @_rcu_kernel(%arg0: i32, %arg1: memref<1x256x128xf32, #tpu.memory_space<vmem>>, %arg2: memref<1152x128xbf16, #tpu.memory_space<vmem>>, %arg3: memref<1x128xf32, #tpu.memory_space<vmem>>, %arg4: memref<1152x128xbf16, #tpu.memory_space<vmem>>, %arg5: memref<1x128xf32, #tpu.memory_space<vmem>>, %arg6: memref<1x256x128xf32, #tpu.memory_space<vmem>>, %arg7: memref<304x128xf32, #tpu.memory_space<vmem>>, %arg8: memref<256x1152xbf16, #tpu.memory_space<vmem>>) attributes {dimension_semantics = [#tpu.dimension_semantics<parallel>], iteration_bounds = array<i64: 2>, scalar_prefetch = 0 : i64, scratch_operands = 2 : i64, tpu.core_type = #tpu.core_type<tc>, window_params = [{transform_indices = @transform_0, window_bounds = array<i64: 1, 256, 128>}, {pipeline_mode = #tpu.pipeline_mode<synchronous>, transform_indices = @transform_1, window_bounds = array<i64: 1152, 128>}, {pipeline_mode = #tpu.pipeline_mode<synchronous>, transform_indices = @transform_2, window_bounds = array<i64: 1, 128>}, {pipeline_mode = #tpu.pipeline_mode<synchronous>, transform_indices = @transform_3, window_bounds = array<i64: 1152, 128>}, {pipeline_mode = #tpu.pipeline_mode<synchronous>, transform_indices = @transform_4, window_bounds = array<i64: 1, 128>}, {transform_indices = @transform_5, window_bounds = array<i64: 1, 256, 128>}]} {
    %cst = arith.constant 0.000000e+00 : f32
    %0 = vector.broadcast %cst : f32 to vector<24x128xf32>
    %c0 = arith.constant 0 : index
    %c0_0 = arith.constant 0 : index
    %1 = vector.load %arg7[%c0, %c0_0] : memref<304x128xf32, #tpu.memory_space<vmem>>, vector<24x128xf32>
    tpu.vector_store %arg7[%c0, %c0_0], %0 {strides = array<i32>} : memref<304x128xf32, #tpu.memory_space<vmem>>, vector<24x128xf32>,
    %cst_1 = arith.constant 0.000000e+00 : f32
    %2 = vector.broadcast %cst_1 : f32 to vector<24x128xf32>
    %c280 = arith.constant 280 : index
    %c0_2 = arith.constant 0 : index
    %3 = vector.load %arg7[%c280, %c0_2] : memref<304x128xf32, #tpu.memory_space<vmem>>, vector<24x128xf32>
    tpu.vector_store %arg7[%c280, %c0_2], %2 {strides = array<i32>} : memref<304x128xf32, #tpu.memory_space<vmem>>, vector<24x128xf32>,
    %4 = tpu.iota {dimensions = array<i32: 0>} : vector<256x128xi32>
    %c16_i32 = arith.constant 16 : i32
    %c0_i32 = arith.constant 0 : i32
    %5 = arith.cmpi eq, %c16_i32, %c0_i32 : i32
    %c1_i32 = arith.constant 1 : i32
    %6 = arith.select %5, %c1_i32, %c16_i32 : i32
    %7 = vector.broadcast %6 : i32 to vector<256x128xi32>
    %8 = arith.remsi %4, %7 : vector<256x128xi32>
    %c0_i32_3 = arith.constant 0 : i32
    %9 = vector.broadcast %c0_i32_3 : i32 to vector<256x128xi32>
    %10 = arith.cmpi ne, %8, %9 : vector<256x128xi32>
    %c0_i32_4 = arith.constant 0 : i32
    %11 = vector.broadcast %c0_i32_4 : i32 to vector<256x128xi32>
    %12 = arith.cmpi slt, %8, %11 : vector<256x128xi32>
    %c0_i32_5 = arith.constant 0 : i32
    %13 = arith.cmpi slt, %6, %c0_i32_5 : i32
    %14 = vector.broadcast %13 : i1 to vector<256x128xi1>
    %15 = vector.broadcast %14 : vector<256x128xi1> to vector<256x128xi1>
    %16 = arith.xori %12, %15 : vector<256x128xi1>
    %17 = arith.andi %16, %10 : vector<256x128xi1>
    %18 = vector.broadcast %6 : i32 to vector<256x128xi32>
    %19 = arith.addi %8, %18 : vector<256x128xi32>
    %20 = arith.select %17, %19, %8 : vector<256x128xi1>, vector<256x128xi32>
    %c0_i32_6 = arith.constant 0 : i32
    %21 = vector.broadcast %c0_i32_6 : i32 to vector<256x128xi32>
    %22 = arith.cmpi sgt, %20, %21 : vector<256x128xi32>
    %c15_i32 = arith.constant 15 : i32
    %23 = vector.broadcast %c15_i32 : i32 to vector<256x128xi32>
    %24 = arith.cmpi slt, %20, %23 : vector<256x128xi32>
    %c0_7 = arith.constant 0 : index
    %c0_8 = arith.constant 0 : index
    %c0_9 = arith.constant 0 : index
    %25 = vector.load %arg1[%c0_7, %c0_8, %c0_9] : memref<1x256x128xf32, #tpu.memory_space<vmem>>, vector<1x256x128xf32>
    %26 = vector.shape_cast %25 : vector<1x256x128xf32> to vector<256x128xf32>
    %cst_10 = arith.constant 0.000000e+00 : f32
    %27 = vector.broadcast %cst_10 : f32 to vector<256x128xf32>
    %28 = arith.maximumf %26, %27 : vector<256x128xf32>
    %c24 = arith.constant 24 : index
    %c0_11 = arith.constant 0 : index
    %29 = vector.load %arg7[%c24, %c0_11] : memref<304x128xf32, #tpu.memory_space<vmem>>, vector<256x128xf32>
    tpu.vector_store %arg7[%c24, %c0_11], %28 {strides = array<i32>} : memref<304x128xf32, #tpu.memory_space<vmem>>, vector<256x128xf32>,
    %c7 = arith.constant 7 : index
    %c0_12 = arith.constant 0 : index
    %30 = vector.load %arg7[%c7, %c0_12] : memref<304x128xf32, #tpu.memory_space<vmem>>, vector<256x128xf32>
    %31 = arith.truncf %30 : vector<256x128xf32> to vector<256x128xbf16>
    %cst_13 = arith.constant 0.000000e+00 : bf16
    %32 = vector.broadcast %cst_13 : bf16 to vector<256x128xbf16>
    %33 = arith.select %22, %31, %32 : vector<256x128xi1>, vector<256x128xbf16>
    %c0_14 = arith.constant 0 : index
    %c0_15 = arith.constant 0 : index
    %34 = vector.load %arg8[%c0_14, %c0_15] : memref<256x1152xbf16, #tpu.memory_space<vmem>>, vector<256x128xbf16>
    tpu.vector_store %arg8[%c0_14, %c0_15], %33 {strides = array<i32>} : memref<256x1152xbf16, #tpu.memory_space<vmem>>, vector<256x128xbf16>,
    %c8 = arith.constant 8 : index
    %c0_16 = arith.constant 0 : index
    %35 = vector.load %arg7[%c8, %c0_16] : memref<304x128xf32, #tpu.memory_space<vmem>>, vector<256x128xf32>
    %36 = arith.truncf %35 : vector<256x128xf32> to vector<256x128xbf16>
    %c0_17 = arith.constant 0 : index
    %c128 = arith.constant 128 : index
    %37 = vector.load %arg8[%c0_17, %c128] : memref<256x1152xbf16, #tpu.memory_space<vmem>>, vector<256x128xbf16>
    tpu.vector_store %arg8[%c0_17, %c128], %36 {strides = array<i32>} : memref<256x1152xbf16, #tpu.memory_space<vmem>>, vector<256x128xbf16>,
    %c9 = arith.constant 9 : index
    %c0_18 = arith.constant 0 : index
    %38 = vector.load %arg7[%c9, %c0_18] : memref<304x128xf32, #tpu.memory_space<vmem>>, vector<256x128xf32>
    %39 = arith.truncf %38 : vector<256x128xf32> to vector<256x128xbf16>
    %cst_19 = arith.constant 0.000000e+00 : bf16
    %40 = vector.broadcast %cst_19 : bf16 to vector<256x128xbf16>
    %41 = arith.select %24, %39, %40 : vector<256x128xi1>, vector<256x128xbf16>
    %c0_20 = arith.constant 0 : index
    %c256 = arith.constant 256 : index
    %42 = vector.load %arg8[%c0_20, %c256] : memref<256x1152xbf16, #tpu.memory_space<vmem>>, vector<256x128xbf16>
    tpu.vector_store %arg8[%c0_20, %c256], %41 {strides = array<i32>} : memref<256x1152xbf16, #tpu.memory_space<vmem>>, vector<256x128xbf16>,
    %c23 = arith.constant 23 : index
    %c0_21 = arith.constant 0 : index
    %43 = vector.load %arg7[%c23, %c0_21] : memref<304x128xf32, #tpu.memory_space<vmem>>, vector<256x128xf32>
    %44 = arith.truncf %43 : vector<256x128xf32> to vector<256x128xbf16>
    %cst_22 = arith.constant 0.000000e+00 : bf16
    %45 = vector.broadcast %cst_22 : bf16 to vector<256x128xbf16>
    %46 = arith.select %22, %44, %45 : vector<256x128xi1>, vector<256x128xbf16>
    %c0_23 = arith.constant 0 : index
    %c384 = arith.constant 384 : index
    %47 = vector.load %arg8[%c0_23, %c384] : memref<256x1152xbf16, #tpu.memory_space<vmem>>, vector<256x128xbf16>
    tpu.vector_store %arg8[%c0_23, %c384], %46 {strides = array<i32>} : memref<256x1152xbf16, #tpu.memory_space<vmem>>, vector<256x128xbf16>,
    %c24_24 = arith.constant 24 : index
    %c0_25 = arith.constant 0 : index
    %48 = vector.load %arg7[%c24_24, %c0_25] : memref<304x128xf32, #tpu.memory_space<vmem>>, vector<256x128xf32>
    %49 = arith.truncf %48 : vector<256x128xf32> to vector<256x128xbf16>
    %c0_26 = arith.constant 0 : index
    %c512 = arith.constant 512 : index
    %50 = vector.load %arg8[%c0_26, %c512] : memref<256x1152xbf16, #tpu.memory_space<vmem>>, vector<256x128xbf16>
    tpu.vector_store %arg8[%c0_26, %c512], %49 {strides = array<i32>} : memref<256x1152xbf16, #tpu.memory_space<vmem>>, vector<256x128xbf16>,
    %c25 = arith.constant 25 : index
    %c0_27 = arith.constant 0 : index
    %51 = vector.load %arg7[%c25, %c0_27] : memref<304x128xf32, #tpu.memory_space<vmem>>, vector<256x128xf32>
    %52 = arith.truncf %51 : vector<256x128xf32> to vector<256x128xbf16>
    %cst_28 = arith.constant 0.000000e+00 : bf16
    %53 = vector.broadcast %cst_28 : bf16 to vector<256x128xbf16>
    %54 = arith.select %24, %52, %53 : vector<256x128xi1>, vector<256x128xbf16>
    %c0_29 = arith.constant 0 : index
    %c640 = arith.constant 640 : index
    %55 = vector.load %arg8[%c0_29, %c640] : memref<256x1152xbf16, #tpu.memory_space<vmem>>, vector<256x128xbf16>
    tpu.vector_store %arg8[%c0_29, %c640], %54 {strides = array<i32>} : memref<256x1152xbf16, #tpu.memory_space<vmem>>, vector<256x128xbf16>,
    %c39 = arith.constant 39 : index
    %c0_30 = arith.constant 0 : index
    %56 = vector.load %arg7[%c39, %c0_30] : memref<304x128xf32, #tpu.memory_space<vmem>>, vector<256x128xf32>
    %57 = arith.truncf %56 : vector<256x128xf32> to vector<256x128xbf16>
    %cst_31 = arith.constant 0.000000e+00 : bf16
    %58 = vector.broadcast %cst_31 : bf16 to vector<256x128xbf16>
    %59 = arith.select %22, %57, %58 : vector<256x128xi1>, vector<256x128xbf16>
    %c0_32 = arith.constant 0 : index
    %c768 = arith.constant 768 : index
    %60 = vector.load %arg8[%c0_32, %c768] : memref<256x1152xbf16, #tpu.memory_space<vmem>>, vector<256x128xbf16>
    tpu.vector_store %arg8[%c0_32, %c768], %59 {strides = array<i32>} : memref<256x1152xbf16, #tpu.memory_space<vmem>>, vector<256x128xbf16>,
    %c40 = arith.constant 40 : index
    %c0_33 = arith.constant 0 : index
    %61 = vector.load %arg7[%c40, %c0_33] : memref<304x128xf32, #tpu.memory_space<vmem>>, vector<256x128xf32>
    %62 = arith.truncf %61 : vector<256x128xf32> to vector<256x128xbf16>
    %c0_34 = arith.constant 0 : index
    %c896 = arith.constant 896 : index
    %63 = vector.load %arg8[%c0_34, %c896] : memref<256x1152xbf16, #tpu.memory_space<vmem>>, vector<256x128xbf16>
    tpu.vector_store %arg8[%c0_34, %c896], %62 {strides = array<i32>} : memref<256x1152xbf16, #tpu.memory_space<vmem>>, vector<256x128xbf16>,
    %c41 = arith.constant 41 : index
    %c0_35 = arith.constant 0 : index
    %64 = vector.load %arg7[%c41, %c0_35] : memref<304x128xf32, #tpu.memory_space<vmem>>, vector<256x128xf32>
    %65 = arith.truncf %64 : vector<256x128xf32> to vector<256x128xbf16>
    %cst_36 = arith.constant 0.000000e+00 : bf16
    %66 = vector.broadcast %cst_36 : bf16 to vector<256x128xbf16>
    %67 = arith.select %24, %65, %66 : vector<256x128xi1>, vector<256x128xbf16>
    %c0_37 = arith.constant 0 : index
    %c1024 = arith.constant 1024 : index
    %68 = vector.load %arg8[%c0_37, %c1024] : memref<256x1152xbf16, #tpu.memory_space<vmem>>, vector<256x128xbf16>
    tpu.vector_store %arg8[%c0_37, %c1024], %67 {strides = array<i32>} : memref<256x1152xbf16, #tpu.memory_space<vmem>>, vector<256x128xbf16>,
    %c0_38 = arith.constant 0 : index
    %c0_39 = arith.constant 0 : index
    %69 = vector.load %arg8[%c0_38, %c0_39] : memref<256x1152xbf16, #tpu.memory_space<vmem>>, vector<256x1152xbf16>
    %c0_40 = arith.constant 0 : index
    %c0_41 = arith.constant 0 : index
    %70 = vector.load %arg2[%c0_40, %c0_41] : memref<1152x128xbf16, #tpu.memory_space<vmem>>, vector<1152x128xbf16>
    %cst_42 = arith.constant dense<0.000000e+00> : vector<256x128xf32>
    %71 = tpu.matmul %69, %70, %cst_42 {dimension_numbers = #tpu.dot_dimension_numbers<[1], [0], [0], [1], [0, 0, 1, 1], [], []>} : vector<256x1152xbf16>, vector<1152x128xbf16>, vector<256x128xf32> -> vector<256x128xf32>
    %c0_43 = arith.constant 0 : index
    %c0_44 = arith.constant 0 : index
    %72 = vector.load %arg3[%c0_43, %c0_44] : memref<1x128xf32, #tpu.memory_space<vmem>>, vector<1x128xf32>
    %73 = vector.broadcast %72 : vector<1x128xf32> to vector<256x128xf32>
    %74 = arith.addf %71, %73 : vector<256x128xf32>
    %cst_45 = arith.constant 0.000000e+00 : f32
    %75 = vector.broadcast %cst_45 : f32 to vector<256x128xf32>
    %76 = arith.maximumf %74, %75 : vector<256x128xf32>
    %c24_46 = arith.constant 24 : index
    %c0_47 = arith.constant 0 : index
    %77 = vector.load %arg7[%c24_46, %c0_47] : memref<304x128xf32, #tpu.memory_space<vmem>>, vector<256x128xf32>
    tpu.vector_store %arg7[%c24_46, %c0_47], %76 {strides = array<i32>} : memref<304x128xf32, #tpu.memory_space<vmem>>, vector<256x128xf32>,
    %c7_48 = arith.constant 7 : index
    %c0_49 = arith.constant 0 : index
    %78 = vector.load %arg7[%c7_48, %c0_49] : memref<304x128xf32, #tpu.memory_space<vmem>>, vector<256x128xf32>
    %79 = arith.truncf %78 : vector<256x128xf32> to vector<256x128xbf16>
    %cst_50 = arith.constant 0.000000e+00 : bf16
    %80 = vector.broadcast %cst_50 : bf16 to vector<256x128xbf16>
    %81 = arith.select %22, %79, %80 : vector<256x128xi1>, vector<256x128xbf16>
    %c0_51 = arith.constant 0 : index
    %c0_52 = arith.constant 0 : index
    %82 = vector.load %arg8[%c0_51, %c0_52] : memref<256x1152xbf16, #tpu.memory_space<vmem>>, vector<256x128xbf16>
    tpu.vector_store %arg8[%c0_51, %c0_52], %81 {strides = array<i32>} : memref<256x1152xbf16, #tpu.memory_space<vmem>>, vector<256x128xbf16>,
    %c8_53 = arith.constant 8 : index
    %c0_54 = arith.constant 0 : index
    %83 = vector.load %arg7[%c8_53, %c0_54] : memref<304x128xf32, #tpu.memory_space<vmem>>, vector<256x128xf32>
    %84 = arith.truncf %83 : vector<256x128xf32> to vector<256x128xbf16>
    %c0_55 = arith.constant 0 : index
    %c128_56 = arith.constant 128 : index
    %85 = vector.load %arg8[%c0_55, %c128_56] : memref<256x1152xbf16, #tpu.memory_space<vmem>>, vector<256x128xbf16>
    tpu.vector_store %arg8[%c0_55, %c128_56], %84 {strides = array<i32>} : memref<256x1152xbf16, #tpu.memory_space<vmem>>, vector<256x128xbf16>,
    %c9_57 = arith.constant 9 : index
    %c0_58 = arith.constant 0 : index
    %86 = vector.load %arg7[%c9_57, %c0_58] : memref<304x128xf32, #tpu.memory_space<vmem>>, vector<256x128xf32>
    %87 = arith.truncf %86 : vector<256x128xf32> to vector<256x128xbf16>
    %cst_59 = arith.constant 0.000000e+00 : bf16
    %88 = vector.broadcast %cst_59 : bf16 to vector<256x128xbf16>
    %89 = arith.select %24, %87, %88 : vector<256x128xi1>, vector<256x128xbf16>
    %c0_60 = arith.constant 0 : index
    %c256_61 = arith.constant 256 : index
    %90 = vector.load %arg8[%c0_60, %c256_61] : memref<256x1152xbf16, #tpu.memory_space<vmem>>, vector<256x128xbf16>
    tpu.vector_store %arg8[%c0_60, %c256_61], %89 {strides = array<i32>} : memref<256x1152xbf16, #tpu.memory_space<vmem>>, vector<256x128xbf16>,
    %c23_62 = arith.constant 23 : index
    %c0_63 = arith.constant 0 : index
    %91 = vector.load %arg7[%c23_62, %c0_63] : memref<304x128xf32, #tpu.memory_space<vmem>>, vector<256x128xf32>
    %92 = arith.truncf %91 : vector<256x128xf32> to vector<256x128xbf16>
    %cst_64 = arith.constant 0.000000e+00 : bf16
    %93 = vector.broadcast %cst_64 : bf16 to vector<256x128xbf16>
    %94 = arith.select %22, %92, %93 : vector<256x128xi1>, vector<256x128xbf16>
    %c0_65 = arith.constant 0 : index
    %c384_66 = arith.constant 384 : index
    %95 = vector.load %arg8[%c0_65, %c384_66] : memref<256x1152xbf16, #tpu.memory_space<vmem>>, vector<256x128xbf16>
    tpu.vector_store %arg8[%c0_65, %c384_66], %94 {strides = array<i32>} : memref<256x1152xbf16, #tpu.memory_space<vmem>>, vector<256x128xbf16>,
    %c24_67 = arith.constant 24 : index
    %c0_68 = arith.constant 0 : index
    %96 = vector.load %arg7[%c24_67, %c0_68] : memref<304x128xf32, #tpu.memory_space<vmem>>, vector<256x128xf32>
    %97 = arith.truncf %96 : vector<256x128xf32> to vector<256x128xbf16>
    %c0_69 = arith.constant 0 : index
    %c512_70 = arith.constant 512 : index
    %98 = vector.load %arg8[%c0_69, %c512_70] : memref<256x1152xbf16, #tpu.memory_space<vmem>>, vector<256x128xbf16>
    tpu.vector_store %arg8[%c0_69, %c512_70], %97 {strides = array<i32>} : memref<256x1152xbf16, #tpu.memory_space<vmem>>, vector<256x128xbf16>,
    %c25_71 = arith.constant 25 : index
    %c0_72 = arith.constant 0 : index
    %99 = vector.load %arg7[%c25_71, %c0_72] : memref<304x128xf32, #tpu.memory_space<vmem>>, vector<256x128xf32>
    %100 = arith.truncf %99 : vector<256x128xf32> to vector<256x128xbf16>
    %cst_73 = arith.constant 0.000000e+00 : bf16
    %101 = vector.broadcast %cst_73 : bf16 to vector<256x128xbf16>
    %102 = arith.select %24, %100, %101 : vector<256x128xi1>, vector<256x128xbf16>
    %c0_74 = arith.constant 0 : index
    %c640_75 = arith.constant 640 : index
    %103 = vector.load %arg8[%c0_74, %c640_75] : memref<256x1152xbf16, #tpu.memory_space<vmem>>, vector<256x128xbf16>
    tpu.vector_store %arg8[%c0_74, %c640_75], %102 {strides = array<i32>} : memref<256x1152xbf16, #tpu.memory_space<vmem>>, vector<256x128xbf16>,
    %c39_76 = arith.constant 39 : index
    %c0_77 = arith.constant 0 : index
    %104 = vector.load %arg7[%c39_76, %c0_77] : memref<304x128xf32, #tpu.memory_space<vmem>>, vector<256x128xf32>
    %105 = arith.truncf %104 : vector<256x128xf32> to vector<256x128xbf16>
    %cst_78 = arith.constant 0.000000e+00 : bf16
    %106 = vector.broadcast %cst_78 : bf16 to vector<256x128xbf16>
    %107 = arith.select %22, %105, %106 : vector<256x128xi1>, vector<256x128xbf16>
    %c0_79 = arith.constant 0 : index
    %c768_80 = arith.constant 768 : index
    %108 = vector.load %arg8[%c0_79, %c768_80] : memref<256x1152xbf16, #tpu.memory_space<vmem>>, vector<256x128xbf16>
    tpu.vector_store %arg8[%c0_79, %c768_80], %107 {strides = array<i32>} : memref<256x1152xbf16, #tpu.memory_space<vmem>>, vector<256x128xbf16>,
    %c40_81 = arith.constant 40 : index
    %c0_82 = arith.constant 0 : index
    %109 = vector.load %arg7[%c40_81, %c0_82] : memref<304x128xf32, #tpu.memory_space<vmem>>, vector<256x128xf32>
    %110 = arith.truncf %109 : vector<256x128xf32> to vector<256x128xbf16>
    %c0_83 = arith.constant 0 : index
    %c896_84 = arith.constant 896 : index
    %111 = vector.load %arg8[%c0_83, %c896_84] : memref<256x1152xbf16, #tpu.memory_space<vmem>>, vector<256x128xbf16>
    tpu.vector_store %arg8[%c0_83, %c896_84], %110 {strides = array<i32>} : memref<256x1152xbf16, #tpu.memory_space<vmem>>, vector<256x128xbf16>,
    %c41_85 = arith.constant 41 : index
    %c0_86 = arith.constant 0 : index
    %112 = vector.load %arg7[%c41_85, %c0_86] : memref<304x128xf32, #tpu.memory_space<vmem>>, vector<256x128xf32>
    %113 = arith.truncf %112 : vector<256x128xf32> to vector<256x128xbf16>
    %cst_87 = arith.constant 0.000000e+00 : bf16
    %114 = vector.broadcast %cst_87 : bf16 to vector<256x128xbf16>
    %115 = arith.select %24, %113, %114 : vector<256x128xi1>, vector<256x128xbf16>
    %c0_88 = arith.constant 0 : index
    %c1024_89 = arith.constant 1024 : index
    %116 = vector.load %arg8[%c0_88, %c1024_89] : memref<256x1152xbf16, #tpu.memory_space<vmem>>, vector<256x128xbf16>
    tpu.vector_store %arg8[%c0_88, %c1024_89], %115 {strides = array<i32>} : memref<256x1152xbf16, #tpu.memory_space<vmem>>, vector<256x128xbf16>,
    %c0_90 = arith.constant 0 : index
    %c0_91 = arith.constant 0 : index
    %117 = vector.load %arg8[%c0_90, %c0_91] : memref<256x1152xbf16, #tpu.memory_space<vmem>>, vector<256x1152xbf16>
    %c0_92 = arith.constant 0 : index
    %c0_93 = arith.constant 0 : index
    %118 = vector.load %arg4[%c0_92, %c0_93] : memref<1152x128xbf16, #tpu.memory_space<vmem>>, vector<1152x128xbf16>
    %cst_94 = arith.constant dense<0.000000e+00> : vector<256x128xf32>
    %119 = tpu.matmul %117, %118, %cst_94 {dimension_numbers = #tpu.dot_dimension_numbers<[1], [0], [0], [1], [0, 0, 1, 1], [], []>} : vector<256x1152xbf16>, vector<1152x128xbf16>, vector<256x128xf32> -> vector<256x128xf32>
    %c0_95 = arith.constant 0 : index
    %c0_96 = arith.constant 0 : index
    %120 = vector.load %arg5[%c0_95, %c0_96] : memref<1x128xf32, #tpu.memory_space<vmem>>, vector<1x128xf32>
    %121 = vector.broadcast %120 : vector<1x128xf32> to vector<256x128xf32>
    %122 = arith.addf %119, %121 : vector<256x128xf32>
    %c0_97 = arith.constant 0 : index
    %c0_98 = arith.constant 0 : index
    %c0_99 = arith.constant 0 : index
    %123 = vector.load %arg1[%c0_97, %c0_98, %c0_99] : memref<1x256x128xf32, #tpu.memory_space<vmem>>, vector<1x256x128xf32>
    %124 = vector.shape_cast %123 : vector<1x256x128xf32> to vector<256x128xf32>
    %125 = arith.addf %122, %124 : vector<256x128xf32>
    %c0_100 = arith.constant 0 : index
    %c0_101 = arith.constant 0 : index
    %c0_102 = arith.constant 0 : index
    %126 = vector.load %arg6[%c0_100, %c0_101, %c0_102] : memref<1x256x128xf32, #tpu.memory_space<vmem>>, vector<1x256x128xf32>
    %127 = vector.shape_cast %126 : vector<1x256x128xf32> to vector<256x128xf32>
    %128 = vector.shape_cast %125 : vector<256x128xf32> to vector<1x256x128xf32>
    tpu.vector_store %arg6[%c0_100, %c0_101, %c0_102], %128 {strides = array<i32>} : memref<1x256x128xf32, #tpu.memory_space<vmem>>, vector<1x256x128xf32>,
    return
  }
  func.func @transform_0(%arg0: i32) -> (i32, i32, i32) {
    %c0_i32 = arith.constant 0 : i32
    %c0_i32_0 = arith.constant 0 : i32
    %c0_i32_1 = arith.constant 0 : i32
    return %arg0, %c0_i32, %c0_i32_0 : i32, i32, i32
  }
  func.func @transform_1(%arg0: i32) -> (i32, i32) {
    %c0_i32 = arith.constant 0 : i32
    %c0_i32_0 = arith.constant 0 : i32
    %c0_i32_1 = arith.constant 0 : i32
    return %c0_i32, %c0_i32_0 : i32, i32
  }
  func.func @transform_2(%arg0: i32) -> (i32, i32) {
    %c0_i32 = arith.constant 0 : i32
    %c0_i32_0 = arith.constant 0 : i32
    %c0_i32_1 = arith.constant 0 : i32
    return %c0_i32, %c0_i32_0 : i32, i32
  }
  func.func @transform_3(%arg0: i32) -> (i32, i32) {
    %c0_i32 = arith.constant 0 : i32
    %c0_i32_0 = arith.constant 0 : i32
    %c0_i32_1 = arith.constant 0 : i32
    return %c0_i32, %c0_i32_0 : i32, i32
  }
  func.func @transform_4(%arg0: i32) -> (i32, i32) {
    %c0_i32 = arith.constant 0 : i32
    %c0_i32_0 = arith.constant 0 : i32
    %c0_i32_1 = arith.constant 0 : i32
    return %c0_i32, %c0_i32_0 : i32, i32
  }
  func.func @transform_5(%arg0: i32) -> (i32, i32, i32) {
    %c0_i32 = arith.constant 0 : i32
    %c0_i32_0 = arith.constant 0 : i32
    %c0_i32_1 = arith.constant 0 : i32
    return %arg0, %c0_i32, %c0_i32_0 : i32, i32, i32
  }
}

</mosaic_0001>

<bundles_post_ra>
// kernel: tpu_custom_call.1
= control target key start
LH: loop header
LB: loop body
LE: loop exit
PB: predicated region body
PF: predicated region fallthrough
CT: control target
= control target key end

     0   :  { %10 = vsyncpa [#allocation5], 0  ;;  %s10087_s0 = inlined_call_operand.hbm [shape: f32[2,256,128], index: 0, kind: input, shape index: {}]   ;;  %s10088_s1 = inlined_call_operand.hbm [shape: bf16[1152,128], index: 1, kind: input, shape index: {}]   ;;  %s10089_s2 = inlined_call_operand.hbm [shape: f32[1,128], index: 2, kind: input, shape index: {}]   ;;  %s10090_s3 = inlined_call_operand.hbm [shape: bf16[1152,128], index: 3, kind: input, shape index: {}]   ;;  %s10091_s4 = inlined_call_operand.hbm [shape: f32[1,128], index: 4, kind: input, shape index: {}]   ;;  %s10092_s5 = inlined_call_operand.hbm [shape: f32[2,256,128], index: 5, kind: output, shape index: {}]  }
   0x1   :  { %12 = vsyncpa [#allocation5 + $0x1], 0 }
   0x2   :  { %13 = vsyncpa [#allocation8], 0 }
   0x3   :  { %14 = vsyncpa [#allocation11], 0 }
   0x4   :  { %15 = vsyncpa [#allocation6], 0 }
   0x5   :  { %17 = vsyncpa [#allocation6 + $0x1], 0  ;;  %s7772_s18 = smov 0   ;;  %s7774_s19 = smov 0  }
   0x6   :  { %s7776_s20 = smov 0   ;;  %s7778_s21 = smov 0  }
   0x7 LB: > { %s7793_s22 = sadd.s32 4294967295, %s7724_s21   ;;  %s5832_s23 = sadd.s32 4294967294, %s7724_s21   ;;  %s7724_s21 = sphi %s7778_s21, %s10556_s21   ;;  %s7720_s20 = sphi %s7776_s20, %s10555_s20   ;;  %s7716_s19 = sphi %s7774_s19, %s10554_s19   ;;  %s7712_s18 = sphi %s7772_s18, %s10553_s18  }
   0x8   : > { %p43_p0 = scmp.ne.s32.totalorder %s7716_s19, %s7712_s18  ;;  %p10093_p1 = scmp.eq.s32.totalorder %s7793_s22, 0 }
   0x9   : > { %p157_p3 = scmp.eq.s32.totalorder %s5832_s23, 1  ;;  %p5833_p5 = scmp.ge.s32.totalorder %s7724_s21, 1 }
   0xa   : > { %p7802_p4 = por %p10093_p1, %p43_p0  ;;  %p164_p7 = scmp.lt.s32.totalorder %s7724_s21, 3 }
   0xb   : > { %p7807_p6 = por %p157_p3, %p43_p0  ;;  %s7726_s27 = smov [#allocation7]  }
   0xc   : > { %s10244_s24 = scalar_select %p7802_p4, 1, 0 }
   0xd   : > { %s10245_s25 = scalar_select %p7807_p6, 1, 0 }
   0xe   : > { %p7812_p8 = pnand %p5833_p5, %p164_p7  ;;  %s176_s28 = sshll.u32 %s7726_s27, 4  ;;  %s7816_s28 = int_to_ptr.vmem [resolvable:$true] %s176_s28 }
   0xf   : > { %s7727_s30 = smov [#allocation10]   ;;  %s7728_s7 = smov [#allocation9]  }
  0x10   : > { %s10246_s26 = scalar_select %p7812_p8, 1, 0 }
  0x11   : > { %p7286_p9 = pneg %p7812_p8  ;;  %s200_s6 = sshll.u32 %s7727_s30, 4  ;;  %s7827_s6 = int_to_ptr.vmem [resolvable:$true] %s200_s6 }
  0x12   : > { %s7829_s8 = sshll.u32 %s7728_s7, 4  ;;  %s7508_s11 = scalar_lea.hbm %s10088_s1, 9216  ;;  %s191_s8 = int_to_ptr.vmem [resolvable:$true] %s7829_s8 }
  0x13   : > { %p7823_p11 = pnand %p7286_p9, %p10093_p1  ;;  %p7509_p12 = scmp.ne.s32.totalorder %s10088_s1, %s7508_s11 }
  0x14   : > { %p7515_p5 = scmp.lt.u32.totalorder %s7508_s11, %s10088_s1 }
  0x15   : > { %p7839_p13 = pneg %p7823_p11 }
  0x17   : > { %p7511_p0 = pnand %p7839_p13, %p7509_p12 }
  0x19   : > { %p7512_p3 = pneg %p7511_p0 }
  0x1b   : > { %p7517_p7 = pnand %p7515_p5, %p7512_p3 }
  0x1d   : > { %7520 = shalt.err (!%p7517_p7)
}
  0x1e   : > { %s7521_s17 = scalar_lea.vmem %s7816_s28, 9216  ;;  %p7529_p2 = scmp.lt.s32.totalorder %s7816_s28, %s7816_s28 }
  0x1f   : > { %p7522_p9 = scmp.ne.s32.totalorder %s7816_s28, %s7521_s17  ;;  %p7530_p6 = scmp.lt.s32.totalorder %s7521_s17, %s7521_s17 }
  0x21   : > { %p7524_p10 = pnand %p7522_p9, %p7839_p13  ;;  %p7531_p12 = por %p7530_p6, %p7529_p2 }
  0x23   : > { %p7525_p1 = pneg %p7524_p10 }
  0x25   : > { %p7532_p0 = pnand %p7531_p12, %p7525_p1 }
  0x27   : > { %7535 = shalt.err (!%p7532_p0)
}
  0x28   : > { %s7729_s23 = smov 64   ;;  %s7730_s27 = smov 4  }
  0x29   : > { %7289 = dma.hbm_to_vmem [thread:$0]  (!%p7823_p11), %s10088_s1, 9216, %s7816_s28, [#allocation8], %s7729_s23, %s7729_s23, %s7730_s27  }
  0x2a   : > { %s7536_s11 = scalar_lea.hbm %s10090_s3, 9216 }
  0x2b   : > { %p7537_p2 = scmp.ne.s32.totalorder %s10090_s3, %s7536_s11  ;;  %p7543_p10 = scmp.lt.u32.totalorder %s7536_s11, %s10090_s3 }
  0x2d   : > { %p7539_p1 = pnand %p7537_p2, %p7839_p13 }
  0x2f   : > { %p7540_p6 = pneg %p7539_p1 }
  0x31   : > { %p7545_p3 = pnand %p7543_p10, %p7540_p6 }
  0x33   : > { %7548 = shalt.err (!%p7545_p3)
}
  0x34   : > { %s7549_s28 = scalar_lea.vmem %s7827_s6, 9216  ;;  %p7557_p12 = scmp.lt.s32.totalorder %s7827_s6, %s7827_s6 }
  0x35   : > { %p7550_p5 = scmp.ne.s32.totalorder %s7827_s6, %s7549_s28  ;;  %p7558_p0 = scmp.lt.s32.totalorder %s7549_s28, %s7549_s28 }
  0x37   : > { %p7552_p7 = pnand %p7550_p5, %p7839_p13  ;;  %p7559_p2 = por %p7558_p0, %p7557_p12 }
  0x39   : > { %p7553_p9 = pneg %p7552_p7 }
  0x3b   : > { %p7560_p1 = pnand %p7559_p2, %p7553_p9 }
  0x3d   : > { %7563 = shalt.err (!%p7560_p1)
}
  0x3e   : > { %7295 = dma.hbm_to_vmem [thread:$0]  (!%p7823_p11), %s10090_s3, 9216, %s7827_s6, [#allocation11], %s7729_s23, %s7729_s23, %s7730_s27  }
  0x3f   : > { %s7564_s10 = scalar_lea.hbm %s10089_s2, 16 }
  0x40   : > { %p7565_p6 = scmp.ne.s32.totalorder %s10089_s2, %s7564_s10  ;;  %p7571_p5 = scmp.lt.u32.totalorder %s7564_s10, %s10089_s2 }
  0x42   : > { %p7567_p10 = pnand %p7565_p6, %p7839_p13 }
  0x44   : > { %p7568_p3 = pneg %p7567_p10 }
  0x46   : > { %p7573_p7 = pnand %p7571_p5, %p7568_p3 }
  0x48   : > { %7576 = shalt.err (!%p7573_p7)
}
  0x49   : > { %s7577_s16 = scalar_lea.vmem %s191_s8, 16  ;;  %s7584_s6 = scalar_lea.vmem %s191_s8, 32 }
  0x4a   : > { %p7578_p9 = scmp.ne.s32.totalorder %s191_s8, %s7577_s16  ;;  %p7585_p2 = scmp.lt.s32.totalorder %s191_s8, %s191_s8 }
  0x4b   : > { %p7586_p1 = scmp.lt.s32.totalorder %s7584_s6, %s7577_s16 }
  0x4c   : > { %p7580_p12 = pnand %p7578_p9, %p7839_p13 }
  0x4d   : > { %p7587_p4 = por %p7586_p1, %p7585_p2 }
  0x4e   : > { %p7581_p0 = pneg %p7580_p12 }
  0x50   : > { %p7588_p8 = pnand %p7587_p4, %p7581_p0 }
  0x52   : > { %7591 = shalt.err (!%p7588_p8)
}
  0x53   : > { %7292 = dma.hbm_to_vmem [thread:$0]  (!%p7823_p11), %s10089_s2, 16, %s191_s8, [#allocation8]  }
  0x54   : > { %s7731_s28 = smov [#allocation12]   ;;  %s7592_s9 = scalar_lea.hbm %s10091_s4, 16 }
  0x55   : > { %s214_s17 = sshll.u32 %s7731_s28, 4  ;;  %p7593_p6 = scmp.ne.s32.totalorder %s10091_s4, %s7592_s9  ;;  %s215_s17 = int_to_ptr.vmem [resolvable:$true] %s214_s17 }
  0x56   : > { %p7599_p10 = scmp.lt.u32.totalorder %s7592_s9, %s10091_s4 }
  0x57   : > { %p7595_p4 = pnand %p7593_p6, %p7839_p13 }
  0x59   : > { %p7596_p8 = pneg %p7595_p4 }
  0x5b   : > { %p7601_p3 = pnand %p7599_p10, %p7596_p8 }
  0x5d   : > { %7604 = shalt.err (!%p7601_p3)
}
  0x5e   : > { %s7605_s8 = scalar_lea.vmem %s215_s17, 16  ;;  %s7612_s15 = scalar_lea.vmem %s215_s17, 32 }
  0x5f   : > { %p7606_p5 = scmp.ne.s32.totalorder %s215_s17, %s7605_s8  ;;  %p7613_p12 = scmp.lt.s32.totalorder %s215_s17, %s215_s17 }
  0x60   : > { %p7614_p0 = scmp.lt.s32.totalorder %s7612_s15, %s7605_s8 }
  0x61   : > { %p7608_p7 = pnand %p7606_p5, %p7839_p13 }
  0x62   : > { %p7615_p2 = por %p7614_p0, %p7613_p12 }
  0x63   : > { %p7609_p9 = pneg %p7608_p7 }
  0x65   : > { %p7616_p1 = pnand %p7615_p2, %p7609_p9 }
  0x67   : > { %7619 = shalt.err (!%p7616_p1)
}
  0x68   : > { %7298 = dma.hbm_to_vmem [thread:$0]  (!%p7823_p11), %s10091_s4, 16, %s215_s17, [#allocation11]  }
  0x69   : > { %s7921_s14 = sadd.s32 1, %s7724_s21   ;;  %s30_s23 = sadd.s32 1, %s7720_s20 }
  0x6a   : > { %s27_s29 = ssub.s32 %s7724_s21, %s7921_s14  ;;  %p37_p13 = scmp.ne.s32.totalorder %s7720_s20, %s7716_s19 }
  0x6b   : > { %p28_p6 = scmp.eq.s32.totalorder %s27_s29, 0  ;;  %p38_p4 = scmp.eq.s32.totalorder %s7724_s21, 0 }
  0x6c   : > { %p10249_p8 = scmp.eq.s32.totalorder %s7793_s22, 1  ;;  %p7311_p3 = scmp.lt.s32.totalorder %s7724_s21, 2 }
  0x6d   : > { %s7937_s28 = scalar_select %p28_p6, %s7720_s20, %s30_s23  }
  0x6e   : > { %p7931_p10 = por %p10249_p8, %p37_p13  ;;  %p39_p5 = por %p38_p4, %p37_p13 }
  0x6f   : > { %s225_s30 = sand.u32 1, %s7720_s20   ;;  %s6032_s17 = sshll.u32 %s7724_s21, 12 }
  0x70   : > { %s5839_s7 = sshll.u32 %s225_s30, 8  ;;  %s7944_s11 = scalar_lea.hbm %s10087_s0, %s6032_s17 }
  0x71   : > { %s229_s12 = scalar_lea.vmem [#allocation4], %s5839_s7  ;;  %p7948_p11 = pnand %p7311_p3, %p39_p5 }
  0x72   : > { %s236_s13 = sshll.u32 %s229_s12, 4  ;;  %s7952_s15 = scalar_lea.sflag [#allocation5], %s225_s30  ;;  %s7946_s13 = int_to_ptr.vmem [resolvable:$true] %s236_s13 }
  0x73   : > { %s7620_s16 = scalar_lea.hbm %s7944_s11, 4096  ;;  %p7622_p9 = pneg %p7948_p11 }
  0x74   : > { %p7621_p7 = scmp.ne.s32.totalorder %s7944_s11, %s7620_s16  ;;  %s7625_s29 = scalar_lea.hbm %s10087_s0, 8192 }
  0x75   : > { %p7626_p2 = scmp.lt.u32.totalorder %s7944_s11, %s10087_s0  ;;  %p7627_p1 = scmp.lt.u32.totalorder %s7625_s29, %s7620_s16 }
  0x76   : > { %p7623_p12 = pnand %p7622_p9, %p7621_p7  ;;  %p7629_p6 = scmp.lt.u32.totalorder %s7620_s16, %s7944_s11 }
  0x77   : > { %p7628_p13 = por %p7627_p1, %p7626_p2 }
  0x78   : > { %p7624_p0 = pneg %p7623_p12 }
  0x79   : > { %p7630_p4 = por %p7629_p6, %p7628_p13 }
  0x7b   : > { %p7631_p8 = pnand %p7630_p4, %p7624_p0 }
  0x7d   : > { %7634 = shalt.err (!%p7631_p8)
}
  0x7e   : > { %s7635_s30 = scalar_lea.vmem %s7946_s13, 4096  ;;  %s7732_s9 = smov [#allocation4]  }
  0x7f   : > { %p7636_p3 = scmp.ne.s32.totalorder %s7946_s13, %s7635_s30  ;;  %s7640_s10 = sshll.u32 %s7732_s9, 4  ;;  %s7641_s10 = int_to_ptr.vmem [resolvable:$false] %s7640_s10 }
  0x80   : > { %s7642_s12 = scalar_lea.vmem %s7641_s10, 8192  ;;  %p7643_p12 = scmp.lt.s32.totalorder %s7946_s13, %s7641_s10 }
  0x81   : > { %p7638_p5 = pnand %p7636_p3, %p7622_p9  ;;  %p7644_p2 = scmp.lt.s32.totalorder %s7642_s12, %s7635_s30 }
  0x83   : > { %p7639_p7 = pneg %p7638_p5  ;;  %p7645_p1 = por %p7644_p2, %p7643_p12 }
  0x85   : > { %p7646_p13 = pnand %p7645_p1, %p7639_p7 }
  0x87   : > { %7649 = shalt.err (!%p7646_p13)
}
  0x88   : > { %s7733_s16 = smov 128   ;;  %s7734_s6 = smov 8  }
  0x89   : > { %7302 = dma.hbm_to_vmem [thread:$0]  (!%p7948_p11), %s7944_s11, 4096, %s7946_s13, %s7952_s15, %s7733_s16, %s7733_s16, %s7734_s6  }
  0x8a   : > { %p10252_p9 = scmp.ne.s32.totalorder %s10246_s26, 0 }
  0x8c   : > { %248 = sbr.rel (%p10252_p9) target bundleno = 1214 (0x4be), region = 40 }
  0x93   : > { %s7983_s23 = sand.u32 1, %s7716_s19   ;;  %p10253_p0 = scmp.ne.s32.totalorder %s10244_s24, 0 }
  0x94   : > { %s5843_s29 = sshll.u32 %s7983_s23, 8  ;;  %s251_s7 = scalar_lea.sflag [#allocation5], %s7983_s23 }
  0x95   : > { %s7989_s17 = scalar_lea.vmem [#allocation4], %s5843_s29 }
  0x96   : > { %7695 = dma.done.wait (%p10253_p0), %s251_s7, 4096  }
  0x97   : > { %7697 = vsyncadd (%p10253_p0), %s251_s7, 4294963200  ;;  %p10254_p11 = scmp.eq.s32.totalorder %s7793_s22, 0 }
  0x99   : > { %7699 = dma.done.wait (%p10254_p11), [#allocation8], 9232   ;;  %p10255_p6 = pmov %p10254_p11 }
  0x9b   : > { %7701 = vsyncadd (%p10255_p6), [#allocation8], 4294958064  ;;  %p10256_p4 = pmov %p10255_p6 }
  0x9d   : > { %7703 = dma.done.wait (%p10256_p4), [#allocation11], 9232   ;;  %p10257_p8 = pmov %p10256_p4 }
  0x9e   : > { %v7735_v0 = vmov 0.0   ;;  %v7736_v1 = vmov 0.0|0.0   ;;  %v7362_v2 = vld [vmem:[#allocation7 + $0x40] sm:$0xff]   ;;  %v7366_v6 = vld [vmem:[#allocation7 + $0x48] sm:$0xff]   ;;  %v7370_v10 = vld [vmem:[#allocation7 + $0x50] sm:$0xff]   ;;  %v306_v19 = vlaneseq  ;;  %vm7737_vm0 = vmmov 1  }
  0x9f   : > { %7705 = vsyncadd (%p10257_p8), [#allocation11], 4294958064  ;;  %301 = vst [vmem:[#allocation2 + $0x8] sm:$0xff] %v7735_v0  ;;  %2570 = vmatprep.mubr.bf16.mxu0 %v7736_v1  ;;  %v7363_v3 = vld [vmem:[#allocation7] sm:$0xff]   ;;  %6226 = vmatprep.subr.bf16.mxu0 %v7362_v2  ;;  %v7367_v7 = vld [vmem:[#allocation7 + $0x8] sm:$0xff]   ;;  %v10140_v36 = vmov 0  }
  0xa0   : > { %302 = vst [vmem:[#allocation2 + $0x10] sm:$0xff] %v7735_v0  ;;  %300 = vst [vmem:[#allocation2] sm:$0xff] %v7735_v0  ;;  %v7364_v4 = vld [vmem:[#allocation7 + $0xc0] sm:$0xff]   ;;  %6227 = vmatpush3.bf16.msra.mxu0 %v7363_v3  ;;  %v7368_v8 = vld [vmem:[#allocation7 + $0xc8] sm:$0xff]   ;;  %v8007_v25 = vshrl.u32 %v306_v19, 7  ;;  %v10266_v61 = vmov 0 }
  0xa1   : > { %303 = vst [vmem:[#allocation2 + $0x118] sm:$0xff] %v7735_v0  ;;  %304 = vst [vmem:[#allocation2 + $0x120] sm:$0xff] %v7735_v0  ;;  %v7365_v5 = vld [vmem:[#allocation7 + $0x80] sm:$0xff]   ;;  %6338 = vmatprep.subr.bf16.mxu1 %v7364_v4  ;;  %6228 = vmatprep.subr.bf16.mxu0 %v7366_v6  ;;  %v7369_v9 = vld [vmem:[#allocation7 + $0x88] sm:$0xff]   ;;  %s9942_s24 = scalar_lea.vmem [#allocation13], %s5843_s29  ;;  %s6033_s26 = sshll.u32 %s7793_s22, 12 }
  0xa2   : > { %305 = vst [vmem:[#allocation2 + $0x128] sm:$0xff] %v7735_v0  ;;  %6339 = vmatpush3.bf16.msra.mxu1 %v7365_v5  ;;  %v7371_v11 = vld [vmem:[#allocation7 + $0x10] sm:$0xff]   ;;  %v7374_v14 = vld [vmem:[#allocation7 + $0x58] sm:$0xff]   ;;  %v7378_v18 = vld [vmem:[#allocation7 + $0x60] sm:$0xff]   ;;  %v308_v30 = vadd.s32 8, %v8007_v25  ;;  %v343_v32 = vand.u32 15, %v8007_v25  ;;  %s10038_s15 = scalar_lea.hbm %s10092_s5, %s6033_s26 }
  0xa3   : > { %6340 = vmatprep.subr.bf16.mxu1 %v7368_v8  ;;  %v7372_v12 = vld [vmem:[#allocation7 + $0xd0] sm:$0xff]   ;;  %v7375_v15 = vld [vmem:[#allocation7 + $0x18] sm:$0xff]   ;;  %vm8003_vm1 = vmpackc.low %vm7737_vm0, %vm7737_vm0  ;;  %v309_v34 = vadd.s32 16, %v8007_v25  ;;  %v311_v45 = vadd.s32 32, %v8007_v25  ;;  %v310_v49 = vadd.s32 24, %v8007_v25  ;;  %v313_v1 = vadd.s32 48, %v8007_v25 }
  0xa4   : > { %6229 = vmatpush3.bf16.msra.mxu0 %v7367_v7  ;;  %v7373_v13 = vld [vmem:[#allocation7 + $0x90] sm:$0xff]   ;;  %v7376_v16 = vld [vmem:[#allocation7 + $0xd8] sm:$0xff]   ;;  %v7379_v21 = vld [vmem:[#allocation7 + $0x20] sm:$0xff]   ;;  %v8015_v37 = vsel %vm8003_vm1, 65537, %v10140_v36  ;;  %v350_v39 = vand.u32 15, %v308_v30  ;;  %vm8017_vm2 = vcmp.gt.s32.totalorder %v343_v32, 0 }
  0xa5   : > { %6230 = vmatprep.subr.bf16.mxu0 %v7370_v10  ;;  %v7377_v17 = vld [vmem:[#allocation7 + $0x98] sm:$0xff]   ;;  %v7380_v22 = vld [vmem:[#allocation7 + $0xe0] sm:$0xff]   ;;  %v7382_v24 = vld [vmem:[#allocation7 + $0x68] sm:$0xff]   ;;  %v357_v43 = vand.u32 15, %v309_v34  ;;  %v371_v60 = vand.u32 15, %v311_v45  ;;  %v364_v0 = vand.u32 15, %v310_v49 }
  0xa6   : > { %6341 = vmatpush3.bf16.msra.mxu1 %v7369_v9  ;;  %v7381_v23 = vld [vmem:[#allocation7 + $0xa0] sm:$0xff]   ;;  %v7383_v26 = vld [vmem:[#allocation7 + $0x28] sm:$0xff]   ;;  %v7386_v29 = vld [vmem:[#allocation7 + $0x70] sm:$0xff]   ;;  %vm8025_vm4 = vcmp.lt.s32.totalorder %v350_v39, 15  ;;  %v10272_v32 = vmov 0  ;;  %s5721_s11 = sshll.u32 %s9942_s24, 4  ;;  %s10040_s11 = int_to_ptr.vmem [resolvable:$true] %s5721_s11 }
  0xa7   : > { %6342 = vmatprep.subr.bf16.mxu1 %v7372_v12  ;;  %v7384_v27 = vld [vmem:[#allocation7 + $0xe8] sm:$0xff]   ;;  %v7387_v31 = vld [vmem:[#allocation7 + $0x30] sm:$0xff]   ;;  %v7390_v38 = vld [vmem:[#allocation7 + $0x78] sm:$0xff]   ;;  %vm8034_vm5 = vcmp.gt.s32.totalorder %v357_v43, 0  ;;  %vm8058_vm9 = vcmp.gt.s32.totalorder %v371_v60, 0  ;;  %v312_v12 = vadd.s32 40, %v8007_v25 }
  0xa8   : > { %6231 = vmatpush3.bf16.msra.mxu0 %v7371_v11  ;;  %v7385_v28 = vld [vmem:[#allocation7 + $0xa8] sm:$0xff]   ;;  %v7388_v33 = vld [vmem:[#allocation7 + $0xf0] sm:$0xff]   ;;  %v7391_v40 = vld [vmem:[#allocation7 + $0x38] sm:$0xff]   ;;  %vm8068_vm10 = vcmp.lt.s32.totalorder %v364_v0, 15  ;;  %s5708_s22 = scalar_lea.sflag [#allocation6], %s7983_s23  ;;  %s7650_s30 = scalar_lea.vmem %s10040_s11, 4096 }
  0xa9   : > { %6232 = vmatprep.subr.bf16.mxu0 %v7374_v14  ;;  %v7389_v35 = vld [vmem:[#allocation7 + $0xb0] sm:$0xff]   ;;  %v7392_v42 = vld [vmem:[#allocation7 + $0xf8] sm:$0xff]   ;;  %vm931_vm3 = vmpackc.low %vm8017_vm2, %vm8017_vm2  ;;  %p7651_p3 = scmp.ne.s32.totalorder %s10040_s11, %s7650_s30  ;;  %s7739_s9 = smov [#allocation13]  }
  0xaa   : > { %6343 = vmatpush3.bf16.msra.mxu1 %v7373_v13  ;;  %v7393_v44 = vld [vmem:[#allocation7 + $0xb8] sm:$0xff]   ;;  %v963_v51 = vsel %vm931_vm3, 65537, %v10140_v36  ;;  %v7394_v52 = vld [vmem:[#allocation7 + $0x140] sm:$0xff]   ;;  %v788_v55 = vld [vmem:[%s7989_s17 + $0x8] sm:$0xff]  ;;  %s7654_s10 = sshll.u32 %s7739_s9, 4  ;;  %s7655_s10 = int_to_ptr.vmem [resolvable:$false] %s7654_s10 }
  0xab   : > { %6344 = vmatprep.subr.bf16.mxu1 %v7376_v16  ;;  %v883_v46 = vld [vmem:[#allocation2 + $0x7] sm:$0xff]  ;;  %v884_v47 = vld [vmem:[#allocation2 + $0xf] sm:$0xff]  ;;  %v5849_v53 = vcombine.low %v963_v51, %v8015_v37  ;;  %v820_v58 = vmax.f32 %v788_v55, 0.0  ;;  %vm1204_vm7 = vmpackc.low %vm8025_vm4, %vm8025_vm4  ;;  %p7652_p5 = pnand %p7651_p3, %p7931_p10  ;;  %s7656_s12 = scalar_lea.vmem %s7655_s10, 8192 }
  0xac   : > { %6233 = vmatpush3.bf16.msra.mxu0 %v7375_v15  ;;  %v915_v50 = vpack.c.bf16 %v884_v47, %v883_v46  ;;  %v787_v54 = vld [vmem:[%s7989_s17] sm:$0xff]  ;;  %v789_v62 = vld [vmem:[%s7989_s17 + $0x10] sm:$0xff]  ;;  %v790_v63 = vld [vmem:[%s7989_s17 + $0x18] sm:$0xff]  ;;  %v1236_v6 = vsel %vm1204_vm7, 65537, %v10140_v36  ;;  %p7657_p12 = scmp.lt.s32.totalorder %s10040_s11, %s7655_s10  ;;  %p7658_p2 = scmp.lt.s32.totalorder %s7656_s12, %s7650_s30 }
  0xad   : > { %6234 = vmatprep.subr.bf16.mxu0 %v7378_v18  ;;  %v819_v57 = vmax.f32 %v787_v54, 0.0  ;;  %v7395_v59 = vld [vmem:[#allocation7 + $0x100] sm:$0xff]   ;;  %vm8038_vm6 = vcmp.ne.s16.totalorder %v5849_v53, 0  ;;  %852 = vst [vmem:[#allocation2 + $0x20] sm:$0xff] %v820_v58  ;;  %vm933_vm8 = vmpackc.low %vm8034_vm5, %vm8034_vm5  ;;  %v821_v3 = vmax.f32 %v789_v62, 0.0  ;;  %v822_v4 = vmax.f32 %v790_v63, 0.0  ;;  %p7653_p7 = pneg %p7652_p5 }
  0xae   : > { %6345 = vmatpush3.bf16.msra.mxu1 %v7377_v17  ;;  %v10267_v61 = vsel %vm8038_vm6, 4294967295, %v10266_v61  ;;  %v7396_v5 = vld [vmem:[#allocation7 + $0x148] sm:$0xff]   ;;  %v965_v7 = vsel %vm933_vm8, 65537, %v10140_v36  ;;  %v8056_v8 = vld [vmem:[%s7989_s17 + $0x20] sm:$0xff]  ;;  %v385_v17 = vand.u32 15, %v313_v1  ;;  %v5865_v19 = vcombine.low %v8015_v37, %v1236_v6  ;;  %v8077_v20 = vld [vmem:[%s7989_s17 + $0x30] sm:$0xff]  ;;  %p7659_p1 = por %p7658_p2, %p7657_p12 }
  0xaf   : > { %6346 = vmatprep.subr.bf16.mxu1 %v7380_v22  ;;  %851 = vst [vmem:[#allocation2 + $0x18] sm:$0xff] %v819_v57  ;;  %v1124_v2 = vpack.c.bf16 %v820_v58, %v819_v57  ;;  %853 = vst [vmem:[#allocation2 + $0x28] sm:$0xff] %v821_v3  ;;  %v8063_v10 = vld [vmem:[%s7989_s17 + $0x28] sm:$0xff]  ;;  %v823_v11 = vmax.f32 %v8056_v8, 0.0  ;;  %v5850_v13 = vcombine.low %v965_v7, %v8015_v37  ;;  %v1155_v18 = vld [vmem:[#allocation2 + $0x9] sm:$0xff]  ;;  %v314_v22 = vadd.s32 56, %v8007_v25 }
  0xb0   : > { %6235 = vmatpush3.bf16.msra.mxu0 %v7379_v21  ;;  %854 = vst [vmem:[#allocation2 + $0x30] sm:$0xff] %v822_v4  ;;  %v824_v15 = vmax.f32 %v8063_v10, 0.0  ;;  %v7397_v16 = vld [vmem:[#allocation7 + $0x108] sm:$0xff]   ;;  %v8080_v21 = vld [vmem:[%s7989_s17 + $0x38] sm:$0xff]  ;;  %vm935_vm11 = vmpackc.low %vm8058_vm9, %vm8058_vm9  ;;  %vm8100_vm14 = vcmp.gt.s32.totalorder %v385_v17, 0  ;;  %vm8105_vm15 = vcmp.ne.s16.totalorder %v5865_v19, 0  ;;  %p7660_p13 = pnand %p7659_p1, %p7653_p7 }
  0xb1   : > { %6236 = vmatprep.subr.bf16.mxu0 %v7382_v24  ;;  %855 = vst [vmem:[#allocation2 + $0x38] sm:$0xff] %v823_v11  ;;  %vm1206_vm12 = vmpackc.low %vm8068_vm10, %vm8068_vm10  ;;  %v825_v24 = vmax.f32 %v8077_v20, 0.0  ;;  %vm8096_vm13 = vcmp.ne.s16.totalorder %v5850_v13, 0  ;;  %v967_v41 = vsel %vm935_vm11, 65537, %v10140_v36  ;;  %v392_v46 = vand.u32 15, %v314_v22  ;;  %v8156_v60 = vld [vmem:[%s7989_s17 + $0x50] sm:$0xff] }
  0xb2   : > { %6347 = vmatpush3.bf16.msra.mxu1 %v7381_v23  ;;  %856 = vst [vmem:[#allocation2 + $0x40] sm:$0xff] %v824_v15  ;;  %v378_v23 = vand.u32 15, %v312_v12  ;;  %v10273_v32 = vsel %vm8096_vm13, 4294967295, %v10272_v32  ;;  %v1238_v45 = vsel %vm1206_vm12, 65537, %v10140_v36  ;;  %v5851_v51 = vcombine.low %v967_v41, %v8015_v37  ;;  %vm937_vm1 = vmpackc.low %vm8100_vm14, %vm8100_vm14  ;;  %v8159_v62 = vld [vmem:[%s7989_s17 + $0x58] sm:$0xff]  ;;  %v8198_v10 = vld [vmem:[%s7989_s17 + $0x60] sm:$0xff] }
  0xb3   : > { %6348 = vmatprep.subr.bf16.mxu1 %v7384_v27  ;;  %v7398_v27 = vld [vmem:[#allocation7 + $0x150] sm:$0xff]   ;;  %857 = vst [vmem:[#allocation2 + $0x48] sm:$0xff] %v825_v24  ;;  %v5866_v56 = vcombine.low %v8015_v37, %v1238_v45  ;;  %vm8151_vm2 = vcmp.lt.s32.totalorder %v392_v46, 15  ;;  %v316_v63 = vadd.s32 72, %v8007_v25  ;;  %v829_v0 = vmax.f32 %v8156_v60, 0.0  ;;  %v8207_v13 = vld [vmem:[%s7989_s17 + $0x68] sm:$0xff] }
  0xb4   : > { %6237 = vmatpush3.bf16.msra.mxu0 %v7383_v26  ;;  %v826_v26 = vmax.f32 %v8080_v21, 0.0  ;;  %vm8137_vm0 = vcmp.lt.s32.totalorder %v378_v23, 15  ;;  %v830_v1 = vmax.f32 %v8159_v62, 0.0  ;;  %vm8167_vm4 = vcmp.ne.s16.totalorder %v5851_v51, 0  ;;  %vm1210_vm8 = vmpackc.low %vm8151_vm2, %vm8151_vm2 }
  0xb5   : > { %6238 = vmatprep.subr.bf16.mxu0 %v7386_v29  ;;  %vm1208_vm3 = vmpackc.low %vm8137_vm0, %vm8137_vm0  ;;  %vm8179_vm7 = vcmp.ne.s16.totalorder %v5866_v56, 0  ;;  %v969_v12 = vsel %vm937_vm1, 65537, %v10140_v36  ;;  %v317_v8 = vadd.s32 80, %v8007_v25  ;;  %861 = vst [vmem:[#allocation2 + $0x68] sm:$0xff] %v829_v0  ;;  %v831_v14 = vmax.f32 %v8198_v10, 0.0  ;;  %v8480_v10 = vld [vmem:[%s7989_s17 + $0xd8] sm:$0xff] }
  0xb6   : > { %6349 = vmatpush3.bf16.msra.mxu1 %v7385_v28  ;;  %v8094_v28 = vld [vmem:[%s7989_s17 + $0x40] sm:$0xff]  ;;  %v1364_v30 = vld [vmem:[#allocation2 + $0x1f] sm:$0xff]  ;;  %858 = vst [vmem:[#allocation2 + $0x50] sm:$0xff] %v826_v26  ;;  %v1365_v43 = vld [vmem:[#allocation2 + $0x27] sm:$0xff]  ;;  %v832_v17 = vmax.f32 %v8207_v13, 0.0  ;;  %v5852_v22 = vcombine.low %v969_v12, %v8015_v37  ;;  %v319_v41 = vadd.s32 96, %v8007_v25 }
  0xb7   : > { %6350 = vmatprep.subr.bf16.mxu1 %v7388_v33  ;;  %v1363_v29 = vld [vmem:[#allocation2 + $0x17] sm:$0xff]  ;;  %v1125_v33 = vpack.c.bf16 %v822_v4, %v821_v3  ;;  %v827_v47 = vmax.f32 %v8094_v28, 0.0  ;;  %v1158_v55 = vld [vmem:[#allocation2 + $0x21] sm:$0xff]  ;;  %v10283_v4 = vmov 0  ;;  %862 = vst [vmem:[#allocation2 + $0x70] sm:$0xff] %v830_v1  ;;  %863 = vst [vmem:[#allocation2 + $0x78] sm:$0xff] %v831_v14 }
  0xb8   : > { %6239 = vmatpush3.bf16.msra.mxu0 %v7387_v31  ;;  %v1156_v31 = vld [vmem:[#allocation2 + $0x11] sm:$0xff]  ;;  %v1157_v54 = vld [vmem:[#allocation2 + $0x19] sm:$0xff]  ;;  %v10284_v4 = vsel %vm8167_vm4, 4294967295, %v10283_v4  ;;  %864 = vst [vmem:[#allocation2 + $0x80] sm:$0xff] %v832_v17  ;;  %vm8242_vm11 = vcmp.ne.s16.totalorder %v5852_v22, 0  ;;  %v10291_v45 = vmov 0 }
  0xb9   : > { %6240 = vmatprep.subr.bf16.mxu0 %v7390_v38  ;;  %v1395_v38 = vpack.c.bf16 %v1364_v30, %v1363_v29  ;;  %v1187_v39 = vpack.c.bf16 %v1156_v31, %v1155_v18  ;;  %859 = vst [vmem:[#allocation2 + $0x58] sm:$0xff] %v827_v47  ;;  %v1367_v57 = vld [vmem:[#allocation2 + $0x37] sm:$0xff]  ;;  %v1368_v58 = vld [vmem:[#allocation2 + $0x3f] sm:$0xff]  ;;  %v1188_v3 = vpack.c.bf16 %v1158_v55, %v1157_v54  ;;  %v1159_v18 = vld [vmem:[#allocation2 + $0x29] sm:$0xff]  ;;  %v413_v29 = vand.u32 15, %v317_v8 }
  0xba   : > { %6351 = vmatpush3.bf16.msra.mxu1 %v7389_v35  ;;  %v315_v35 = vadd.s32 64, %v8007_v25  ;;  %v1397_v9 = vpack.c.bf16 %v1368_v58, %v1367_v57  ;;  %v1160_v19 = vld [vmem:[#allocation2 + $0x31] sm:$0xff]  ;;  %v8227_v30 = vld [vmem:[%s7989_s17 + $0x70] sm:$0xff]  ;;  %v8230_v31 = vld [vmem:[%s7989_s17 + $0x78] sm:$0xff]  ;;  %v10292_v45 = vsel %vm8242_vm11, 4294967295, %v10291_v45  ;;  %v1242_v46 = vsel %vm1210_vm8, 65537, %v10140_v36 }
  0xbb   : > { %6352 = vmatprep.subr.bf16.mxu1 %v7392_v42  ;;  %v8120_v42 = vld [vmem:[%s7989_s17 + $0x48] sm:$0xff]  ;;  %6050 = vmatprep.mubr.msk.bf16.mxu1 %vm8038_vm6, %v1395_v38  ;;  %v833_v34 = vmax.f32 %v8227_v30, 0.0  ;;  %vm8270_vm14 = vcmp.gt.s32.totalorder %v413_v29, 0  ;;  %v7403_v54 = vld [vmem:[#allocation7 + $0x120] sm:$0xff]   ;;  %v5868_v56 = vcombine.low %v8015_v37, %v1242_v46  ;;  %v427_v57 = vand.u32 15, %v319_v41  ;;  %v1162_v58 = vld [vmem:[#allocation2 + $0x41] sm:$0xff] }
  0xbc   : > { %6241 = vmatpush3.bf16.msra.mxu0 %v7391_v40  ;;  %v10276_v40 = vmov 0  ;;  %v828_v48 = vmax.f32 %v8120_v42, 0.0  ;;  %v399_v53 = vand.u32 15, %v315_v35  ;;  %v834_v35 = vmax.f32 %v8230_v31, 0.0  ;;  %v1161_v55 = vld [vmem:[#allocation2 + $0x39] sm:$0xff]  ;;  %vm941_vm1 = vmpackc.low %vm8270_vm14, %vm8270_vm14  ;;  %v8335_v29 = vld [vmem:[%s7989_s17 + $0xa0] sm:$0xff] }
  0xbd   : > { %6450 = vmatprep.subr.bf16.mxu0 %v7394_v52  ;;  %v10277_v40 = vsel %vm8105_vm15, 4294967295, %v10276_v40  ;;  %865 = vst [vmem:[#allocation2 + $0x88] sm:$0xff] %v833_v34  ;;  %v7404_v8 = vld [vmem:[#allocation7 + $0x168] sm:$0xff]   ;;  %vm8306_vm2 = vcmp.ne.s16.totalorder %v5868_v56, 0  ;;  %v10301_v22 = vmov 0  ;;  %v839_v28 = vmax.f32 %v8335_v29, 0.0 }
  0xbe   : > { %6353 = vmatpush3.bf16.msra.mxu1 %v7393_v44  ;;  %10278 = vst [vmem:[#allocation18_spill] sm:$0xff] %v10277_v40  ;;  %v1366_v44 = vld [vmem:[#allocation2 + $0x2f] sm:$0xff]  ;;  %860 = vst [vmem:[#allocation2 + $0x60] sm:$0xff] %v828_v48  ;;  %vm8175_vm5 = vcmp.gt.s32.totalorder %v399_v53, 0  ;;  %v7406_v56 = vld [vmem:[#allocation7 + $0x170] sm:$0xff]  }
  0xbf   : > { %6034 = vmatmul.mubr.msk.bf16.vlgmr.msra.gmra.mrb[0].mxu0 %vm8038_vm6, %v915_v50  ;;  %v1396_v49 = vpack.c.bf16 %v1366_v44, %v1365_v43  ;;  %v7399_v50 = vld [vmem:[#allocation7 + $0x110] sm:$0xff]   ;;  %vm939_vm9 = vmpackc.low %vm8175_vm5, %vm8175_vm5  ;;  %v8240_v43 = vld [vmem:[%s7989_s17 + $0x80] sm:$0xff]  ;;  %v1189_v44 = vpack.c.bf16 %v1160_v19, %v1159_v18  ;;  %866 = vst [vmem:[#allocation2 + $0x90] sm:$0xff] %v834_v35  ;;  %v321_v18 = vadd.s32 112, %v8007_v25  ;;  %v1190_v19 = vpack.c.bf16 %v1162_v58, %v1161_v55 }
  0xc0   : > { %6451 = vmatpush3.bf16.msra.mxu0 %v7395_v59  ;;  %2578 = vmatprep.mubr.bf16.mxu0 %v1124_v2  ;;  %v7400_v2 = vld [vmem:[#allocation7 + $0x158] sm:$0xff]   ;;  %v971_v20 = vsel %vm939_vm9, 65537, %v10140_v36  ;;  %v835_v52 = vmax.f32 %v8240_v43, 0.0  ;;  %871 = vst [vmem:[#allocation2 + $0xb8] sm:$0xff] %v839_v28 }
  0xc1   : > { %6452 = vmatprep.subr.bf16.mxu0 %v7396_v5  ;;  %6051 = vmatmul.mubr.msk.bf16.vlgmr.msra.gmra.mrb[0].mxu1 %vm8105_vm15, %v1187_v39  ;;  %v1126_v5 = vpack.c.bf16 %v824_v15, %v823_v11  ;;  %v1240_v11 = vsel %vm1208_vm3, 65537, %v10140_v36  ;;  %v7401_v15 = vld [vmem:[#allocation7 + $0x118] sm:$0xff]   ;;  %v5853_v59 = vcombine.low %v971_v20, %v8015_v37  ;;  %vm8310_vm3 = vcmp.gt.s32.totalorder %v427_v57, 0 }
  0xc2   : > { %6052 = vmatprep.mubr.msk.bf16.mxu1 %vm8096_vm13, %v1396_v49  ;;  %v5867_v23 = vcombine.low %v8015_v37, %v1240_v11  ;;  %867 = vst [vmem:[#allocation2 + $0x98] sm:$0xff] %v835_v52  ;;  %v10297_v11 = vmov 0  ;;  %v973_v39 = vsel %vm941_vm1, 65537, %v10140_v36  ;;  %v441_v46 = vand.u32 15, %v321_v18  ;;  %v1163_v20 = vld [vmem:[#allocation2 + $0x49] sm:$0xff] }
  0xc3   : > { %v10298_v11 = vsel %vm8306_vm2, 4294967295, %v10297_v11  ;;  %vm8318_vm5 = vcmp.ne.s16.totalorder %v5853_v59, 0  ;;  %v5854_v21 = vcombine.low %v973_v39, %v8015_v37  ;;  %v1374_v58 = vld [vmem:[#allocation2 + $0x6f] sm:$0xff]  ;;  %v322_v59 = vadd.s32 120, %v8007_v25  ;;  %v1587_v40 = vld [vmem:[#allocation2 + $0x27] sm:$0xff] }
  0xc4   : > { %6453 = vmatpush3.bf16.msra.mxu0 %v7397_v16  ;;  %v406_v16 = vand.u32 15, %v316_v63  ;;  %vm8260_vm12 = vcmp.ne.s16.totalorder %v5867_v23, 0  ;;  %v8297_v63 = vld [vmem:[%s7989_s17 + $0x90] sm:$0xff]  ;;  %v10302_v22 = vsel %vm8318_vm5, 4294967295, %v10301_v22  ;;  %vm8390_vm1 = vcmp.gt.s32.totalorder %v441_v46, 0 }
  0xc5   : > { %6454 = vmatprep.subr.bf16.mxu0 %v7398_v27  ;;  %v1369_v27 = vld [vmem:[#allocation2 + $0x47] sm:$0xff]  ;;  %v1372_v6 = vld [vmem:[#allocation2 + $0x5f] sm:$0xff]  ;;  %vm8399_vm9 = vcmp.ne.s16.totalorder %v5854_v21, 0 }
  0xc6   : > { %vm8234_vm10 = vcmp.lt.s32.totalorder %v406_v16, 15  ;;  %v320_v16 = vadd.s32 104, %v8007_v25  ;;  %v1373_v57 = vld [vmem:[#allocation2 + $0x67] sm:$0xff] }
  0xc7   : > { %6035 = vmatmul.mubr.msk.bf16.gmra.mrb[4].mxu0 %vm8096_vm13, %v1395_v38  ;;  %v7402_v38 = vld [vmem:[#allocation7 + $0x160] sm:$0xff]   ;;  %vm1212_vm0 = vmpackc.low %vm8234_vm10, %vm8234_vm10  ;;  %v1166_v21 = vld [vmem:[#allocation2 + $0x61] sm:$0xff] }
  0xc8   : > { %2586 = vmatprep.mubr.bf16.mxu0 %v1125_v33  ;;  %6455 = vmatpush3.bf16.msra.mxu0 %v7399_v50  ;;  %v1370_v33 = vld [vmem:[#allocation2 + $0x4f] sm:$0xff]  ;;  %v10293_v50 = vmov 0  ;;  %v1244_v23 = vsel %vm1212_vm0, 65537, %v10140_v36 }
  0xc9   : > { %6456 = vmatprep.subr.bf16.mxu0 %v7400_v2  ;;  %6053 = vmatmul.mubr.msk.bf16.gmra.mrb[4].mxu1 %vm8179_vm7, %v1188_v3  ;;  %v10294_v50 = vsel %vm8260_vm12, 4294967295, %v10293_v50  ;;  %v1398_v51 = vpack.c.bf16 %v1370_v33, %v1369_v27  ;;  %v1371_v2 = vld [vmem:[#allocation2 + $0x57] sm:$0xff]  ;;  %v8302_v3 = vld [vmem:[%s7989_s17 + $0x98] sm:$0xff]  ;;  %v1128_v27 = vpack.c.bf16 %v828_v48, %v827_v47  ;;  %v8349_v48 = vld [vmem:[%s7989_s17 + $0xb0] sm:$0xff]  ;;  %v5869_v41 = vcombine.low %v8015_v37, %v1244_v23 }
  0xca   : > { %6054 = vmatprep.mubr.msk.bf16.mxu1 %vm8167_vm4, %v1397_v9  ;;  %v838_v12 = vmax.f32 %v8302_v3, 0.0  ;;  %v8338_v33 = vld [vmem:[%s7989_s17 + $0xa8] sm:$0xff]  ;;  %v1129_v23 = vpack.c.bf16 %v830_v1, %v829_v0  ;;  %v325_v1 = vadd.s32 144, %v8007_v25  ;;  %v332_v3 = vadd.s32 200, %v8007_v25 }
  0xcb   : > { %v840_v42 = vmax.f32 %v8338_v33, 0.0  ;;  %v7405_v47 = vld [vmem:[#allocation7 + $0x128] sm:$0xff]   ;;  %vm8379_vm10 = vcmp.ne.s16.totalorder %v5869_v41, 0  ;;  %v1400_v41 = vpack.c.bf16 %v1374_v58, %v1373_v57 }
  0xcc   : > { %6457 = vmatpush3.bf16.msra.mxu0 %v7401_v15  ;;  %870 = vst [vmem:[#allocation2 + $0xb0] sm:$0xff] %v838_v12  ;;  %v1165_v0 = vld [vmem:[#allocation2 + $0x59] sm:$0xff]  ;;  %v7408_v15 = vld [vmem:[#allocation7 + $0x1c0] sm:$0xff]  }
  0xcd   : > { %6458 = vmatprep.subr.bf16.mxu0 %v7402_v38  ;;  %v1399_v38 = vpack.c.bf16 %v1372_v6, %v1371_v2  ;;  %872 = vst [vmem:[#allocation2 + $0xc0] sm:$0xff] %v840_v42  ;;  %v323_v2 = vadd.s32 128, %v8007_v25  ;;  %v10305_v6 = vmov 0  ;;  %6562 = vmatprep.subr.bf16.mxu1 %v7408_v15  ;;  %v1375_v57 = vld [vmem:[#allocation2 + $0x77] sm:$0xff]  ;;  %v1376_v58 = vld [vmem:[#allocation2 + $0x7f] sm:$0xff] }
  0xce   : > { %v10306_v6 = vsel %vm8379_vm10, 4294967295, %v10305_v6  ;;  %v1401_v15 = vpack.c.bf16 %v1376_v58, %v1375_v57 }
  0xcf   : > { %6036 = vmatmul.mubr.msk.bf16.gmra.mrb[8].mxu0 %vm8167_vm4, %v1396_v49  ;;  %v1127_v49 = vpack.c.bf16 %v826_v26, %v825_v24  ;;  %v8275_v24 = vld [vmem:[%s7989_s17 + $0x88] sm:$0xff]  ;;  %v318_v26 = vadd.s32 88, %v8007_v25  ;;  %10307 = vst [vmem:[#allocation19_spill] sm:$0xff] %v10306_v6  ;;  %v455_v62 = vand.u32 15, %v323_v2  ;;  %v1170_v2 = vld [vmem:[#allocation2 + $0x81] sm:$0xff] }
  0xd0   : > { %2594 = vmatprep.mubr.bf16.mxu0 %v1126_v5  ;;  %v836_v53 = vmax.f32 %v8275_v24, 0.0  ;;  %6459 = vmatpush3.bf16.msra.mxu0 %v7403_v54  ;;  %v837_v5 = vmax.f32 %v8297_v63, 0.0  ;;  %v1164_v54 = vld [vmem:[#allocation2 + $0x51] sm:$0xff] }
  0xd1   : > { %6055 = vmatmul.mubr.msk.bf16.gmra.mrb[8].mxu1 %vm8260_vm12, %v1189_v44  ;;  %6460 = vmatprep.subr.bf16.mxu0 %v7404_v8  ;;  %v434_v44 = vand.u32 15, %v320_v16  ;;  %v8397_v16 = vld [vmem:[%s7989_s17 + $0xc0] sm:$0xff]  ;;  %v1191_v18 = vpack.c.bf16 %v1164_v54, %v1163_v20  ;;  %v448_v20 = vand.u32 15, %v322_v59  ;;  %v8439_v54 = vadd.s32 136, %v8007_v25 }
  0xd2   : > { %868 = vst [vmem:[#allocation2 + $0xa0] sm:$0xff] %v836_v53  ;;  %6056 = vmatprep.mubr.msk.bf16.mxu1 %vm8242_vm11, %v1398_v51  ;;  %869 = vst [vmem:[#allocation2 + $0xa8] sm:$0xff] %v837_v5  ;;  %v10115_v39 = vmax.f32 %v8397_v16, 0.0  ;;  %v1168_v8 = vld [vmem:[#allocation2 + $0x71] sm:$0xff] }
  0xd3   : > { %vm8386_vm0 = vcmp.lt.s32.totalorder %v434_v44, 15  ;;  %v462_v57 = vand.u32 15, %v8439_v54  ;;  %v10329_v54 = vmov 0 }
  0xd4   : > { %6461 = vmatpush3.bf16.msra.mxu0 %v7405_v47  ;;  %v7407_v47 = vld [vmem:[#allocation7 + $0x130] sm:$0xff]   ;;  %875 = vst [vmem:[#allocation2 + $0xd8] sm:$0xff] %v10115_v39 }
  0xd5   : > { %6462 = vmatprep.subr.bf16.mxu0 %v7406_v56  ;;  %v7409_v56 = vld [vmem:[#allocation7 + $0x180] sm:$0xff]  }
  0xd6   : > { %6563 = vmatpush3.bf16.msra.mxu1 %v7409_v56  ;;  %v1377_v56 = vld [vmem:[#allocation2 + $0x87] sm:$0xff] }
  0xd7   : > { %6037 = vmatmul.mubr.msk.bf16.gmra.mrb[12].mxu0 %vm8242_vm11, %v1397_v9  ;;  %v420_v9 = vand.u32 15, %v318_v26  ;;  %v8370_v26 = vld [vmem:[%s7989_s17 + $0xb8] sm:$0xff] }
  0xd8   : > { %2602 = vmatprep.mubr.bf16.mxu0 %v1127_v49  ;;  %v10123_v49 = vmax.f32 %v8349_v48, 0.0  ;;  %v10120_v55 = vmax.f32 %v8370_v26, 0.0  ;;  %6463 = vmatpush3.bf16.msra.mxu0 %v7407_v47  ;;  %v1192_v47 = vpack.c.bf16 %v1166_v21, %v1165_v0  ;;  %v10323_v0 = vmov 0 }
  0xd9   : > { %6057 = vmatmul.mubr.msk.bf16.gmra.mrb[12].mxu1 %vm8306_vm2, %v1190_v19  ;;  %vm8362_vm8 = vcmp.lt.s32.totalorder %v420_v9, 15  ;;  %v10312_v19 = vmov 0 }
  0xda   : > { %6058 = vmatprep.mubr.msk.bf16.mxu1 %vm8318_vm5, %v1399_v38  ;;  %873 = vst [vmem:[#allocation2 + $0xc8] sm:$0xff] %v10123_v49  ;;  %vm1214_vm14 = vmpackc.low %vm8362_vm8, %vm8362_vm8  ;;  %v10313_v19 = vsel %vm8399_vm9, 4294967295, %v10312_v19  ;;  %v10365_v49 = vmov 0 }
  0xdb   : > { %874 = vst [vmem:[#allocation2 + $0xd0] sm:$0xff] %v10120_v55  ;;  %10314 = vst [vmem:[#allocation20_spill] sm:$0xff] %v10313_v19  ;;  %v1246_v60 = vsel %vm1214_vm14, 65537, %v10140_v36  ;;  %vm8441_vm14 = vcmp.lt.s32.totalorder %v448_v20, 15  ;;  %v1130_v20 = vpack.c.bf16 %v832_v17, %v831_v14  ;;  %v10110_v14 = vmax.f32 %v8480_v10, 0.0  ;;  %v1167_v17 = vld [vmem:[#allocation2 + $0x69] sm:$0xff] }
  0xdc   : > { %vm10315_vm8 = vmpackc.low %vm8310_vm3, %vm8310_vm3  ;;  %v337_v55 = vadd.s32 240, %v8007_v25 }
  0xdd   : > { %v975_v44 = vsel %vm10315_vm8, 65537, %v10140_v36  ;;  %vm8445_vm8 = vcmp.gt.s32.totalorder %v455_v62, 0  ;;  %v7411_v62 = vld [vmem:[#allocation7 + $0x188] sm:$0xff]   ;;  %878 = vst [vmem:[#allocation2 + $0xf0] sm:$0xff] %v10110_v14  ;;  %v10350_v14 = vmov 0 }
  0xde   : > { %vm947_vm11 = vmpackc.low %vm8445_vm8, %vm8445_vm8 }
  0xdf   : > { %6038 = vmatmul.mubr.msk.bf16.gmra.mrb[16].mxu0 %vm8318_vm5, %v1398_v51  ;;  %vm1216_vm5 = vmpackc.low %vm8386_vm0, %vm8386_vm0  ;;  %v5855_v51 = vcombine.low %v975_v44, %v8015_v37  ;;  %v10320_v44 = vmov 0 }
  0xe0   : > { %2610 = vmatprep.mubr.bf16.mxu0 %v1128_v27  ;;  %v8408_v27 = vld [vmem:[%s7989_s17 + $0xc8] sm:$0xff]  ;;  %vm10326_vm0 = vmpackc.low %vm8390_vm1, %vm8390_vm1 }
  0xe1   : > { %v10114_v46 = vmax.f32 %v8408_v27, 0.0  ;;  %6059 = vmatmul.mubr.msk.bf16.gmra.mrb[16].mxu1 %vm8379_vm10, %v1191_v18  ;;  %v469_v18 = vand.u32 15, %v325_v1  ;;  %vm8449_vm3 = vcmp.ne.s16.totalorder %v5855_v51, 0  ;;  %v8464_v1 = vld [vmem:[%s7989_s17 + $0xd0] sm:$0xff]  ;;  %v977_v9 = vsel %vm10326_vm0, 65537, %v10140_v36 }
  0xe2   : > { %6060 = vmatprep.mubr.msk.bf16.mxu1 %vm8399_vm9, %v1400_v41  ;;  %v10321_v44 = vsel %vm8449_vm3, 4294967295, %v10320_v44  ;;  %v10113_v13 = vmax.f32 %v8464_v1, 0.0  ;;  %v7412_v51 = vld [vmem:[#allocation7 + $0x1d0] sm:$0xff]   ;;  %v1387_v33 = vld [vmem:[#allocation2 + $0xd7] sm:$0xff] }
  0xe3   : > { %876 = vst [vmem:[#allocation2 + $0xe0] sm:$0xff] %v10114_v46  ;;  %10322 = vst [vmem:[#allocation21_spill] sm:$0xff] %v10321_v44  ;;  %vm8500_vm1 = vcmp.gt.s32.totalorder %v469_v18, 0  ;;  %v1131_v18 = vpack.c.bf16 %v834_v35, %v833_v34  ;;  %v7417_v34 = vld [vmem:[#allocation7 + $0x138] sm:$0xff]   ;;  %v1169_v35 = vld [vmem:[#allocation2 + $0x79] sm:$0xff] }
  0xe4   : > { %877 = vst [vmem:[#allocation2 + $0xe8] sm:$0xff] %v10113_v13  ;;  %v7425_v46 = vld [vmem:[#allocation7 + $0x1b8] sm:$0xff]  }
  0xe7   : > { %6039 = vmatmul.mubr.msk.bf16.gmra.mrb[20].mxu0 %vm8399_vm9, %v1399_v38  ;;  %v5870_v38 = vcombine.low %v8015_v37, %v1246_v60  ;;  %v1248_v60 = vsel %vm1216_vm5, 65537, %v10140_v36 }
  0xe8   : > { %2618 = vmatprep.mubr.bf16.mxu0 %v1129_v23  ;;  %v7410_v23 = vld [vmem:[#allocation7 + $0x1c8] sm:$0xff]   ;;  %v5871_v21 = vcombine.low %v8015_v37, %v1248_v60  ;;  %v327_v60 = vadd.s32 160, %v8007_v25 }
  0xe9   : > { %vm8466_vm9 = vcmp.ne.s16.totalorder %v5870_v38, 0  ;;  %6564 = vmatprep.subr.bf16.mxu1 %v7410_v23  ;;  %v5856_v38 = vcombine.low %v977_v9, %v8015_v37  ;;  %v7414_v23 = vld [vmem:[#allocation7 + $0x1d8] sm:$0xff]   ;;  %v10332_v9 = vmov 0 }
  0xea   : > { %v10324_v0 = vsel %vm8466_vm9, 4294967295, %v10323_v0  ;;  %6565 = vmatpush3.bf16.msra.mxu1 %v7411_v62  ;;  %vm8505_vm0 = vcmp.ne.s16.totalorder %v5871_v21, 0  ;;  %v1193_v62 = vpack.c.bf16 %v1168_v8, %v1167_v17  ;;  %v979_v21 = vsel %vm947_vm11, 65537, %v10140_v36  ;;  %v8527_v17 = vld [vmem:[%s7989_s17 + $0xe8] sm:$0xff] }
  0xeb   : > { %10325 = vst [vmem:[#allocation22_spill] sm:$0xff] %v10324_v0  ;;  %6061 = vmatmul.mubr.msk.bf16.gmra.mrb[20].mxu1 %vm8466_vm9, %v1192_v47  ;;  %6566 = vmatprep.subr.bf16.mxu1 %v7412_v51  ;;  %v1378_v47 = vld [vmem:[#allocation2 + $0x8f] sm:$0xff]  ;;  %v10330_v54 = vsel %vm8505_vm0, 4294967295, %v10329_v54  ;;  %vm8509_vm5 = vcmp.ne.s16.totalorder %v5856_v38, 0  ;;  %v10104_v30 = vmax.f32 %v8527_v17, 0.0  ;;  %v5857_v59 = vcombine.low %v979_v21, %v8015_v37 }
  0xec   : > { %6062 = vmatprep.mubr.msk.bf16.mxu1 %vm8449_vm3, %v1401_v15  ;;  %10331 = vst [vmem:[#allocation23_spill] sm:$0xff] %v10330_v54  ;;  %v10333_v9 = vsel %vm8509_vm5, 4294967295, %v10332_v9  ;;  %v7416_v51 = vld [vmem:[#allocation7 + $0x178] sm:$0xff]   ;;  %v1402_v8 = vpack.c.bf16 %v1378_v47, %v1377_v56  ;;  %v326_v56 = vadd.s32 152, %v8007_v25  ;;  %v1379_v47 = vld [vmem:[#allocation2 + $0x97] sm:$0xff] }
  0xed   : > { %10334 = vst [vmem:[#allocation24_spill] sm:$0xff] %v10333_v9  ;;  %6464 = vmatprep.subr.bf16.mxu0 %v7416_v51  ;;  %880 = vst [vmem:[#allocation2 + $0x100] sm:$0xff] %v10104_v30  ;;  %v7419_v30 = vld [vmem:[#allocation7 + $0x1a0] sm:$0xff]   ;;  %vm8567_vm11 = vcmp.ne.s16.totalorder %v5857_v59, 0  ;;  %v7423_v51 = vld [vmem:[#allocation7 + $0x1b0] sm:$0xff]  }
  0xee   : > { %6465 = vmatpush3.bf16.msra.mxu0 %v7417_v34  ;;  %v10340_v34 = vmov 0 }
  0xef   : > { %6040 = vmatmul.mubr.msk.bf16.gmra.mrb[24].mxu0 %vm8449_vm3, %v1400_v41  ;;  %v7413_v41 = vld [vmem:[#allocation7 + $0x190] sm:$0xff]   ;;  %vm10335_vm3 = vmpackc.low %vm8441_vm14, %vm8441_vm14  ;;  %v10341_v34 = vsel %vm8567_vm11, 4294967295, %v10340_v34 }
  0xf0   : > { %2626 = vmatprep.mubr.bf16.mxu0 %v1130_v20  ;;  %6567 = vmatpush3.bf16.msra.mxu1 %v7413_v41  ;;  %v7415_v20 = vld [vmem:[#allocation7 + $0x198] sm:$0xff]   ;;  %v8524_v41 = vld [vmem:[%s7989_s17 + $0xe0] sm:$0xff]  ;;  %v1250_v31 = vsel %vm10335_vm3, 65537, %v10140_v36  ;;  %vm8550_vm3 = vcmp.lt.s32.totalorder %v462_v57, 15  ;;  %v476_v57 = vand.u32 15, %v326_v56  ;;  %10342 = vst [vmem:[#allocation25_spill] sm:$0xff] %v10341_v34  ;;  %vm10343_vm14 = vmpackc.low %vm8500_vm1, %vm8500_vm1 }
  0xf1   : > { %6568 = vmatprep.subr.bf16.mxu1 %v7414_v23  ;;  %v10105_v38 = vmax.f32 %v8524_v41, 0.0  ;;  %v483_v23 = vand.u32 15, %v327_v60  ;;  %v7418_v60 = vld [vmem:[#allocation7 + $0x1e0] sm:$0xff]   ;;  %v10344_v56 = vmov 0  ;;  %vm10347_vm1 = vmpackc.low %vm8550_vm3, %vm8550_vm3 }
  0xf2   : > { %v1252_v58 = vsel %vm10347_vm1, 65537, %v10140_v36  ;;  %vm8619_vm3 = vcmp.lt.s32.totalorder %v476_v57, 15 }
  0xf3   : > { %879 = vst [vmem:[#allocation2 + $0xf8] sm:$0xff] %v10105_v38  ;;  %6063 = vmatmul.mubr.msk.bf16.gmra.mrb[24].mxu1 %vm8505_vm0, %v1193_v62  ;;  %v329_v62 = vadd.s32 176, %v8007_v25  ;;  %vm8561_vm8 = vcmp.gt.s32.totalorder %v483_v23, 0  ;;  %v7421_v38 = vld [vmem:[#allocation7 + $0x1a8] sm:$0xff]   ;;  %v328_v23 = vadd.s32 168, %v8007_v25 }
  0xf4   : > { %6569 = vmatpush3.bf16.msra.mxu1 %v7415_v20  ;;  %6064 = vmatprep.mubr.msk.bf16.mxu1 %vm8509_vm5, %v1402_v8  ;;  %v5872_v20 = vcombine.low %v8015_v37, %v1250_v31  ;;  %v8565_v31 = vpack.c.bf16 %v1170_v2, %v1169_v35  ;;  %v8584_v35 = vld [vmem:[%s7989_s17 + $0xf0] sm:$0xff]  ;;  %v8587_v2 = vld [vmem:[%s7989_s17 + $0xf8] sm:$0xff] }
  0xf5   : > { %6570 = vmatprep.subr.bf16.mxu1 %v7418_v60  ;;  %v8575_v60 = vpack.c.bf16 %v836_v53, %v835_v52  ;;  %v10109_v24 = vmax.f32 %v8584_v35, 0.0  ;;  %v10108_v52 = vmax.f32 %v8587_v2, 0.0  ;;  %v7422_v53 = vld [vmem:[#allocation7 + $0x1f0] sm:$0xff]   ;;  %v497_v59 = vand.u32 15, %v329_v62 }
  0xf6   : > { %v1381_v62 = vld [vmem:[#allocation2 + $0xa7] sm:$0xff]  ;;  %v490_v57 = vand.u32 15, %v328_v23 }
  0xf7   : > { %6041 = vmatmul.mubr.msk.bf16.gmra.mrb[28].mxu0 %vm8509_vm5, %v1401_v15  ;;  %v1380_v15 = vld [vmem:[#allocation2 + $0x9f] sm:$0xff]  ;;  %vm8589_vm5 = vcmp.ne.s16.totalorder %v5872_v20, 0  ;;  %881 = vst [vmem:[#allocation2 + $0x108] sm:$0xff] %v10109_v24  ;;  %882 = vst [vmem:[#allocation2 + $0x110] sm:$0xff] %v10108_v52  ;;  %v7424_v52 = vld [vmem:[#allocation7 + $0x1f8] sm:$0xff]  }
  0xf8   : > { %2634 = vmatprep.mubr.bf16.mxu0 %v1131_v18  ;;  %v7420_v18 = vld [vmem:[#allocation7 + $0x1e8] sm:$0xff]   ;;  %6571 = vmatpush3.bf16.msra.mxu1 %v7419_v30  ;;  %v981_v30 = vsel %vm10343_vm14, 65537, %v10140_v36  ;;  %v10345_v56 = vsel %vm8589_vm5, 4294967295, %v10344_v56  ;;  %v8593_v43 = vpack.c.bf16 %v1380_v15, %v1379_v47  ;;  %v1171_v47 = vld [vmem:[#allocation2 + $0x89] sm:$0xff]  ;;  %vm1222_vm14 = vmpackc.low %vm8619_vm3, %vm8619_vm3 }
  0xf9   : > { %6572 = vmatprep.subr.bf16.mxu1 %v7420_v18  ;;  %10346 = vst [vmem:[#allocation26_spill] sm:$0xff] %v10345_v56  ;;  %v1172_v15 = vld [vmem:[#allocation2 + $0x91] sm:$0xff]  ;;  %v5858_v20 = vcombine.low %v981_v30, %v8015_v37  ;;  %v330_v18 = vadd.s32 184, %v8007_v25  ;;  %v331_v30 = vadd.s32 192, %v8007_v25  ;;  %vm10355_vm3 = vmpackc.low %vm8561_vm8, %vm8561_vm8  ;;  %vm8669_vm8 = vcmp.lt.s32.totalorder %v490_v57, 15 }
  0xfa   : > { %v1382_v24 = vld [vmem:[#allocation2 + $0xaf] sm:$0xff]  ;;  %v8639_v39 = vpack.c.bf16 %v1172_v15, %v1171_v47  ;;  %v983_v23 = vsel %vm10355_vm3, 65537, %v10140_v36  ;;  %v1173_v15 = vld [vmem:[#allocation2 + $0x99] sm:$0xff]  ;;  %v518_v57 = vand.u32 15, %v332_v3  ;;  %v8712_v3 = vpack.c.bf16 %v840_v42, %v839_v28 }
  0xfb   : > { %6065 = vmatmul.mubr.msk.bf16.gmra.mrb[28].mxu1 %vm8589_vm5, %v8565_v31  ;;  %vm8628_vm1 = vcmp.ne.s16.totalorder %v5858_v20, 0  ;;  %vm8635_vm5 = vcmp.gt.s32.totalorder %v497_v59, 0  ;;  %v8653_v59 = vld [vmem:[#allocation7 + $0x200] sm:$0xff]   ;;  %v10356_v20 = vmov 0  ;;  %v8659_v47 = vpack.c.bf16 %v1382_v24, %v1381_v62  ;;  %v1384_v62 = vld [vmem:[#allocation2 + $0xbf] sm:$0xff] }
  0xfc   : > { %6573 = vmatpush3.bf16.msra.mxu1 %v7421_v38  ;;  %6066 = vmatprep.mubr.msk.bf16.mxu1 %vm8567_vm11, %v8593_v43  ;;  %v5873_v38 = vcombine.low %v8015_v37, %v1252_v58  ;;  %v10351_v14 = vsel %vm8628_vm1, 4294967295, %v10350_v14  ;;  %v504_v58 = vand.u32 15, %v330_v18  ;;  %v511_v63 = vand.u32 15, %v331_v30 }
  0xfd   : > { %6574 = vmatprep.subr.bf16.mxu1 %v7422_v53  ;;  %10352 = vst [vmem:[#allocation27_spill] sm:$0xff] %v10351_v14  ;;  %v8645_v53 = vpack.c.bf16 %v838_v12, %v837_v5  ;;  %v1254_v5 = vsel %vm1222_vm14, 65537, %v10140_v36  ;;  %v333_v12 = vadd.s32 208, %v8007_v25  ;;  %7170 = vmatprep.subr.bf16.mxu0 %v8653_v59  ;;  %v5859_v21 = vcombine.low %v983_v23, %v8015_v37  ;;  %vm1224_vm14 = vmpackc.low %vm8669_vm8, %vm8669_vm8 }
  0xfe   : > { %v334_v24 = vadd.s32 216, %v8007_v25  ;;  %vm8681_vm3 = vcmp.lt.s32.totalorder %v504_v58, 15  ;;  %v336_v58 = vadd.s32 232, %v8007_v25  ;;  %vm10368_vm8 = vmpackc.low %vm8635_vm5, %vm8635_vm5  ;;  %vm8729_vm10 = vcmp.lt.s32.totalorder %v518_v57, 15 }
  0xff   : > { %6042 = vmatmul.mubr.msk.bf16.gmra.mrb[32].mxu0 %vm8567_vm11, %v1402_v8  ;;  %vm8655_vm11 = vcmp.ne.s16.totalorder %v5873_v38, 0  ;;  %v335_v8 = vadd.s32 224, %v8007_v25  ;;  %v1383_v38 = vld [vmem:[#allocation2 + $0xb7] sm:$0xff]  ;;  %v525_v23 = vand.u32 15, %v333_v12  ;;  %vm1226_vm0 = vmpackc.low %vm8681_vm3, %vm8681_vm3  ;;  %v985_v12 = vsel %vm10368_vm8, 65537, %v10140_v36 }
 0x100   : > { %2642 = vmatprep.mubr.bf16.mxu0 %v8575_v60  ;;  %6575 = vmatpush3.bf16.msra.mxu1 %v7423_v51  ;;  %v10357_v20 = vsel %vm8655_vm11, 4294967295, %v10356_v20  ;;  %v5874_v51 = vcombine.low %v8015_v37, %v1254_v5  ;;  %v8727_v29 = vpack.c.bf16 %v1384_v62, %v1383_v38  ;;  %v546_v28 = vand.u32 15, %v336_v58  ;;  %v1175_v38 = vld [vmem:[#allocation2 + $0xa9] sm:$0xff]  ;;  %v1176_v62 = vld [vmem:[#allocation2 + $0xb1] sm:$0xff] }
 0x101   : > { %6576 = vmatprep.subr.bf16.mxu1 %v7424_v52  ;;  %10358 = vst [vmem:[#allocation28_spill] sm:$0xff] %v10357_v20  ;;  %v10369_v52 = vmov 0  ;;  %v1256_v42 = vsel %vm1224_vm14, 65537, %v10140_v36  ;;  %v1258_v13 = vsel %vm1226_vm0, 65537, %v10140_v36  ;;  %vm8735_vm5 = vcmp.gt.s32.totalorder %v525_v23, 0  ;;  %v1385_v23 = vld [vmem:[#allocation2 + $0xc7] sm:$0xff]  ;;  %vm10398_vm0 = vmpackc.low %vm8729_vm10, %vm8729_vm10 }
 0x102   : > { %vm8723_vm9 = vcmp.ne.s16.totalorder %v5874_v51, 0  ;;  %v5860_v18 = vcombine.low %v985_v12, %v8015_v37  ;;  %v338_v51 = vadd.s32 248, %v8007_v25  ;;  %v5875_v30 = vcombine.low %v8015_v37, %v1256_v42  ;;  %vm957_vm8 = vmpackc.low %vm8735_vm5, %vm8735_vm5  ;;  %v1386_v25 = vld [vmem:[#allocation2 + $0xcf] sm:$0xff] }
 0x103   : > { %6067 = vmatmul.mubr.msk.bf16.gmra.mrb[32].mxu1 %vm8655_vm11, %v8639_v39  ;;  %vm8690_vm11 = vcmp.gt.s32.totalorder %v511_v63, 0  ;;  %v532_v63 = vand.u32 15, %v334_v24  ;;  %v10370_v52 = vsel %vm8723_vm9, 4294967295, %v10369_v52  ;;  %v5876_v57 = vcombine.low %v8015_v37, %v1258_v13 }
 0x104   : > { %6577 = vmatpush3.bf16.msra.mxu1 %v7425_v46  ;;  %6068 = vmatprep.mubr.msk.bf16.mxu1 %vm8628_vm1, %v8659_v47  ;;  %v1174_v46 = vld [vmem:[#allocation2 + $0xa1] sm:$0xff]  ;;  %vm955_vm3 = vmpackc.low %vm8690_vm11, %vm8690_vm11  ;;  %10371 = vst [vmem:[#allocation30_spill] sm:$0xff] %v10370_v52  ;;  %v10387_v42 = vmax.f32 %v8349_v48, 0.0  ;;  %v10388_v13 = vmax.f32 %v8370_v26, 0.0  ;;  %vm8799_vm4 = vcmp.ne.s16.totalorder %v5875_v30, 0  ;;  %v10395_v48 = vmov 0 }
 0x105   : > { %v8706_v5 = vpack.c.bf16 %v1174_v46, %v1173_v15  ;;  %v553_v15 = vand.u32 15, %v337_v55  ;;  %vm8744_vm11 = vcmp.lt.s32.totalorder %v532_v63, 15  ;;  %vm8805_vm5 = vcmp.ne.s16.totalorder %v5876_v57, 0 }
 0x106   : > { %v8793_v24 = vpack.c.bf16 %v10388_v13, %v10387_v42  ;;  %v1260_v26 = vsel %vm10398_vm0, 65537, %v10140_v36  ;;  %v10404_v13 = vmax.f32 %v8397_v16, 0.0  ;;  %v10405_v58 = vmax.f32 %v8408_v27, 0.0  ;;  %v1179_v16 = vld [vmem:[#allocation2 + $0xc9] sm:$0xff]  ;;  %v1180_v27 = vld [vmem:[#allocation2 + $0xd1] sm:$0xff] }
 0x107   : > { %6043 = vmatmul.mubr.msk.bf16.gmra.mrb[36].mxu0 %vm8628_vm1, %v8593_v43  ;;  %vm8699_vm1 = vcmp.ne.s16.totalorder %v5859_v21, 0  ;;  %v539_v21 = vand.u32 15, %v335_v8  ;;  %v987_v8 = vsel %vm955_vm3, 65537, %v10140_v36  ;;  %vm8768_vm3 = vcmp.lt.s32.totalorder %v546_v28, 15 }
 0x108   : > { %2650 = vmatprep.mubr.bf16.mxu0 %v8645_v53  ;;  %v10366_v49 = vsel %vm8699_vm1, 4294967295, %v10365_v49  ;;  %v5861_v63 = vcombine.low %v987_v8, %v8015_v37  ;;  %v8787_v28 = vpack.c.bf16 %v1176_v62, %v1175_v38  ;;  %v10389_v8 = vmov 0  ;;  %v1178_v62 = vld [vmem:[#allocation2 + $0xc1] sm:$0xff] }
 0x109   : > { %10367 = vst [vmem:[#allocation29_spill] sm:$0xff] %v10366_v49  ;;  %vm8755_vm14 = vcmp.gt.s32.totalorder %v539_v21, 0  ;;  %v10384_v21 = vmov 0  ;;  %v10390_v8 = vsel %vm8799_vm4, 4294967295, %v10389_v8  ;;  %v8803_v49 = vpack.c.bf16 %v1386_v25, %v1385_v23  ;;  %v1388_v23 = vld [vmem:[#allocation2 + $0xdf] sm:$0xff] }
 0x10a   : > { %10391 = vst [vmem:[#allocation32_spill] sm:$0xff] %v10390_v8  ;;  %v10392_v38 = vmov 0  ;;  %vm10400_vm10 = vmpackc.low %vm8755_vm14, %vm8755_vm14  ;;  %v5877_v55 = vcombine.low %v8015_v37, %v1260_v26  ;;  %v10410_v26 = vmov 0  ;;  %v10424_v12 = vmax.f32 %v8524_v41, 0.0  ;;  %v1184_v41 = vld [vmem:[#allocation2 + $0xf1] sm:$0xff] }
 0x10b   : > { %6069 = vmatmul.mubr.msk.bf16.gmra.mrb[36].mxu1 %vm8723_vm9, %v8706_v5  ;;  %vm8780_vm9 = vcmp.ne.s16.totalorder %v5860_v18, 0  ;;  %v560_v18 = vand.u32 15, %v338_v51  ;;  %v10393_v38 = vsel %vm8805_vm5, 4294967295, %v10392_v38  ;;  %v1177_v51 = vld [vmem:[#allocation2 + $0xb9] sm:$0xff]  ;;  %v991_v25 = vsel %vm10400_vm10, 65537, %v10140_v36 }
 0x10c   : > { %6070 = vmatprep.mubr.msk.bf16.mxu1 %vm8699_vm1, %v8727_v29  ;;  %v10385_v21 = vsel %vm8780_vm9, 4294967295, %v10384_v21  ;;  %10394 = vst [vmem:[#allocation33_spill] sm:$0xff] %v10393_v38  ;;  %v8857_v42 = vpack.c.bf16 %v1178_v62, %v1177_v51  ;;  %v1389_v51 = vld [vmem:[#allocation2 + $0xe7] sm:$0xff]  ;;  %v1390_v62 = vld [vmem:[#allocation2 + $0xef] sm:$0xff] }
 0x10d   : > { %10386 = vst [vmem:[#allocation31_spill] sm:$0xff] %v10385_v21  ;;  %vm8849_vm0 = vcmp.lt.s32.totalorder %v560_v18, 15  ;;  %v8872_v18 = vpack.c.bf16 %v1388_v23, %v1387_v33  ;;  %v5863_v33 = vcombine.low %v991_v25, %v8015_v37  ;;  %v8890_v23 = vpack.c.bf16 %v1180_v27, %v1179_v16  ;;  %v1182_v25 = vld [vmem:[#allocation2 + $0xe1] sm:$0xff]  ;;  %v1391_v27 = vld [vmem:[#allocation2 + $0xf7] sm:$0xff] }
 0x10e   : > { %v8898_v21 = vpack.c.bf16 %v1390_v62, %v1389_v51  ;;  %v10420_v16 = vmov 0  ;;  %v1392_v51 = vld [vmem:[#allocation2 + $0xff] sm:$0xff] }
 0x10f   : > { %6044 = vmatmul.mubr.msk.bf16.gmra.mrb[40].mxu0 %vm8699_vm1, %v8659_v47  ;;  %vm8776_vm1 = vcmp.gt.s32.totalorder %v553_v15, 0  ;;  %v989_v15 = vsel %vm957_vm8, 65537, %v10140_v36  ;;  %vm8812_vm8 = vcmp.ne.s16.totalorder %v5861_v63, 0  ;;  %vm8907_vm10 = vcmp.ne.s16.totalorder %v5863_v33, 0 }
 0x110   : > { %2658 = vmatprep.mubr.bf16.mxu0 %v8712_v3  ;;  %vm961_vm2 = vmpackc.low %vm8776_vm1, %vm8776_vm1  ;;  %v10396_v48 = vsel %vm8812_vm8, 4294967295, %v10395_v48  ;;  %v5862_v30 = vcombine.low %v989_v15, %v8015_v37  ;;  %v8863_v15 = vpack.c.bf16 %v10405_v58, %v10404_v13  ;;  %v10414_v13 = vmax.f32 %v8480_v10, 0.0  ;;  %10416 = vst [vmem:[#allocation39_spill] sm:$0xff] %v8898_v21 }
 0x111   : > { %10397 = vst [vmem:[#allocation34_spill] sm:$0xff] %v10396_v48  ;;  %vm10399_vm1 = vmpackc.low %vm8744_vm11, %vm8744_vm11  ;;  %v993_v63 = vsel %vm961_vm2, 65537, %v10140_v36  ;;  %v10421_v16 = vsel %vm8907_vm10, 4294967295, %v10420_v16  ;;  %v8938_v48 = vpack.c.bf16 %v1392_v51, %v1391_v27  ;;  %v1394_v27 = vld [vmem:[#allocation2 + $0x10f] sm:$0xff] }
 0x112   : > { %v1262_v57 = vsel %vm10399_vm1, 65537, %v10140_v36  ;;  %vm10401_vm11 = vmpackc.low %vm8768_vm3, %vm8768_vm3  ;;  %10406 = vst [vmem:[#allocation35_spill] sm:$0xff] %v8863_v15  ;;  %vm8865_vm14 = vcmp.ne.s16.totalorder %v5862_v30, 0  ;;  %vm8874_vm3 = vcmp.ne.s16.totalorder %v5877_v55, 0  ;;  %v10413_v55 = vmax.f32 %v8464_v1, 0.0 }
 0x113   : > { %6071 = vmatmul.mubr.msk.bf16.gmra.mrb[40].mxu1 %vm8799_vm4, %v8787_v28  ;;  %v1264_v46 = vsel %vm10401_vm11, 65537, %v10140_v36  ;;  %v10407_v36 = vmov 0  ;;  %vm1234_vm2 = vmpackc.low %vm8849_vm0, %vm8849_vm0  ;;  %v10411_v26 = vsel %vm8874_vm3, 4294967295, %v10410_v26  ;;  %v5878_v30 = vcombine.low %v8015_v37, %v1262_v57  ;;  %v1181_v57 = vld [vmem:[#allocation2 + $0xd9] sm:$0xff]  ;;  %10422 = vst [vmem:[#allocation41_spill] sm:$0xff] %v10421_v16  ;;  %v1186_v16 = vld [vmem:[#allocation2 + $0x101] sm:$0xff] }
 0x114   : > { %6072 = vmatprep.mubr.msk.bf16.mxu1 %vm8780_vm9, %v8803_v49  ;;  %v10408_v36 = vsel %vm8865_vm14, 4294967295, %v10407_v36  ;;  %10412 = vst [vmem:[#allocation37_spill] sm:$0xff] %v10411_v26  ;;  %v8896_v58 = vpack.c.bf16 %v10414_v13, %v10413_v55  ;;  %v10423_v1 = vmov 0   ;;  %v5864_v62 = vcombine.low %v993_v63, %v8015_v37  ;;  %10430 = vst [vmem:[#allocation44_spill] sm:$0xff] %v8938_v48  ;;  %v7446_v26 = vld [vmem:[#allocation10 + $0x70] sm:$0xff]  }
 0x115   : > { %10409 = vst [vmem:[#allocation36_spill] sm:$0xff] %v10408_v36  ;;  %vm8900_vm1 = vcmp.ne.s16.totalorder %v5878_v30, 0  ;;  %v1266_v10 = vsel %vm1234_vm2, 65537, %v10423_v1  ;;  %v5879_v30 = vcombine.low %v8015_v37, %v1264_v46  ;;  %v8926_v33 = vpack.c.bf16 %v1182_v25, %v1181_v57  ;;  %v1183_v46 = vld [vmem:[#allocation2 + $0xe9] sm:$0xff]  ;;  %v1507_v57 = vld [vmem:[#allocation2 + $0x19] sm:$0xff] }
 0x116   : > { %10415 = vst [vmem:[#allocation38_spill] sm:$0xff] %v8896_v58  ;;  %v10425_v55 = vmax.f32 %v8527_v17, 0.0  ;;  %vm8934_vm11 = vcmp.ne.s16.totalorder %v5864_v62, 0  ;;  %v10427_v1 = vmov 0  ;;  %v10431_v63 = vmov 0  ;;  %v1508_v17 = vld [vmem:[#allocation2 + $0x21] sm:$0xff] }
 0x117   : > { %6045 = vmatmul.mubr.msk.bf16.gmra.mrb[44].mxu0 %vm8780_vm9, %v8727_v29  ;;  %v10428_v1 = vsel %vm8934_vm11, 4294967295, %v10427_v1  ;;  %vm8940_vm0 = vcmp.ne.s16.totalorder %v5879_v30, 0  ;;  %v1393_v25 = vld [vmem:[#allocation2 + $0x107] sm:$0xff]  ;;  %v8954_v51 = vpack.c.bf16 %v1184_v41, %v1183_v46  ;;  %v1539_v62 = vpack.c.bf16 %v1508_v17, %v1507_v57  ;;  %v1668_v46 = vld [vmem:[#allocation2 + $0x30] sm:$0xff] }
 0x118   : > { %2666 = vmatprep.mubr.bf16.mxu0 %v8793_v24  ;;  %v8932_v13 = vpack.c.bf16 %v10425_v55, %v10424_v12  ;;  %10429 = vst [vmem:[#allocation43_spill] sm:$0xff] %v10428_v1  ;;  %v10432_v63 = vsel %vm8940_vm0, 4294967295, %v10431_v63  ;;  %v8956_v30 = vpack.c.bf16 %v1394_v27, %v1393_v25  ;;  %v10435_v12 = vmax.f32 %v8584_v35, 0.0  ;;  %v1667_v35 = vld [vmem:[#allocation2 + $0x28] sm:$0xff]  ;;  %v1510_v57 = vld [vmem:[#allocation2 + $0x31] sm:$0xff]  ;;  %v1511_v1 = vld [vmem:[#allocation2 + $0x39] sm:$0xff] }
 0x119   : > { %10433 = vst [vmem:[#allocation45_spill] sm:$0xff] %v10432_v63  ;;  %v10436_v55 = vmax.f32 %v8587_v2, 0.0  ;;  %v5880_v2 = vcombine.low %v8015_v37, %v1266_v10  ;;  %v1509_v41 = vld [vmem:[#allocation2 + $0x29] sm:$0xff]  ;;  %v10438_v27 = vmov 0  ;;  %v1669_v37 = vld [vmem:[#allocation2 + $0x38] sm:$0xff] }
 0x11a   : > { %10426 = vst [vmem:[#allocation42_spill] sm:$0xff] %v8932_v13  ;;  %10434 = vst [vmem:[#allocation46_spill] sm:$0xff] %v8956_v30  ;;  %v7429_v10 = vld [vmem:[#allocation7 + $0x218] sm:$0xff]  }
 0x11b   : > { %6073 = vmatmul.mubr.msk.bf16.gmra.mrb[44].mxu1 %vm8805_vm5, %v8857_v42  ;;  %v8962_v36 = vpack.c.bf16 %v10436_v55, %v10435_v12  ;;  %vm8978_vm2 = vcmp.ne.s16.totalorder %v5880_v2, 0  ;;  %v1699_v12 = vpack.c.bf16 %v1668_v46, %v1667_v35  ;;  %v8982_v55 = vpack.c.bf16 %v1510_v57, %v1509_v41  ;;  %v1589_v35 = vld [vmem:[#allocation2 + $0x37] sm:$0xff]  ;;  %v1590_v46 = vld [vmem:[#allocation2 + $0x3f] sm:$0xff]  ;;  %v1513_v2 = vld [vmem:[#allocation2 + $0x49] sm:$0xff] }
 0x11c   : > { %6074 = vmatprep.mubr.msk.bf16.mxu1 %vm8812_vm8, %v8872_v18  ;;  %v10439_v27 = vsel %vm8978_vm2, 4294967295, %v10438_v27  ;;  %v1671_v41 = vld [vmem:[#allocation2 + $0x48] sm:$0xff] }
 0x11d   : > { %10437 = vst [vmem:[#allocation47_spill] sm:$0xff] %v8962_v36  ;;  %10440 = vst [vmem:[#allocation48_spill] sm:$0xff] %v10439_v27  ;;  %v1588_v36 = vld [vmem:[#allocation2 + $0x2f] sm:$0xff] }
 0x11f   : > { %6046 = vmatmul.mubr.msk.bf16.gmra.mrb[48].mxu0 %vm8812_vm8, %v8803_v49 }
 0x120   : > { %2674 = vmatprep.mubr.bf16.mxu0 %v8863_v15  ;;  %v10417_v15 = vmov 0 }
 0x121   : > { %v10418_v15 = vsel %vm8900_vm1, 4294967295, %v10417_v15 }
 0x122   : > { %10419 = vst [vmem:[#allocation40_spill] sm:$0xff] %v10418_v15 }
 0x123   : > { %6075 = vmatmul.mubr.msk.bf16.gmra.mrb[48].mxu1 %vm8874_vm3, %v8890_v23 }
 0x124   : > { %6076 = vmatprep.mubr.msk.bf16.mxu1 %vm8865_vm14, %v8898_v21 }
 0x127   : > { %6047 = vmatmul.mubr.msk.bf16.gmra.mrb[52].mxu0 %vm8865_vm14, %v8872_v18 }
 0x128   : > { %2682 = vmatprep.mubr.bf16.mxu0 %v8896_v58  ;;  %v1444_v58 = vld [vmem:[#allocation2 + $0x20] sm:$0xff] }
 0x12b   : > { %6077 = vmatmul.mubr.msk.bf16.gmra.mrb[52].mxu1 %vm8900_vm1, %v8926_v33 }
 0x12c   : > { %6078 = vmatprep.mubr.msk.bf16.mxu1 %vm8907_vm10, %v8938_v48 }
 0x12f   : > { %6048 = vmatmul.mubr.msk.bf16.gmra.mrb[56].mxu0 %vm8907_vm10, %v8898_v21  ;;  %v1443_v21 = vld [vmem:[#allocation2 + $0x18] sm:$0xff] }
 0x130   : > { %2690 = vmatprep.mubr.bf16.mxu0 %v8932_v13  ;;  %v1185_v13 = vld [vmem:[#allocation2 + $0xf9] sm:$0xff]  ;;  %v1475_v17 = vpack.c.bf16 %v1444_v58, %v1443_v21  ;;  %v1619_v58 = vpack.c.bf16 %v1588_v36, %v1587_v40  ;;  %v1672_v36 = vld [vmem:[#allocation2 + $0x50] sm:$0xff] }
 0x131   : > { %v8976_v25 = vpack.c.bf16 %v1186_v16, %v1185_v13  ;;  %v1670_v21 = vld [vmem:[#allocation2 + $0x40] sm:$0xff]  ;;  %v7430_v40 = vld [vmem:[#allocation7 + $0x220] sm:$0xff]   ;;  %v1701_v57 = vpack.c.bf16 %v1672_v36, %v1671_v41 }
 0x132   : > { %v1700_v13 = vpack.c.bf16 %v1670_v21, %v1669_v37  ;;  %v1516_v37 = vld [vmem:[#allocation2 + $0x61] sm:$0xff]  ;;  %v1673_v21 = vld [vmem:[#allocation2 + $0x58] sm:$0xff]  ;;  %v1517_v36 = vld [vmem:[#allocation2 + $0x69] sm:$0xff] }
 0x133   : > { %6079 = vmatmul.mubr.msk.bf16.gmra.mrb[56].mxu1 %vm8940_vm0, %v8954_v51  ;;  %v1594_v41 = vld [vmem:[#allocation2 + $0x5f] sm:$0xff] }
 0x134   : > { %6080 = vmatprep.mubr.msk.bf16.mxu1 %vm8934_vm11, %v8956_v30  ;;  %v1512_v30 = vld [vmem:[#allocation2 + $0x41] sm:$0xff] }
 0x135   : > { %v8991_v16 = vpack.c.bf16 %v1512_v30, %v1511_v1  ;;  %v1620_v1 = vpack.c.bf16 %v1590_v46, %v1589_v35 }
 0x137   : > { %6049 = vmatmul.mubr.msk.bf16.gmra.mrb[60].mxu0 %vm8934_vm11, %v8938_v48  ;;  %v7428_v48 = vld [vmem:[#allocation7 + $0x210] sm:$0xff]   ;;  %vm10447_vm11 = vnez %v10330_v54 }
 0x138   : > { %6082 = vmatprep.mubr.msk.bf16.mxu0 %vm8105_vm15, %v1539_v62  ;;  %v7427_v62 = vld [vmem:[#allocation7 + $0x208] sm:$0xff]  }
 0x13b   : > { %6081 = vmatmul.mubr.msk.bf16.gmra.mrb[60].mxu1 %vm8978_vm2, %v8976_v25 }
 0x13c   : > { %3053 = vmatprep.mubr.bf16.mxu1 %v1699_v12 }
 0x13f   : > { %2893 = vmatmul.mubr.bf16.vlgmr.msra.gmra.mrb[64].mxu0 %v1475_v17  ;;  %v7431_v17 = vld [vmem:[#allocation7 + $0x228] sm:$0xff]  }
 0x140   : > { %7171 = vmatpush3.bf16.msra.mxu0 %v8653_v59  ;;  %6083 = vmatprep.mubr.msk.bf16.mxu0 %vm8179_vm7, %v8982_v55  ;;  %v1514_v59 = vld [vmem:[#allocation2 + $0x51] sm:$0xff] }
 0x141   : > { %7172 = vmatprep.subr.bf16.mxu0 %v7427_v62  ;;  %v8998_v30 = vpack.c.bf16 %v1514_v59, %v1513_v2  ;;  %v7433_v2 = vld [vmem:[#allocation7 + $0x238] sm:$0xff]   ;;  %v1593_v59 = vld [vmem:[#allocation2 + $0x57] sm:$0xff] }
 0x143   : > { %6098 = vmatmul.mubr.msk.bf16.vlgmr.msra.gmra.mrb[64].mxu1 %vm8038_vm6, %v1619_v58  ;;  %vm10441_vm6 = vnez %v10298_v11  ;;  %v1674_v58 = vld [vmem:[#allocation2 + $0x60] sm:$0xff] }
 0x144   : > { %7173 = vmatpush3.bf16.msra.mxu0 %v7427_v62  ;;  %3061 = vmatprep.mubr.bf16.mxu1 %v1700_v13  ;;  %v1592_v62 = vld [vmem:[#allocation2 + $0x4f] sm:$0xff] }
 0x145   : > { %7174 = vmatprep.subr.bf16.mxu0 %v7428_v48 }
 0x147   : > { %2901 = vmatmul.mubr.bf16.gmra.mrb[68].mxu0 %v1699_v12  ;;  %v1591_v12 = vld [vmem:[#allocation2 + $0x47] sm:$0xff] }
 0x148   : > { %6084 = vmatprep.mubr.msk.bf16.mxu0 %vm8260_vm12, %v8991_v16  ;;  %7175 = vmatpush3.bf16.msra.mxu0 %v7428_v48  ;;  %v1515_v48 = vld [vmem:[#allocation2 + $0x59] sm:$0xff]  ;;  %v1621_v35 = vpack.c.bf16 %v1592_v62, %v1591_v12  ;;  %v1676_v12 = vld [vmem:[#allocation2 + $0x70] sm:$0xff]  ;;  %vm10446_vm12 = vnez %v10302_v22 }
 0x149   : > { %7176 = vmatprep.subr.bf16.mxu0 %v7429_v10  ;;  %v9005_v46 = vpack.c.bf16 %v1516_v37, %v1515_v48  ;;  %v1595_v48 = vld [vmem:[#allocation2 + $0x67] sm:$0xff]  ;;  %v1596_v37 = vld [vmem:[#allocation2 + $0x6f] sm:$0xff] }
 0x14b   : > { %6099 = vmatmul.mubr.msk.bf16.gmra.mrb[68].mxu1 %vm8096_vm13, %v1620_v1  ;;  %vm10442_vm13 = vnez %v10284_v4  ;;  %v1675_v1 = vld [vmem:[#allocation2 + $0x68] sm:$0xff] }
 0x14c   : > { %7177 = vmatpush3.bf16.msra.mxu0 %v7429_v10  ;;  %3069 = vmatprep.mubr.bf16.mxu1 %v1701_v57  ;;  %v7432_v10 = vld [vmem:[#allocation7 + $0x230] sm:$0xff]  }
 0x14d   : > { %7178 = vmatprep.subr.bf16.mxu0 %v7430_v40 }
 0x14f   : > { %2909 = vmatmul.mubr.bf16.gmra.mrb[72].mxu0 %v1700_v13  ;;  %v1702_v13 = vpack.c.bf16 %v1674_v58, %v1673_v21  ;;  %v1677_v21 = vld [vmem:[#allocation2 + $0x78] sm:$0xff]  ;;  %v1678_v58 = vld [vmem:[#allocation2 + $0x80] sm:$0xff] }
 0x150   : > { %6085 = vmatprep.mubr.msk.bf16.mxu0 %vm10441_vm6, %v8998_v30  ;;  %7179 = vmatpush3.bf16.msra.mxu0 %v7430_v40  ;;  %vm10443_vm6 = vnez %v10306_v6  ;;  %v1518_v40 = vld [vmem:[#allocation2 + $0x71] sm:$0xff] }
 0x151   : > { %7180 = vmatprep.subr.bf16.mxu0 %v7431_v17  ;;  %v9012_v62 = vpack.c.bf16 %v1518_v40, %v1517_v36 }
 0x153   : > { %6100 = vmatmul.mubr.msk.bf16.gmra.mrb[72].mxu1 %vm10442_vm13, %v1621_v35  ;;  %vm10444_vm13 = vnez %v10292_v45  ;;  %v1704_v35 = vpack.c.bf16 %v1678_v58, %v1677_v21 }
 0x154   : > { %7181 = vmatpush3.bf16.msra.mxu0 %v7431_v17  ;;  %3077 = vmatprep.mubr.bf16.mxu1 %v1702_v13  ;;  %v1622_v17 = vpack.c.bf16 %v1594_v41, %v1593_v59  ;;  %v1679_v59 = vld [vmem:[#allocation2 + $0x88] sm:$0xff]  ;;  %v1680_v41 = vld [vmem:[#allocation2 + $0x90] sm:$0xff] }
 0x155   : > { %7182 = vmatprep.subr.bf16.mxu0 %v7432_v10  ;;  %v1705_v40 = vpack.c.bf16 %v1680_v41, %v1679_v59 }
 0x157   : > { %2917 = vmatmul.mubr.bf16.gmra.mrb[76].mxu0 %v1701_v57  ;;  %v1703_v57 = vpack.c.bf16 %v1676_v12, %v1675_v1  ;;  %v1599_v1 = vld [vmem:[#allocation2 + $0x87] sm:$0xff]  ;;  %v1600_v12 = vld [vmem:[#allocation2 + $0x8f] sm:$0xff] }
 0x158   : > { %6086 = vmatprep.mubr.msk.bf16.mxu0 %vm10443_vm6, %v9005_v46  ;;  %7183 = vmatpush3.bf16.msra.mxu0 %v7432_v10  ;;  %vm10445_vm6 = vnez %v10324_v0  ;;  %v1623_v10 = vpack.c.bf16 %v1596_v37, %v1595_v48 }
 0x159   : > { %7184 = vmatprep.subr.bf16.mxu0 %v7433_v2 }
 0x15b   : > { %6101 = vmatmul.mubr.msk.bf16.gmra.mrb[76].mxu1 %vm10444_vm13, %v1622_v17  ;;  %vm10448_vm13 = vnez %v10313_v19  ;;  %v1625_v17 = vpack.c.bf16 %v1600_v12, %v1599_v1  ;;  %v10460_v1 = vld [vmem:[#allocation38_spill] sm:$0xff] }
 0x15c   : > { %7185 = vmatpush3.bf16.msra.mxu0 %v7433_v2  ;;  %3085 = vmatprep.mubr.bf16.mxu1 %v1703_v57  ;;  %v1598_v2 = vld [vmem:[#allocation2 + $0x7f] sm:$0xff] }
 0x15f   : > { %2925 = vmatmul.mubr.bf16.gmra.mrb[80].mxu0 %v1702_v13  ;;  %v1597_v13 = vld [vmem:[#allocation2 + $0x77] sm:$0xff] }
 0x160   : > { %6087 = vmatprep.mubr.msk.bf16.mxu0 %vm10445_vm6, %v9012_v62  ;;  %v1624_v36 = vpack.c.bf16 %v1598_v2, %v1597_v13  ;;  %vm10449_vm6 = vnez %v10345_v56 }
 0x163   : > { %6102 = vmatmul.mubr.msk.bf16.gmra.mrb[80].mxu1 %vm10446_vm12, %v1623_v10  ;;  %vm10450_vm12 = vnez %v10321_v44 }
 0x164   : > { %3093 = vmatprep.mubr.bf16.mxu1 %v1704_v35 }
 0x167   : > { %2933 = vmatmul.mubr.bf16.gmra.mrb[84].mxu0 %v1703_v57  ;;  %v1460_v57 = vld [vmem:[#allocation2 + $0xa0] sm:$0xff] }
 0x168   : > { %6088 = vmatprep.mubr.msk.bf16.mxu0 %vm10447_vm11, %v8565_v31  ;;  %vm10451_vm11 = vnez %v10357_v20  ;;  %v1459_v31 = vld [vmem:[#allocation2 + $0x98] sm:$0xff] }
 0x169   : > { %v1483_v48 = vpack.c.bf16 %v1460_v57, %v1459_v31 }
 0x16b   : > { %6103 = vmatmul.mubr.msk.bf16.gmra.mrb[84].mxu1 %vm10448_vm13, %v1624_v36  ;;  %vm10452_vm13 = vnez %v10333_v9 }
 0x16c   : > { %3101 = vmatprep.mubr.bf16.mxu1 %v1705_v40 }
 0x16f   : > { %2941 = vmatmul.mubr.bf16.gmra.mrb[88].mxu0 %v1704_v35 }
 0x170   : > { %6089 = vmatprep.mubr.msk.bf16.mxu0 %vm10449_vm6, %v8639_v39  ;;  %vm10453_vm6 = vnez %v10370_v52 }
 0x173   : > { %6104 = vmatmul.mubr.msk.bf16.gmra.mrb[88].mxu1 %vm10450_vm12, %v1625_v17  ;;  %vm10454_vm12 = vnez %v10341_v34  ;;  %v7441_v34 = vld [vmem:[#allocation10 + $0x18] sm:$0xff]  }
 0x174   : > { %3109 = vmatprep.mubr.bf16.mxu1 %v8575_v60 }
 0x177   : > { %2949 = vmatmul.mubr.bf16.gmra.mrb[92].mxu0 %v1705_v40 }
 0x178   : > { %6090 = vmatprep.mubr.msk.bf16.mxu0 %vm10451_vm11, %v8706_v5 }
 0x17b   : > { %6105 = vmatmul.mubr.msk.bf16.gmra.mrb[92].mxu1 %vm10452_vm13, %v8593_v43  ;;  %vm10455_vm13 = vnez %v10351_v14 }
 0x17c   : > { %3117 = vmatprep.mubr.bf16.mxu1 %v8645_v53 }
 0x17f   : > { %2957 = vmatmul.mubr.bf16.gmra.mrb[96].mxu0 %v1483_v48 }
 0x180   : > { %6091 = vmatprep.mubr.msk.bf16.mxu0 %vm10453_vm6, %v8787_v28  ;;  %v9062_v28 = vld [vmem:[#allocation9] ss:$0 sm:$0xff] }
 0x183   : > { %6106 = vmatmul.mubr.msk.bf16.gmra.mrb[96].mxu1 %vm10454_vm12, %v8659_v47 }
 0x184   : > { %3125 = vmatprep.mubr.bf16.mxu1 %v8712_v3 }
 0x187   : > { %2965 = vmatmul.mubr.bf16.gmra.mrb[100].mxu0 %v8645_v53 }
 0x188   : > { %6092 = vmatprep.mubr.msk.bf16.mxu0 %vm8799_vm4, %v8857_v42 }
 0x18b   : > { %6107 = vmatmul.mubr.msk.bf16.gmra.mrb[100].mxu1 %vm10455_vm13, %v8727_v29  ;;  %v10458_v29 = vld [vmem:[#allocation35_spill] sm:$0xff]  ;;  %vm10477_vm13 = vnez %v10345_v56 }
 0x18c   : > { %3133 = vmatprep.mubr.bf16.mxu1 %v8793_v24 }
 0x18f   : > { %2973 = vmatmul.mubr.bf16.gmra.mrb[104].mxu0 %v8712_v3  ;;  %v10456_v3 = vld [vmem:[#allocation29_spill] sm:$0xff] }
 0x190   : > { %6093 = vmatprep.mubr.msk.bf16.mxu0 %vm8805_vm5, %v8890_v23  ;;  %vm10457_vm12 = vnez %v10456_v3 }
 0x192   : > { %v6242_v39 = vpop.f32.mrb[0].mxu0 }
 0x193   : > { %v6243_v60 = vpop.f32.mrb[1].mxu0  ;;  %6108 = vmatmul.mubr.msk.bf16.gmra.mrb[104].mxu1 %vm10457_vm12, %v8803_v49  ;;  %vm10476_vm12 = vnez %v10330_v54 }
 0x194   : > { %v6244_v43 = vadd.f32 %v6243_v60, %v6242_v39  ;;  %v6245_v53 = vpop.f32.mrb[2].mxu0  ;;  %3141 = vmatprep.mubr.bf16.mxu1 %v10458_v29  ;;  %v6354_v37 = vpop.f32.mrb[0].mxu1 }
 0x195   : > { %v6246_v47 = vpop.f32.mrb[3].mxu0  ;;  %v6355_v58 = vpop.f32.mrb[1].mxu1 }
 0x196   : > { %v6247_v5 = vadd.f32 %v6246_v47, %v6245_v53  ;;  %v2573_v23 = vadd.f32 %v6244_v43, %v9062_v28  ;;  %v6356_v13 = vadd.f32 %v6355_v58, %v6354_v37  ;;  %v6357_v49 = vpop.f32.mrb[2].mxu1  ;;  %v10461_v58 = vld [vmem:[#allocation39_spill] sm:$0xff] }
 0x197   : > { %2981 = vmatmul.mubr.bf16.gmra.mrb[108].mxu0 %v8793_v24  ;;  %v6358_v59 = vpop.f32.mrb[3].mxu1 }
 0x198   : > { %6094 = vmatprep.mubr.msk.bf16.mxu0 %vm8874_vm3, %v8926_v33  ;;  %v2576_v35 = vadd.f32 %v6247_v5, %v9062_v28  ;;  %v6359_v36 = vadd.f32 %v6358_v59, %v6357_v49  ;;  %v9071_v33 = vadd.f32 %v6356_v13, %v2573_v23  ;;  %v1538_v13 = vld [vmem:[#allocation2 + $0x111] sm:$0xff] }
 0x19a   : > { %v6248_v42 = vpop.f32.mrb[4].mxu0  ;;  %v9080_v12 = vadd.f32 %v6359_v36, %v2576_v35  ;;  %v1537_v35 = vld [vmem:[#allocation2 + $0x109] sm:$0xff] }
 0x19b   : > { %v6249_v21 = vpop.f32.mrb[5].mxu0  ;;  %6109 = vmatmul.mubr.msk.bf16.gmra.mrb[108].mxu1 %vm8780_vm9, %v8872_v18  ;;  %vm10475_vm9 = vnez %v10324_v0 }
 0x19c   : > { %v6250_v10 = vadd.f32 %v6249_v21, %v6248_v42  ;;  %v6251_v24 = vpop.f32.mrb[6].mxu0  ;;  %3149 = vmatprep.mubr.bf16.mxu1 %v10460_v1  ;;  %v6360_v57 = vpop.f32.mrb[4].mxu1  ;;  %v7435_v42 = vld [vmem:[#allocation10] sm:$0xff]  }
 0x19d   : > { %v6252_v2 = vpop.f32.mrb[7].mxu0  ;;  %v6361_v39 = vpop.f32.mrb[5].mxu1 }
 0x19e   : > { %v6253_v41 = vadd.f32 %v6252_v2, %v6251_v24  ;;  %v2581_v31 = vadd.f32 %v6250_v10, %v9062_v28  ;;  %v6362_v47 = vadd.f32 %v6361_v39, %v6360_v57  ;;  %v6363_v18 = vpop.f32.mrb[6].mxu1  ;;  %v10463_v24 = vld [vmem:[#allocation42_spill] sm:$0xff]  ;;  %v9097_v57 = vpack.c.bf16 %v1538_v13, %v1537_v35 }
 0x19f   : > { %2989 = vmatmul.mubr.bf16.gmra.mrb[112].mxu0 %v10458_v29  ;;  %v7434_v29 = vld [vmem:[#allocation10 + $0x40] sm:$0xff]  }
 0x1a0   : > { %6095 = vmatprep.mubr.msk.bf16.mxu0 %vm8900_vm1, %v8954_v51  ;;  %v2584_v53 = vadd.f32 %v6253_v41, %v9062_v28  ;;  %v6364_v51 = vpop.f32.mrb[7].mxu1  ;;  %v9085_v21 = vadd.f32 %v6362_v47, %v2581_v31  ;;  %6698 = vmatprep.subr.bf16.mxu1 %v7434_v29 }
 0x1a1   : > { %v6365_v37 = vadd.f32 %v6364_v51, %v6363_v18  ;;  %6699 = vmatpush3.bf16.msra.mxu1 %v7435_v42  ;;  %v10466_v42 = vld [vmem:[#allocation47_spill] sm:$0xff] }
 0x1a2   : > { %v6254_v17 = vpop.f32.mrb[8].mxu0 }
 0x1a3   : > { %v6255_v48 = vpop.f32.mrb[9].mxu0  ;;  %6110 = vmatmul.mubr.msk.bf16.gmra.mrb[112].mxu1 %vm8812_vm8, %v10461_v58  ;;  %v9094_v49 = vadd.f32 %v6365_v37, %v2584_v53  ;;  %vm10474_vm8 = vnez %v10306_v6 }
 0x1a4   : > { %v6256_v60 = vadd.f32 %v6255_v48, %v6254_v17  ;;  %v6257_v43 = vpop.f32.mrb[10].mxu0  ;;  %3157 = vmatprep.mubr.bf16.mxu1 %v10463_v24  ;;  %v6366_v41 = vpop.f32.mrb[8].mxu1 }
 0x1a5   : > { %v6258_v5 = vpop.f32.mrb[11].mxu0 }
 0x1a6   : > { %v6259_v23 = vadd.f32 %v6258_v5, %v6257_v43  ;;  %v2589_v59 = vadd.f32 %v6256_v60, %v9062_v28  ;;  %v10464_v60 = vld [vmem:[#allocation44_spill] sm:$0xff] }
 0x1a7   : > { %2997 = vmatmul.mubr.bf16.gmra.mrb[116].mxu0 %v10460_v1  ;;  %v6367_v1 = vpop.f32.mrb[9].mxu1 }
 0x1a8   : > { %6096 = vmatprep.mubr.msk.bf16.mxu0 %vm8940_vm0, %v8976_v25  ;;  %v2592_v48 = vadd.f32 %v6259_v23, %v9062_v28  ;;  %v6368_v25 = vadd.f32 %v6367_v1, %v6366_v41  ;;  %v6369_v39 = vpop.f32.mrb[10].mxu1 }
 0x1a9   : > { %v6370_v47 = vpop.f32.mrb[11].mxu1 }
 0x1aa   : > { %v6260_v2 = vpop.f32.mrb[12].mxu0  ;;  %v6371_v53 = vadd.f32 %v6370_v47, %v6369_v39  ;;  %v9101_v5 = vadd.f32 %v6368_v25, %v2589_v59  ;;  %v7436_v39 = vld [vmem:[#allocation10 + $0x48] sm:$0xff]  }
 0x1ab   : > { %v6261_v36 = vpop.f32.mrb[13].mxu0  ;;  %6111 = vmatmul.mubr.msk.bf16.gmra.mrb[116].mxu1 %vm8865_vm14, %v10464_v60  ;;  %6700 = vmatprep.subr.bf16.mxu1 %v7436_v39  ;;  %v10467_v60 = vld [vmem:[#allocation46_spill] sm:$0xff]  ;;  %vm10472_vm14 = vnez %v10294_v50 }
 0x1ac   : > { %v6262_v17 = vadd.f32 %v6261_v36, %v6260_v2  ;;  %v6263_v31 = vpop.f32.mrb[14].mxu0  ;;  %3165 = vmatprep.mubr.bf16.mxu1 %v10466_v42  ;;  %v9110_v51 = vadd.f32 %v6371_v53, %v2592_v48  ;;  %v6372_v58 = vpop.f32.mrb[12].mxu1 }
 0x1ad   : > { %v6264_v43 = vpop.f32.mrb[15].mxu0 }
 0x1ae   : > { %v6265_v18 = vadd.f32 %v6264_v43, %v6263_v31  ;;  %v2597_v37 = vadd.f32 %v6262_v17, %v9062_v28  ;;  %v7506_v31 = vld [vmem:[#allocation2 + $0x8] sm:$0xff]  ;;  %v7437_v43 = vld [vmem:[#allocation10 + $0x8] sm:$0xff]  }
 0x1af   : > { %3005 = vmatmul.mubr.bf16.gmra.mrb[120].mxu0 %v10463_v24  ;;  %v6373_v24 = vpop.f32.mrb[13].mxu1  ;;  %v9114_v25 = vpack.c.bf16 %v7506_v31, %v7506_v31  ;;  %6701 = vmatpush3.bf16.msra.mxu1 %v7437_v43 }
 0x1b0   : > { %6097 = vmatprep.mubr.msk.bf16.mxu0 %vm8978_vm2, %v9097_v57  ;;  %v2600_v59 = vadd.f32 %v6265_v18, %v9062_v28  ;;  %v6374_v41 = vadd.f32 %v6373_v24, %v6372_v58  ;;  %v6375_v36 = vpop.f32.mrb[14].mxu1  ;;  %v1617_v58 = vld [vmem:[#allocation2 + $0x117] sm:$0xff] }
 0x1b1   : > { %v6376_v48 = vpop.f32.mrb[15].mxu1 }
 0x1b2   : > { %v6266_v23 = vpop.f32.mrb[16].mxu0  ;;  %v6377_v53 = vadd.f32 %v6376_v48, %v6375_v36  ;;  %v9117_v17 = vadd.f32 %v6374_v41, %v2597_v37 }
 0x1b3   : > { %v6267_v35 = vpop.f32.mrb[17].mxu0  ;;  %6112 = vmatmul.mubr.msk.bf16.gmra.mrb[120].mxu1 %vm8907_vm10, %v10467_v60 }
 0x1b4   : > { %v6268_v13 = vadd.f32 %v6267_v35, %v6266_v23  ;;  %v6269_v2 = vpop.f32.mrb[18].mxu0  ;;  %3173 = vmatprep.mubr.bf16.mxu1 %v9114_v25  ;;  %v1618_v35 = vld [vmem:[#allocation2 + $0x11f] sm:$0xff]  ;;  %v9126_v24 = vadd.f32 %v6377_v53, %v2600_v59  ;;  %v6378_v37 = vpop.f32.mrb[16].mxu1 }
 0x1b5   : > { %v6270_v1 = vpop.f32.mrb[19].mxu0  ;;  %v6379_v36 = vpop.f32.mrb[17].mxu1 }
 0x1b6   : > { %v6271_v47 = vadd.f32 %v6270_v1, %v6269_v2  ;;  %v1634_v1 = vpack.c.bf16 %v1618_v35, %v1617_v58  ;;  %v6380_v60 = vadd.f32 %v6379_v36, %v6378_v37  ;;  %v7438_v36 = vld [vmem:[#allocation10 + $0x50] sm:$0xff]  }
 0x1b7   : > { %3013 = vmatmul.mubr.bf16.gmra.mrb[124].mxu0 %v10466_v42  ;;  %v2605_v42 = vadd.f32 %v6268_v13, %v9062_v28  ;;  %v10470_v13 = vld [vmem:[#allocation43_spill] sm:$0xff]  ;;  %6702 = vmatprep.subr.bf16.mxu1 %v7438_v36 }
 0x1b8   : > { %7186 = vmatprep.mubr.msk.bf16.mxu0 %vm8105_vm15, %v8982_v55  ;;  %v2608_v48 = vadd.f32 %v6271_v47, %v9062_v28  ;;  %v6381_v55 = vpop.f32.mrb[18].mxu1  ;;  %vm10471_vm10 = vnez %v10470_v13 }
 0x1b9   : > { %v6382_v29 = vpop.f32.mrb[19].mxu1  ;;  %v9133_v59 = vadd.f32 %v6380_v60, %v2605_v42 }
 0x1ba   : > { %v6272_v2 = vpop.f32.mrb[20].mxu0  ;;  %v6383_v40 = vadd.f32 %v6382_v29, %v6381_v55  ;;  %v1744_v55 = vld [vmem:[#allocation2 + $0x91] sm:$0xff] }
 0x1bb   : > { %v6273_v41 = vpop.f32.mrb[21].mxu0  ;;  %6113 = vmatmul.mubr.msk.bf16.gmra.mrb[124].mxu1 %vm10471_vm10, %v1634_v1  ;;  %v7439_v1 = vld [vmem:[#allocation10 + $0x10] sm:$0xff]   ;;  %vm10473_vm10 = vnez %v10298_v11 }
 0x1bc   : > { %v6274_v31 = vadd.f32 %v6273_v41, %v6272_v2  ;;  %v6275_v39 = vpop.f32.mrb[22].mxu0  ;;  %v9140_v43 = vadd.f32 %v6383_v40, %v2608_v48  ;;  %6703 = vmatpush3.bf16.msra.mxu1 %v7439_v1  ;;  %v1743_v48 = vld [vmem:[#allocation2 + $0x89] sm:$0xff]  ;;  %4838 = vmatprep.mubr.bf16.mxu1 %v9114_v25 }
 0x1bd   : > { %v6276_v23 = vpop.f32.mrb[23].mxu0 }
 0x1be   : > { %v6277_v10 = vadd.f32 %v6276_v23, %v6275_v39  ;;  %v2613_v53 = vadd.f32 %v6274_v31, %v9062_v28  ;;  %v6384_v23 = vpop.f32.mrb[20].mxu1  ;;  %v1742_v31 = vld [vmem:[#allocation2 + $0x81] sm:$0xff] }
 0x1bf   : > { %7187 = vmatmul.mubr.msk.bf16.vlgmr.msra.gmra.mrb[128].mxu0 %vm8179_vm7, %v8991_v16  ;;  %v6385_v58 = vpop.f32.mrb[21].mxu1 }
 0x1c0   : > { %7190 = vmatprep.mubr.msk.bf16.mxu0 %vm10472_vm14, %v8998_v30  ;;  %v2616_v16 = vadd.f32 %v6277_v10, %v9062_v28  ;;  %v6386_v42 = vadd.f32 %v6385_v58, %v6384_v23  ;;  %v6387_v37 = vpop.f32.mrb[22].mxu1  ;;  %v1741_v10 = vld [vmem:[#allocation2 + $0x79] sm:$0xff] }
 0x1c1   : > { %v6388_v39 = vpop.f32.mrb[23].mxu1 }
 0x1c2   : > { %v6278_v47 = vpop.f32.mrb[24].mxu0  ;;  %v6389_v30 = vadd.f32 %v6388_v39, %v6387_v37  ;;  %v9147_v40 = vadd.f32 %v6386_v42, %v2613_v53 }
 0x1c3   : > { %v6279_v29 = vpop.f32.mrb[25].mxu0 }
 0x1c4   : > { %v6280_v35 = vadd.f32 %v6279_v29, %v6278_v47  ;;  %v6281_v2 = vpop.f32.mrb[26].mxu0  ;;  %v9152_v47 = vadd.f32 %v6389_v30, %v2616_v16  ;;  %v1746_v30 = vld [vmem:[#allocation2 + $0xa1] sm:$0xff] }
 0x1c5   : > { %v6282_v41 = vpop.f32.mrb[27].mxu0 }
 0x1c6   : > { %v6283_v60 = vadd.f32 %v6282_v41, %v6281_v2  ;;  %v2621_v29 = vadd.f32 %v6280_v35, %v9062_v28  ;;  %v6390_v58 = vpop.f32.mrb[24].mxu1  ;;  %v1769_v41 = vpack.c.bf16 %v1744_v55, %v1743_v48  ;;  %v1745_v35 = vld [vmem:[#allocation2 + $0x99] sm:$0xff] }
 0x1c7   : > { %7191 = vmatmul.mubr.msk.bf16.gmra.mrb[132].mxu0 %vm10473_vm10, %v9005_v46  ;;  %v1768_v46 = vpack.c.bf16 %v1742_v31, %v1741_v10  ;;  %v6391_v53 = vpop.f32.mrb[25].mxu1  ;;  %v1747_v10 = vld [vmem:[#allocation2 + $0xa9] sm:$0xff]  ;;  %v1748_v31 = vld [vmem:[#allocation2 + $0xb1] sm:$0xff] }
 0x1c8   : > { %7194 = vmatprep.mubr.msk.bf16.mxu0 %vm10474_vm8, %v9012_v62  ;;  %v2624_v36 = vadd.f32 %v6283_v60, %v9062_v28  ;;  %v6392_v62 = vadd.f32 %v6391_v53, %v6390_v58  ;;  %v6393_v39 = vpop.f32.mrb[26].mxu1  ;;  %v1770_v58 = vpack.c.bf16 %v1746_v30, %v1745_v35  ;;  %v1749_v35 = vld [vmem:[#allocation2 + $0xb9] sm:$0xff]  ;;  %v1750_v30 = vld [vmem:[#allocation2 + $0xc1] sm:$0xff] }
 0x1c9   : > { %v6394_v1 = vpop.f32.mrb[27].mxu1 }
 0x1ca   : > { %v6284_v23 = vpop.f32.mrb[28].mxu0  ;;  %v6395_v14 = vadd.f32 %v6394_v1, %v6393_v39  ;;  %v9158_v16 = vadd.f32 %v6392_v62, %v2621_v29  ;;  %v1771_v29 = vpack.c.bf16 %v1748_v31, %v1747_v10  ;;  %v7440_v1 = vld [vmem:[#allocation10 + $0x58] sm:$0xff]  }
 0x1cb   : > { %v6285_v2 = vpop.f32.mrb[29].mxu0  ;;  %6704 = vmatprep.subr.bf16.mxu1 %v7440_v1  ;;  %v1752_v10 = vld [vmem:[#allocation2 + $0xd1] sm:$0xff] }
 0x1cc   : > { %v6286_v42 = vadd.f32 %v6285_v2, %v6284_v23  ;;  %v6287_v37 = vpop.f32.mrb[30].mxu0  ;;  %v9162_v48 = vadd.f32 %v6395_v14, %v2624_v36  ;;  %6705 = vmatpush3.bf16.msra.mxu1 %v7441_v34 }
 0x1cd   : > { %v6288_v13 = vpop.f32.mrb[31].mxu0 }
 0x1ce   : > { %v6289_v3 = vadd.f32 %v6288_v13, %v6287_v37  ;;  %v2629_v55 = vadd.f32 %v6286_v42, %v9062_v28  ;;  %v6396_v23 = vpop.f32.mrb[28].mxu1 }
 0x1cf   : > { %7195 = vmatmul.mubr.msk.bf16.gmra.mrb[136].mxu0 %vm10475_vm9, %v1768_v46  ;;  %v6397_v2 = vpop.f32.mrb[29].mxu1 }
 0x1d0   : > { %7198 = vmatprep.mubr.msk.bf16.mxu0 %vm10476_vm12, %v1769_v41  ;;  %v2632_v37 = vadd.f32 %v6289_v3, %v9062_v28  ;;  %v6398_v62 = vadd.f32 %v6397_v2, %v6396_v23  ;;  %v6399_v41 = vpop.f32.mrb[30].mxu1  ;;  %v1751_v3 = vld [vmem:[#allocation2 + $0xc9] sm:$0xff]  ;;  %v1772_v2 = vpack.c.bf16 %v1750_v30, %v1749_v35 }
 0x1d1   : > { %v6400_v54 = vpop.f32.mrb[31].mxu1  ;;  %v1755_v30 = vld [vmem:[#allocation2 + $0xe9] sm:$0xff] }
 0x1d2   : > { %v6290_v60 = vpop.f32.mrb[32].mxu0  ;;  %v6401_v36 = vadd.f32 %v6400_v54, %v6399_v41  ;;  %v9168_v42 = vadd.f32 %v6398_v62, %v2629_v55  ;;  %v1773_v62 = vpack.c.bf16 %v1752_v10, %v1751_v3 }
 0x1d3   : > { %v6291_v13 = vpop.f32.mrb[33].mxu0 }
 0x1d4   : > { %v6292_v53 = vadd.f32 %v6291_v13, %v6290_v60  ;;  %v6293_v46 = vpop.f32.mrb[34].mxu0  ;;  %v9172_v31 = vadd.f32 %v6401_v36, %v2632_v37  ;;  %v1754_v36 = vld [vmem:[#allocation2 + $0xe1] sm:$0xff] }
 0x1d5   : > { %v6294_v39 = vpop.f32.mrb[35].mxu0 }
 0x1d6   : > { %v6295_v14 = vadd.f32 %v6294_v39, %v6293_v46  ;;  %v2637_v23 = vadd.f32 %v6292_v53, %v9062_v28  ;;  %v6402_v54 = vpop.f32.mrb[32].mxu1  ;;  %v1753_v53 = vld [vmem:[#allocation2 + $0xd9] sm:$0xff] }
 0x1d7   : > { %7199 = vmatmul.mubr.msk.bf16.gmra.mrb[140].mxu0 %vm10477_vm13, %v1770_v58  ;;  %v6403_v58 = vpop.f32.mrb[33].mxu1 }
 0x1d8   : > { %7202 = vmatprep.mubr.msk.bf16.mxu0 %vm10451_vm11, %v1771_v29  ;;  %v2640_v41 = vadd.f32 %v6295_v14, %v9062_v28  ;;  %v6404_v29 = vadd.f32 %v6403_v58, %v6402_v54  ;;  %v6405_v39 = vpop.f32.mrb[34].mxu1  ;;  %v1756_v14 = vld [vmem:[#allocation2 + $0xf1] sm:$0xff] }
 0x1d9   : > { %v6406_v34 = vpop.f32.mrb[35].mxu1 }
 0x1da   : > { %v6296_v60 = vpop.f32.mrb[36].mxu0  ;;  %v9176_v56 = vadd.f32 %v6404_v29, %v2637_v23  ;;  %v6407_v37 = vadd.f32 %v6406_v34, %v6405_v39  ;;  %v1774_v23 = vpack.c.bf16 %v1754_v36, %v1753_v53  ;;  %v1775_v29 = vpack.c.bf16 %v1756_v14, %v1755_v30  ;;  %v7442_v34 = vld [vmem:[#allocation10 + $0x60] sm:$0xff]   ;;  %v1758_v53 = vld [vmem:[#allocation2 + $0x101] sm:$0xff] }
 0x1db   : > { %v6297_v13 = vpop.f32.mrb[37].mxu0  ;;  %6706 = vmatprep.subr.bf16.mxu1 %v7442_v34 }
 0x1dc   : > { %v6298_v55 = vadd.f32 %v6297_v13, %v6296_v60  ;;  %v6299_v46 = vpop.f32.mrb[38].mxu0  ;;  %v9182_v35 = vadd.f32 %v6407_v37, %v2640_v41  ;;  %v7443_v41 = vld [vmem:[#allocation10 + $0x20] sm:$0xff]  }
 0x1dd   : > { %v6300_v1 = vpop.f32.mrb[39].mxu0  ;;  %6707 = vmatpush3.bf16.msra.mxu1 %v7443_v41 }
 0x1de   : > { %v6301_v20 = vadd.f32 %v6300_v1, %v6299_v46  ;;  %v2645_v10 = vadd.f32 %v6298_v55, %v9062_v28  ;;  %v6408_v60 = vpop.f32.mrb[36].mxu1  ;;  %v1757_v55 = vld [vmem:[#allocation2 + $0xf9] sm:$0xff] }
 0x1df   : > { %7203 = vmatmul.mubr.msk.bf16.gmra.mrb[144].mxu0 %vm10453_vm6, %v1772_v2  ;;  %v6409_v13 = vpop.f32.mrb[37].mxu1 }
 0x1e0   : > { %7206 = vmatprep.mubr.msk.bf16.mxu0 %vm8799_vm4, %v1773_v62  ;;  %v2648_v2 = vadd.f32 %v6301_v20, %v9062_v28  ;;  %v6410_v39 = vadd.f32 %v6409_v13, %v6408_v60  ;;  %v6411_v62 = vpop.f32.mrb[38].mxu1 }
 0x1e1   : > { %v6412_v37 = vpop.f32.mrb[39].mxu1 }
 0x1e2   : > { %v6302_v3 = vpop.f32.mrb[40].mxu0  ;;  %v9186_v52 = vadd.f32 %v6410_v39, %v2645_v10  ;;  %v6413_v9 = vadd.f32 %v6412_v37, %v6411_v62  ;;  %v1776_v10 = vpack.c.bf16 %v1758_v53, %v1757_v55 }
 0x1e3   : > { %v6303_v54 = vpop.f32.mrb[41].mxu0 }
 0x1e4   : > { %v6304_v58 = vadd.f32 %v6303_v54, %v6302_v3  ;;  %v6305_v46 = vpop.f32.mrb[42].mxu0  ;;  %v9192_v20 = vadd.f32 %v6413_v9, %v2648_v2  ;;  %v1762_v2 = vld [vmem:[#allocation2 + $0x121] sm:$0xff] }
 0x1e5   : > { %v6306_v1 = vpop.f32.mrb[43].mxu0 }
 0x1e6   : > { %v6307_v8 = vadd.f32 %v6306_v1, %v6305_v46  ;;  %v2653_v30 = vadd.f32 %v6304_v58, %v9062_v28  ;;  %v6414_v14 = vpop.f32.mrb[40].mxu1  ;;  %v1761_v58 = vld [vmem:[#allocation2 + $0x119] sm:$0xff] }
 0x1e7   : > { %7207 = vmatmul.mubr.msk.bf16.gmra.mrb[148].mxu0 %vm8805_vm5, %v1774_v23  ;;  %v6415_v60 = vpop.f32.mrb[41].mxu1 }
 0x1e8   : > { %7210 = vmatprep.mubr.msk.bf16.mxu0 %vm8874_vm3, %v1775_v29  ;;  %v2656_v23 = vadd.f32 %v6307_v8, %v9062_v28  ;;  %v6416_v46 = vadd.f32 %v6415_v60, %v6414_v14  ;;  %v6417_v39 = vpop.f32.mrb[42].mxu1 }
 0x1e9   : > { %v6418_v29 = vpop.f32.mrb[43].mxu1 }
 0x1ea   : > { %v6308_v36 = vpop.f32.mrb[44].mxu0  ;;  %v9196_v34 = vadd.f32 %v6416_v46, %v2653_v30  ;;  %v6419_v9 = vadd.f32 %v6418_v29, %v6417_v39  ;;  %v7444_v39 = vld [vmem:[#allocation10 + $0x68] sm:$0xff]  }
 0x1eb   : > { %v6309_v3 = vpop.f32.mrb[45].mxu0  ;;  %6708 = vmatprep.subr.bf16.mxu1 %v7444_v39 }
 0x1ec   : > { %v6310_v54 = vadd.f32 %v6309_v3, %v6308_v36  ;;  %v6311_v13 = vpop.f32.mrb[46].mxu0  ;;  %v9203_v41 = vadd.f32 %v6419_v9, %v2656_v23  ;;  %v1778_v36 = vpack.c.bf16 %v1762_v2, %v1761_v58 }
 0x1ed   : > { %v6312_v62 = vpop.f32.mrb[47].mxu0 }
 0x1ee   : > { %v6313_v1 = vadd.f32 %v6312_v62, %v6311_v13  ;;  %v2661_v37 = vadd.f32 %v6310_v54, %v9062_v28  ;;  %v6420_v55 = vpop.f32.mrb[44].mxu1 }
 0x1ef   : > { %7211 = vmatmul.mubr.msk.bf16.gmra.mrb[152].mxu0 %vm8900_vm1, %v1776_v10  ;;  %v6421_v30 = vpop.f32.mrb[45].mxu1 }
 0x1f0   : > { %7214 = vmatprep.mubr.msk.bf16.mxu0 %vm8940_vm0, %v9097_v57  ;;  %v2664_v60 = vadd.f32 %v6313_v1, %v9062_v28  ;;  %v6422_v10 = vadd.f32 %v6421_v30, %v6420_v55  ;;  %v6423_v13 = vpop.f32.mrb[46].mxu1  ;;  %v7445_v57 = vld [vmem:[#allocation10 + $0x28] sm:$0xff]   ;;  %vm10479_vm0 = vnez %v10273_v32 }
 0x1f1   : > { %v6424_v62 = vpop.f32.mrb[47].mxu1  ;;  %6709 = vmatpush3.bf16.msra.mxu1 %v7445_v57 }
 0x1f2   : > { %v6314_v8 = vpop.f32.mrb[48].mxu0  ;;  %v9207_v23 = vadd.f32 %v6422_v10, %v2661_v37  ;;  %v6425_v9 = vadd.f32 %v6424_v62, %v6423_v13  ;;  %6710 = vmatprep.subr.bf16.mxu1 %v7446_v26 }
 0x1f3   : > { %v6315_v53 = vpop.f32.mrb[49].mxu0 }
 0x1f4   : > { %v6316_v14 = vadd.f32 %v6315_v53, %v6314_v8  ;;  %v6317_v3 = vpop.f32.mrb[50].mxu0  ;;  %v9211_v54 = vadd.f32 %v6425_v9, %v2664_v60 }
 0x1f5   : > { %v6318_v46 = vpop.f32.mrb[51].mxu0 }
 0x1f6   : > { %v6319_v29 = vadd.f32 %v6318_v46, %v6317_v3  ;;  %v2669_v1 = vadd.f32 %v6316_v14, %v9062_v28  ;;  %v6426_v2 = vpop.f32.mrb[48].mxu1 }
 0x1f7   : > { %7215 = vmatmul.mubr.msk.bf16.gmra.mrb[156].mxu0 %vm8978_vm2, %v1778_v36  ;;  %v6427_v55 = vpop.f32.mrb[49].mxu1  ;;  %vm10478_vm2 = vnez %v10267_v61  ;;  %v7504_v61 = vld [vmem:[#allocation10 + $0x230] sm:$0xff]  }
 0x1f8   : > { %v2672_v3 = vadd.f32 %v6319_v29, %v9062_v28  ;;  %v6428_v37 = vadd.f32 %v6427_v55, %v6426_v2  ;;  %v6429_v10 = vpop.f32.mrb[50].mxu1 }
 0x1f9   : > { %v6430_v46 = vpop.f32.mrb[51].mxu1 }
 0x1fa   : > { %v6320_v58 = vpop.f32.mrb[52].mxu0  ;;  %v9215_v36 = vadd.f32 %v6428_v37, %v2669_v1  ;;  %v6431_v39 = vadd.f32 %v6430_v46, %v6429_v10  ;;  %v7448_v46 = vld [vmem:[#allocation10 + $0xc0] sm:$0xff]  }
 0x1fb   : > { %v6321_v8 = vpop.f32.mrb[53].mxu0  ;;  %6810 = vmatprep.subr.bf16.mxu0 %v7448_v46 }
 0x1fc   : > { %v6322_v53 = vadd.f32 %v6321_v8, %v6320_v58  ;;  %v6323_v30 = vpop.f32.mrb[54].mxu0  ;;  %v9217_v60 = vadd.f32 %v6431_v39, %v2672_v3 }
 0x1fd   : > { %v6324_v13 = vpop.f32.mrb[55].mxu0 }
 0x1fe   : > { %v6325_v62 = vadd.f32 %v6324_v13, %v6323_v30  ;;  %v2677_v14 = vadd.f32 %v6322_v53, %v9062_v28  ;;  %v6432_v9 = vpop.f32.mrb[52].mxu1  ;;  %v7447_v30 = vld [vmem:[#allocation10 + $0x30] sm:$0xff]  }
 0x1ff   : > { %v6433_v63 = vpop.f32.mrb[53].mxu1  ;;  %6711 = vmatpush3.bf16.msra.mxu1 %v7447_v30 }
 0x200   : > { %v2680_v29 = vadd.f32 %v6325_v62, %v9062_v28  ;;  %v6434_v2 = vadd.f32 %v6433_v63, %v6432_v9  ;;  %v6435_v55 = vpop.f32.mrb[54].mxu1  ;;  %v7449_v63 = vld [vmem:[#allocation10 + $0x80] sm:$0xff]  }
 0x201   : > { %v6436_v1 = vpop.f32.mrb[55].mxu1  ;;  %6811 = vmatpush3.bf16.msra.mxu0 %v7449_v63 }
 0x202   : > { %v6326_v57 = vpop.f32.mrb[56].mxu0  ;;  %v9221_v10 = vadd.f32 %v6434_v2, %v2677_v14  ;;  %v6437_v3 = vadd.f32 %v6436_v1, %v6435_v55  ;;  %v7450_v55 = vld [vmem:[#allocation10 + $0xc8] sm:$0xff]  }
 0x203   : > { %v6327_v27 = vpop.f32.mrb[57].mxu0  ;;  %6812 = vmatprep.subr.bf16.mxu0 %v7450_v55 }
 0x204   : > { %v6328_v58 = vadd.f32 %v6327_v27, %v6326_v57  ;;  %v6329_v8 = vpop.f32.mrb[58].mxu0  ;;  %v9223_v53 = vadd.f32 %v6437_v3, %v2680_v29 }
 0x205   : > { %v6330_v15 = vpop.f32.mrb[59].mxu0 }
 0x206   : > { %v6331_v37 = vadd.f32 %v6330_v15, %v6329_v8  ;;  %v2685_v27 = vadd.f32 %v6328_v58, %v9062_v28  ;;  %v6438_v39 = vpop.f32.mrb[56].mxu1  ;;  %v7451_v58 = vld [vmem:[#allocation10 + $0x88] sm:$0xff]  }
 0x207   : > { %v6439_v57 = vpop.f32.mrb[57].mxu1  ;;  %6813 = vmatpush3.bf16.msra.mxu0 %v7451_v58 }
 0x208   : > { %v2688_v15 = vadd.f32 %v6331_v37, %v9062_v28  ;;  %v6440_v14 = vadd.f32 %v6439_v57, %v6438_v39  ;;  %v6441_v8 = vpop.f32.mrb[58].mxu1  ;;  %v7455_v57 = vld [vmem:[#allocation10 + $0x90] sm:$0xff]  }
 0x209   : > { %v6442_v26 = vpop.f32.mrb[59].mxu1 }
 0x20a   : > { %v6332_v13 = vpop.f32.mrb[60].mxu0  ;;  %v9227_v30 = vadd.f32 %v6440_v14, %v2685_v27  ;;  %v6443_v1 = vadd.f32 %v6442_v26, %v6441_v8 }
 0x20b   : > { %v6333_v62 = vpop.f32.mrb[61].mxu0 }
 0x20c   : > { %v6334_v9 = vadd.f32 %v6333_v62, %v6332_v13  ;;  %v6335_v38 = vpop.f32.mrb[62].mxu0  ;;  %v9229_v3 = vadd.f32 %v6443_v1, %v2688_v15  ;;  %v7453_v62 = vld [vmem:[#allocation10 + $0xd0] sm:$0xff]   ;;  %v7454_v15 = vld [vmem:[#allocation10 + $0x38] sm:$0xff]  }
 0x20d   : > { %v6336_v2 = vpop.f32.mrb[63].mxu0  ;;  %6814 = vmatprep.subr.bf16.mxu0 %v7453_v62 }
 0x20e   : > { %v6337_v29 = vadd.f32 %v6336_v2, %v6335_v38  ;;  %v2693_v46 = vadd.f32 %v6334_v9, %v9062_v28  ;;  %v6444_v37 = vpop.f32.mrb[60].mxu1  ;;  %v7452_v2 = vld [vmem:[#allocation10 + $0x78] sm:$0xff]   ;;  %6815 = vmatpush3.bf16.msra.mxu0 %v7455_v57 }
 0x20f   : > { %v6445_v0 = vpop.f32.mrb[61].mxu1  ;;  %v7456_v9 = vld [vmem:[#allocation10 + $0xd8] sm:$0xff]   ;;  %6712 = vmatprep.subr.bf16.mxu1 %v7452_v2 }
 0x210   : > { %v2696_v38 = vadd.f32 %v6337_v29, %v9062_v28  ;;  %v6446_v27 = vadd.f32 %v6445_v0, %v6444_v37  ;;  %v6447_v14 = vpop.f32.mrb[62].mxu1  ;;  %6713 = vmatpush3.bf16.msra.mxu1 %v7454_v15  ;;  %6816 = vmatprep.subr.bf16.mxu0 %v7456_v9  ;;  %v7458_v29 = vld [vmem:[#allocation10 + $0xe0] sm:$0xff]  }
 0x211   : > { %v6448_v26 = vpop.f32.mrb[63].mxu1  ;;  %v7459_v37 = vld [vmem:[#allocation10 + $0xa0] sm:$0xff]  }
 0x212   : > { %v6466_v13 = vpop.f32.mrb[64].mxu0  ;;  %v9234_v58 = vadd.f32 %v6446_v27, %v2693_v46  ;;  %v6449_v6 = vadd.f32 %v6448_v26, %v6447_v14  ;;  %v3408_v2 = vld [vmem:[#allocation2 + $0xf] sm:$0xff] }
 0x213   : > { %v6467_v39 = vpop.f32.mrb[65].mxu0 }
 0x214   : > { %v6468_v63 = vadd.f32 %v6467_v39, %v6466_v13  ;;  %v6469_v44 = vpop.f32.mrb[66].mxu0  ;;  %v7457_v13 = vld [vmem:[#allocation10 + $0x98] sm:$0xff]   ;;  %v9237_v0 = vadd.f32 %v6449_v6, %v2696_v38  ;;  %v7460_v39 = vld [vmem:[#allocation10 + $0xe8] sm:$0xff]  }
 0x215   : > { %v6470_v8 = vpop.f32.mrb[67].mxu0  ;;  %6817 = vmatpush3.bf16.msra.mxu0 %v7457_v13  ;;  %v7461_v13 = vld [vmem:[#allocation10 + $0xa8] sm:$0xff]  }
 0x216   : > { %v2895_v55 = vadd.f32 %v6468_v63, %v9071_v33  ;;  %v6471_v1 = vadd.f32 %v6470_v8, %v6469_v44  ;;  %v6578_v57 = vpop.f32.mrb[64].mxu1  ;;  %6818 = vmatprep.subr.bf16.mxu0 %v7458_v29 }
 0x217   : > { %v6579_v44 = vpop.f32.mrb[65].mxu1 }
 0x218   : > { %v2898_v62 = vadd.f32 %v6471_v1, %v9080_v12  ;;  %v6580_v27 = vadd.f32 %v6579_v44, %v6578_v57  ;;  %v6581_v14 = vpop.f32.mrb[66].mxu1  ;;  %v3407_v12 = vld [vmem:[#allocation2 + $0x7] sm:$0xff] }
 0x219   : > { %6819 = vmatpush3.bf16.msra.mxu0 %v7459_v37  ;;  %v6582_v15 = vpop.f32.mrb[67].mxu1  ;;  %v3439_v26 = vpack.c.bf16 %v3408_v2, %v3407_v12  ;;  %v7462_v57 = vld [vmem:[#allocation10 + $0xf0] sm:$0xff]  }
 0x21a   : > { %v6472_v28 = vpop.f32.mrb[68].mxu0  ;;  %6820 = vmatprep.subr.bf16.mxu0 %v7460_v39  ;;  %v6583_v1 = vadd.f32 %v6582_v15, %v6581_v14  ;;  %v9240_v9 = vadd.f32 %v6580_v27, %v2895_v55  ;;  %v7466_v55 = vld [vmem:[#allocation10 + $0xf8] sm:$0xff]  }
 0x21b   : > { %v6473_v33 = vpop.f32.mrb[69].mxu0  ;;  %6130 = vmatmul.mubr.msk.bf16.vlgmr.msra.gmra.mrb[128].mxu1 %vm10478_vm2, %v3439_v26  ;;  %v7467_v26 = vld [vmem:[#allocation10 + $0xb8] sm:$0xff]  }
 0x21c   : > { %v6474_v63 = vadd.f32 %v6473_v33, %v6472_v28  ;;  %v6475_v46 = vpop.f32.mrb[70].mxu0  ;;  %v9246_v29 = vadd.f32 %v6583_v1, %v2898_v62  ;;  %v7464_v33 = vld [vmem:[#allocation10 + $0xb0] sm:$0xff]  }
 0x21d   : > { %v6476_v8 = vpop.f32.mrb[71].mxu0  ;;  %6821 = vmatpush3.bf16.msra.mxu0 %v7461_v13 }
 0x21e   : > { %v2903_v6 = vadd.f32 %v6474_v63, %v9085_v21  ;;  %v6477_v38 = vadd.f32 %v6476_v8, %v6475_v46  ;;  %v7463_v21 = vld [vmem:[#allocation10 + $0x140] sm:$0xff]   ;;  %v6584_v39 = vpop.f32.mrb[68].mxu1  ;;  %6822 = vmatprep.subr.bf16.mxu0 %v7462_v57 }
 0x21f   : > { %v7465_v63 = vld [vmem:[#allocation10 + $0x100] sm:$0xff]   ;;  %v6585_v46 = vpop.f32.mrb[69].mxu1  ;;  %6922 = vmatprep.subr.bf16.mxu1 %v7463_v21 }
 0x220   : > { %v2906_v28 = vadd.f32 %v6477_v38, %v9094_v49  ;;  %v6586_v49 = vadd.f32 %v6585_v46, %v6584_v39  ;;  %v6587_v14 = vpop.f32.mrb[70].mxu1  ;;  %6923 = vmatpush3.bf16.msra.mxu1 %v7465_v63 }
 0x221   : > { %6823 = vmatpush3.bf16.msra.mxu0 %v7464_v33  ;;  %v6588_v62 = vpop.f32.mrb[71].mxu1 }
 0x222   : > { %v6478_v37 = vpop.f32.mrb[72].mxu0  ;;  %6824 = vmatprep.subr.bf16.mxu0 %v7466_v55  ;;  %v6589_v15 = vadd.f32 %v6588_v62, %v6587_v14  ;;  %v9249_v38 = vadd.f32 %v6586_v49, %v2903_v6  ;;  %v7469_v62 = vld [vmem:[#allocation10 + $0x108] sm:$0xff]  }
 0x223   : > { %v6479_v44 = vpop.f32.mrb[73].mxu0 }
 0x224   : > { %v6480_v27 = vadd.f32 %v6479_v44, %v6478_v37  ;;  %v6481_v25 = vpop.f32.mrb[74].mxu0  ;;  %v9252_v13 = vadd.f32 %v6589_v15, %v2906_v28 }
 0x225   : > { %v6482_v8 = vpop.f32.mrb[75].mxu0  ;;  %6825 = vmatpush3.bf16.msra.mxu0 %v7467_v26 }
 0x226   : > { %v2911_v12 = vadd.f32 %v6480_v27, %v9101_v5  ;;  %v6483_v2 = vadd.f32 %v6482_v8, %v6481_v25  ;;  %v6590_v57 = vpop.f32.mrb[72].mxu1  ;;  %v7468_v8 = vld [vmem:[#allocation10 + $0x148] sm:$0xff]  }
 0x227   : > { %v6591_v39 = vpop.f32.mrb[73].mxu1  ;;  %6924 = vmatprep.subr.bf16.mxu1 %v7468_v8 }
 0x228   : > { %v2914_v1 = vadd.f32 %v6483_v2, %v9110_v51  ;;  %v6592_v63 = vadd.f32 %v6591_v39, %v6590_v57  ;;  %v6593_v46 = vpop.f32.mrb[74].mxu1  ;;  %6925 = vmatpush3.bf16.msra.mxu1 %v7469_v62 }
 0x229   : > { %v6594_v27 = vpop.f32.mrb[75].mxu1 }
 0x22a   : > { %v6484_v37 = vpop.f32.mrb[76].mxu0  ;;  %v6595_v25 = vadd.f32 %v6594_v27, %v6593_v46  ;;  %v9255_v49 = vadd.f32 %v6592_v63, %v2911_v12 }
 0x22b   : > { %v6485_v21 = vpop.f32.mrb[77].mxu0 }
 0x22c   : > { %v6486_v33 = vadd.f32 %v6485_v21, %v6484_v37  ;;  %v6487_v44 = vpop.f32.mrb[78].mxu0  ;;  %v9258_v28 = vadd.f32 %v6595_v25, %v2914_v1 }
 0x22d   : > { %v6488_v5 = vpop.f32.mrb[79].mxu0 }
 0x22e   : > { %v2919_v55 = vadd.f32 %v6486_v33, %v9117_v17  ;;  %v6489_v6 = vadd.f32 %v6488_v5, %v6487_v44  ;;  %v6596_v2 = vpop.f32.mrb[76].mxu1 }
 0x22f   : > { %v6597_v26 = vpop.f32.mrb[77].mxu1 }
 0x230   : > { %v2922_v51 = vadd.f32 %v6489_v6, %v9126_v24  ;;  %v6598_v21 = vadd.f32 %v6597_v26, %v6596_v2  ;;  %v6599_v39 = vpop.f32.mrb[78].mxu1 }
 0x231   : > { %v6600_v33 = vpop.f32.mrb[79].mxu1 }
 0x232   : > { %v6490_v14 = vpop.f32.mrb[80].mxu0  ;;  %v6601_v24 = vadd.f32 %v6600_v33, %v6599_v39  ;;  %v9261_v1 = vadd.f32 %v6598_v21, %v2919_v55  ;;  %v7470_v39 = vld [vmem:[#allocation10 + $0x150] sm:$0xff]  }
 0x233   : > { %v6491_v15 = vpop.f32.mrb[81].mxu0  ;;  %6926 = vmatprep.subr.bf16.mxu1 %v7470_v39 }
 0x234   : > { %v6492_v37 = vadd.f32 %v6491_v15, %v6490_v14  ;;  %v6493_v57 = vpop.f32.mrb[82].mxu0  ;;  %v9264_v46 = vadd.f32 %v6601_v24, %v2922_v51 }
 0x235   : > { %v6494_v17 = vpop.f32.mrb[83].mxu0 }
 0x236   : > { %v2927_v12 = vadd.f32 %v6492_v37, %v9133_v59  ;;  %v6495_v44 = vadd.f32 %v6494_v17, %v6493_v57  ;;  %v6602_v27 = vpop.f32.mrb[80].mxu1  ;;  %v7471_v17 = vld [vmem:[#allocation10 + $0x110] sm:$0xff]  }
 0x237   : > { %v6603_v25 = vpop.f32.mrb[81].mxu1  ;;  %6927 = vmatpush3.bf16.msra.mxu1 %v7471_v17 }
 0x238   : > { %v2930_v63 = vadd.f32 %v6495_v44, %v9140_v43  ;;  %v6604_v2 = vadd.f32 %v6603_v25, %v6602_v27  ;;  %v6605_v15 = vpop.f32.mrb[82].mxu1 }
 0x239   : > { %v6606_v26 = vpop.f32.mrb[83].mxu1 }
 0x23a   : > { %v6496_v5 = vpop.f32.mrb[84].mxu0  ;;  %v6607_v57 = vadd.f32 %v6606_v26, %v6605_v15  ;;  %v9267_v55 = vadd.f32 %v6604_v2, %v2927_v12 }
 0x23b   : > { %v6497_v6 = vpop.f32.mrb[85].mxu0 }
 0x23c   : > { %v6498_v14 = vadd.f32 %v6497_v6, %v6496_v5  ;;  %v6499_v8 = vpop.f32.mrb[86].mxu0  ;;  %v9270_v51 = vadd.f32 %v6607_v57, %v2930_v63 }
 0x23d   : > { %v6500_v62 = vpop.f32.mrb[87].mxu0 }
 0x23e   : > { %v2935_v59 = vadd.f32 %v6498_v14, %v9147_v40  ;;  %v6501_v37 = vadd.f32 %v6500_v62, %v6499_v8  ;;  %v6608_v33 = vpop.f32.mrb[84].mxu1 }
 0x23f   : > { %v6609_v24 = vpop.f32.mrb[85].mxu1 }
 0x240   : > { %v2938_v43 = vadd.f32 %v6501_v37, %v9152_v47  ;;  %v6610_v6 = vadd.f32 %v6609_v24, %v6608_v33  ;;  %v6611_v25 = vpop.f32.mrb[86].mxu1 }
 0x241   : > { %v6612_v14 = vpop.f32.mrb[87].mxu1 }
 0x242   : > { %v6502_v21 = vpop.f32.mrb[88].mxu0  ;;  %v6613_v47 = vadd.f32 %v6612_v14, %v6611_v25  ;;  %v9273_v63 = vadd.f32 %v6610_v6, %v2935_v59  ;;  %v7472_v25 = vld [vmem:[#allocation10 + $0x158] sm:$0xff]  }
 0x243   : > { %v6503_v44 = vpop.f32.mrb[89].mxu0  ;;  %6928 = vmatprep.subr.bf16.mxu1 %v7472_v25 }
 0x244   : > { %v6504_v5 = vadd.f32 %v6503_v44, %v6502_v21  ;;  %v6505_v27 = vpop.f32.mrb[90].mxu0  ;;  %v9276_v15 = vadd.f32 %v6613_v47, %v2938_v43 }
 0x245   : > { %v6506_v40 = vpop.f32.mrb[91].mxu0 }
 0x246   : > { %v2943_v12 = vadd.f32 %v6504_v5, %v9158_v16  ;;  %v6507_v8 = vadd.f32 %v6506_v40, %v6505_v27  ;;  %v6614_v26 = vpop.f32.mrb[88].mxu1  ;;  %v7473_v40 = vld [vmem:[#allocation10 + $0x118] sm:$0xff]  }
 0x247   : > { %v6615_v57 = vpop.f32.mrb[89].mxu1  ;;  %6929 = vmatpush3.bf16.msra.mxu1 %v7473_v40 }
 0x248   : > { %v2946_v2 = vadd.f32 %v6507_v8, %v9162_v48  ;;  %v6616_v33 = vadd.f32 %v6615_v57, %v6614_v26  ;;  %v6617_v44 = vpop.f32.mrb[90].mxu1 }
 0x249   : > { %v6618_v24 = vpop.f32.mrb[91].mxu1 }
 0x24a   : > { %v6508_v62 = vpop.f32.mrb[92].mxu0  ;;  %v6619_v27 = vadd.f32 %v6618_v24, %v6617_v44  ;;  %v9279_v59 = vadd.f32 %v6616_v33, %v2943_v12 }
 0x24b   : > { %v6509_v37 = vpop.f32.mrb[93].mxu0 }
 0x24c   : > { %v6510_v21 = vadd.f32 %v6509_v37, %v6508_v62  ;;  %v6511_v39 = vpop.f32.mrb[94].mxu0  ;;  %v9282_v43 = vadd.f32 %v6619_v27, %v2946_v2 }
 0x24d   : > { %v6512_v17 = vpop.f32.mrb[95].mxu0 }
 0x24e   : > { %v2951_v16 = vadd.f32 %v6510_v21, %v9168_v42  ;;  %v6513_v5 = vadd.f32 %v6512_v17, %v6511_v39  ;;  %v6620_v14 = vpop.f32.mrb[92].mxu1 }
 0x24f   : > { %v6621_v47 = vpop.f32.mrb[93].mxu1 }
 0x250   : > { %v2954_v48 = vadd.f32 %v6513_v5, %v9172_v31  ;;  %v6622_v37 = vadd.f32 %v6621_v47, %v6620_v14  ;;  %v6623_v57 = vpop.f32.mrb[94].mxu1  ;;  %v7474_v31 = vld [vmem:[#allocation10 + $0x1c0] sm:$0xff]  }
 0x251   : > { %v6624_v21 = vpop.f32.mrb[95].mxu1  ;;  %7034 = vmatprep.subr.bf16.mxu0 %v7474_v31 }
 0x252   : > { %v6514_v6 = vpop.f32.mrb[96].mxu0  ;;  %v6625_v2 = vadd.f32 %v6624_v21, %v6623_v57  ;;  %v9285_v33 = vadd.f32 %v6622_v37, %v2951_v16  ;;  %v7477_v37 = vld [vmem:[#allocation10 + $0x120] sm:$0xff]  }
 0x253   : > { %v6515_v8 = vpop.f32.mrb[97].mxu0 }
 0x254   : > { %v6516_v62 = vadd.f32 %v6515_v8, %v6514_v6  ;;  %v6517_v26 = vpop.f32.mrb[98].mxu0  ;;  %v9288_v17 = vadd.f32 %v6625_v2, %v2954_v48 }
 0x255   : > { %v6518_v42 = vpop.f32.mrb[99].mxu0 }
 0x256   : > { %v2959_v12 = vadd.f32 %v6516_v62, %v9176_v56  ;;  %v6519_v39 = vadd.f32 %v6518_v42, %v6517_v26  ;;  %v6626_v5 = vpop.f32.mrb[96].mxu1  ;;  %v7476_v56 = vld [vmem:[#allocation10 + $0x160] sm:$0xff]  }
 0x257   : > { %v6627_v6 = vpop.f32.mrb[97].mxu1  ;;  %6930 = vmatprep.subr.bf16.mxu1 %v7476_v56 }
 0x258   : > { %v2962_v44 = vadd.f32 %v6519_v39, %v9182_v35  ;;  %v6628_v40 = vadd.f32 %v6627_v6, %v6626_v5  ;;  %v6629_v8 = vpop.f32.mrb[98].mxu1  ;;  %6931 = vmatpush3.bf16.msra.mxu1 %v7477_v37 }
 0x259   : > { %v6630_v62 = vpop.f32.mrb[99].mxu1 }
 0x25a   : > { %v6520_v24 = vpop.f32.mrb[100].mxu0  ;;  %v6631_v57 = vadd.f32 %v6630_v62, %v6629_v8  ;;  %v9291_v35 = vadd.f32 %v6628_v40, %v2959_v12 }
 0x25b   : > { %v6521_v27 = vpop.f32.mrb[101].mxu0 }
 0x25c   : > { %v6522_v25 = vadd.f32 %v6521_v27, %v6520_v24  ;;  %v6523_v14 = vpop.f32.mrb[102].mxu0  ;;  %v9294_v42 = vadd.f32 %v6631_v57, %v2962_v44 }
 0x25d   : > { %v6524_v47 = vpop.f32.mrb[103].mxu0 }
 0x25e   : > { %v2967_v26 = vadd.f32 %v6522_v25, %v9186_v52  ;;  %v6525_v16 = vadd.f32 %v6524_v47, %v6523_v14  ;;  %v6632_v39 = vpop.f32.mrb[100].mxu1 }
 0x25f   : > { %v6633_v2 = vpop.f32.mrb[101].mxu1 }
 0x260   : > { %v2970_v48 = vadd.f32 %v6525_v16, %v9192_v20  ;;  %v6634_v27 = vadd.f32 %v6633_v2, %v6632_v39  ;;  %v6635_v6 = vpop.f32.mrb[102].mxu1  ;;  %v7480_v2 = vld [vmem:[#allocation10 + $0x168] sm:$0xff]  }
 0x261   : > { %v6636_v25 = vpop.f32.mrb[103].mxu1  ;;  %6932 = vmatprep.subr.bf16.mxu1 %v7480_v2 }
 0x262   : > { %v6526_v21 = vpop.f32.mrb[104].mxu0  ;;  %v6637_v40 = vadd.f32 %v6636_v25, %v6635_v6  ;;  %v9297_v8 = vadd.f32 %v6634_v27, %v2967_v26  ;;  %v7481_v26 = vld [vmem:[#allocation10 + $0x128] sm:$0xff]  }
 0x263   : > { %v6527_v31 = vpop.f32.mrb[105].mxu0  ;;  %6933 = vmatpush3.bf16.msra.mxu1 %v7481_v26 }
 0x264   : > { %v6528_v24 = vadd.f32 %v6527_v31, %v6526_v21  ;;  %v6529_v5 = vpop.f32.mrb[106].mxu0  ;;  %v9300_v44 = vadd.f32 %v6637_v40, %v2970_v48 }
 0x265   : > { %v6530_v52 = vpop.f32.mrb[107].mxu0 }
 0x266   : > { %v2975_v14 = vadd.f32 %v6528_v24, %v9196_v34  ;;  %v6531_v12 = vadd.f32 %v6530_v52, %v6529_v5  ;;  %v6638_v56 = vpop.f32.mrb[104].mxu1 }
 0x267   : > { %v6639_v16 = vpop.f32.mrb[105].mxu1 }
 0x268   : > { %v2978_v20 = vadd.f32 %v6531_v12, %v9203_v41  ;;  %v6640_v21 = vadd.f32 %v6639_v16, %v6638_v56  ;;  %v6641_v39 = vpop.f32.mrb[106].mxu1 }
 0x269   : > { %v6642_v19 = vpop.f32.mrb[107].mxu1 }
 0x26a   : > { %v6532_v47 = vpop.f32.mrb[108].mxu0  ;;  %v6643_v5 = vadd.f32 %v6642_v19, %v6641_v39  ;;  %v9303_v27 = vadd.f32 %v6640_v21, %v2975_v14 }
 0x26b   : > { %v6533_v62 = vpop.f32.mrb[109].mxu0 }
 0x26c   : > { %v6534_v37 = vadd.f32 %v6533_v62, %v6532_v47  ;;  %v6535_v57 = vpop.f32.mrb[110].mxu0  ;;  %v9306_v48 = vadd.f32 %v6643_v5, %v2978_v20 }
 0x26d   : > { %v6536_v31 = vpop.f32.mrb[111].mxu0 }
 0x26e   : > { %v2983_v34 = vadd.f32 %v6534_v37, %v9207_v23  ;;  %v6537_v24 = vadd.f32 %v6536_v31, %v6535_v57  ;;  %v6644_v52 = vpop.f32.mrb[108].mxu1 }
 0x26f   : > { %v6645_v12 = vpop.f32.mrb[109].mxu1 }
 0x270   : > { %v2986_v41 = vadd.f32 %v6537_v24, %v9211_v54  ;;  %v6646_v56 = vadd.f32 %v6645_v12, %v6644_v52  ;;  %v6647_v62 = vpop.f32.mrb[110].mxu1 }
 0x271   : > { %v6648_v16 = vpop.f32.mrb[111].mxu1 }
 0x272   : > { %v6538_v6 = vpop.f32.mrb[112].mxu0  ;;  %v6649_v37 = vadd.f32 %v6648_v16, %v6647_v62  ;;  %v9309_v57 = vadd.f32 %v6646_v56, %v2983_v34  ;;  %v7485_v34 = vld [vmem:[#allocation10 + $0x130] sm:$0xff]  }
 0x273   : > { %v6539_v25 = vpop.f32.mrb[113].mxu0 }
 0x274   : > { %v6540_v40 = vadd.f32 %v6539_v25, %v6538_v6  ;;  %v6541_v47 = vpop.f32.mrb[114].mxu0  ;;  %v9312_v20 = vadd.f32 %v6649_v37, %v2986_v41  ;;  %v7484_v25 = vld [vmem:[#allocation10 + $0x170] sm:$0xff]  }
 0x275   : > { %v6542_v23 = vpop.f32.mrb[115].mxu0  ;;  %6934 = vmatprep.subr.bf16.mxu1 %v7484_v25 }
 0x276   : > { %v2991_v19 = vadd.f32 %v6540_v40, %v9215_v36  ;;  %v6543_v14 = vadd.f32 %v6542_v23, %v6541_v47  ;;  %v6650_v39 = vpop.f32.mrb[112].mxu1  ;;  %6935 = vmatpush3.bf16.msra.mxu1 %v7485_v34 }
 0x277   : > { %v6651_v2 = vpop.f32.mrb[113].mxu1 }
 0x278   : > { %v2994_v54 = vadd.f32 %v6543_v14, %v9217_v60  ;;  %v6652_v5 = vadd.f32 %v6651_v2, %v6650_v39  ;;  %v6653_v6 = vpop.f32.mrb[114].mxu1 }
 0x279   : > { %v6654_v12 = vpop.f32.mrb[115].mxu1 }
 0x27a   : > { %v6544_v21 = vpop.f32.mrb[116].mxu0  ;;  %v6655_v47 = vadd.f32 %v6654_v12, %v6653_v6  ;;  %v9315_v56 = vadd.f32 %v6652_v5, %v2991_v19 }
 0x27b   : > { %v6545_v31 = vpop.f32.mrb[117].mxu0 }
 0x27c   : > { %v6546_v24 = vadd.f32 %v6545_v31, %v6544_v21  ;;  %v6547_v26 = vpop.f32.mrb[118].mxu0  ;;  %v9318_v41 = vadd.f32 %v6655_v47, %v2994_v54 }
 0x27d   : > { %v6548_v52 = vpop.f32.mrb[119].mxu0 }
 0x27e   : > { %v2999_v36 = vadd.f32 %v6546_v24, %v9221_v10  ;;  %v6549_v40 = vadd.f32 %v6548_v52, %v6547_v26  ;;  %v6656_v23 = vpop.f32.mrb[116].mxu1 }
 0x27f   : > { %v6657_v14 = vpop.f32.mrb[117].mxu1 }
 0x280   : > { %v3002_v60 = vadd.f32 %v6549_v40, %v9223_v53  ;;  %v6658_v39 = vadd.f32 %v6657_v14, %v6656_v23  ;;  %v6659_v31 = vpop.f32.mrb[118].mxu1 }
 0x281   : > { %v6660_v2 = vpop.f32.mrb[119].mxu1 }
 0x282   : > { %v6550_v62 = vpop.f32.mrb[120].mxu0  ;;  %v6661_v26 = vadd.f32 %v6660_v2, %v6659_v31  ;;  %v9321_v5 = vadd.f32 %v6658_v39, %v2999_v36  ;;  %v7489_v36 = vld [vmem:[#allocation10 + $0x138] sm:$0xff]  }
 0x283   : > { %v6551_v16 = vpop.f32.mrb[121].mxu0 }
 0x284   : > { %v6552_v37 = vadd.f32 %v6551_v16, %v6550_v62  ;;  %v6553_v21 = vpop.f32.mrb[122].mxu0  ;;  %v9324_v54 = vadd.f32 %v6661_v26, %v3002_v60  ;;  %v7488_v16 = vld [vmem:[#allocation10 + $0x178] sm:$0xff]  }
 0x285   : > { %v6554_v10 = vpop.f32.mrb[123].mxu0  ;;  %6936 = vmatprep.subr.bf16.mxu1 %v7488_v16 }
 0x286   : > { %v3007_v24 = vadd.f32 %v6552_v37, %v9227_v30  ;;  %v6555_v19 = vadd.f32 %v6554_v10, %v6553_v21  ;;  %v6662_v52 = vpop.f32.mrb[120].mxu1  ;;  %6937 = vmatpush3.bf16.msra.mxu1 %v7489_v36 }
 0x287   : > { %v6663_v12 = vpop.f32.mrb[121].mxu1 }
 0x288   : > { %v3010_v53 = vadd.f32 %v6555_v19, %v9229_v3  ;;  %v6664_v47 = vadd.f32 %v6663_v12, %v6662_v52  ;;  %v6665_v62 = vpop.f32.mrb[122].mxu1 }
 0x289   : > { %v6666_v14 = vpop.f32.mrb[123].mxu1 }
 0x28a   : > { %v6556_v6 = vpop.f32.mrb[124].mxu0  ;;  %v6667_v21 = vadd.f32 %v6666_v14, %v6665_v62  ;;  %v9327_v39 = vadd.f32 %v6664_v47, %v3007_v24 }
 0x28b   : > { %v6557_v25 = vpop.f32.mrb[125].mxu0 }
 0x28c   : > { %v6558_v40 = vadd.f32 %v6557_v25, %v6556_v6  ;;  %v6559_v34 = vpop.f32.mrb[126].mxu0  ;;  %v9330_v60 = vadd.f32 %v6667_v21, %v3010_v53 }
 0x28d   : > { %v6560_v23 = vpop.f32.mrb[127].mxu0 }
 0x28e   : > { %v3015_v30 = vadd.f32 %v6558_v40, %v9234_v58  ;;  %v6561_v37 = vadd.f32 %v6560_v23, %v6559_v34  ;;  %v6668_v10 = vpop.f32.mrb[124].mxu1 }
 0x28f   : > { %v6669_v26 = vpop.f32.mrb[125].mxu1 }
 0x290   : > { %v3018_v3 = vadd.f32 %v6561_v37, %v9237_v0  ;;  %v6670_v52 = vadd.f32 %v6669_v26, %v6668_v10  ;;  %v6671_v25 = vpop.f32.mrb[126].mxu1 }
 0x291   : > { %v6672_v34 = vpop.f32.mrb[127].mxu1 }
 0x292   : > { %v7188_v31 = vpop.f32.mrb[128].mxu0  ;;  %v6673_v47 = vadd.f32 %v6672_v34, %v6671_v25  ;;  %v9336_v23 = vadd.f32 %v6670_v52, %v3015_v30 }
 0x293   : > { %v3225_v2 = vadd.f32 %v7188_v31, %v9249_v38  ;;  %v3216_v19 = vpop.f32.mrb[129].mxu0 }
 0x294   : > { %v3217_v6 = vadd.f32 %v3216_v19, %v9240_v9  ;;  %v7189_v58 = vpop.f32.mrb[130].mxu0  ;;  %v9338_v16 = vadd.f32 %v6673_v47, %v3018_v3 }
 0x295   : > { %v3345_v12 = vmax.f32 %v3225_v2, 0.0  ;;  %v3228_v24 = vadd.f32 %v7189_v58, %v9252_v13  ;;  %v3219_v40 = vpop.f32.mrb[131].mxu0  ;;  %v9343_v2 = vld [vmem:[#allocation10 + $0x200] sm:$0xff]   ;;  %v3551_v58 = vld [vmem:[#allocation2 + $0x9] sm:$0xff] }
 0x296   : > { %v3343_v0 = vmax.f32 %v3217_v6, 0.0  ;;  %v3220_v53 = vadd.f32 %v3219_v40, %v9246_v29  ;;  %7218 = vmatprep.subr.bf16.mxu1 %v9343_v2 }
 0x297   : > { %3377 = vst [vmem:[#allocation2 + $0x28] sm:$0xff] %v3345_v12  ;;  %v3346_v62 = vmax.f32 %v3228_v24, 0.0 }
 0x298   : > { %3375 = vst [vmem:[#allocation2 + $0x18] sm:$0xff] %v3343_v0  ;;  %v3344_v38 = vmax.f32 %v3220_v53, 0.0 }
 0x299   : > { %3378 = vst [vmem:[#allocation2 + $0x30] sm:$0xff] %v3346_v62  ;;  %v3521_v9 = vpack.c.bf16 %v3346_v62, %v3345_v12  ;;  %v7478_v62 = vld [vmem:[#allocation10 + $0x1c8] sm:$0xff]  }
 0x29a   : > { %3376 = vst [vmem:[#allocation2 + $0x20] sm:$0xff] %v3344_v38  ;;  %v7192_v14 = vpop.f32.mrb[132].mxu0  ;;  %v3520_v37 = vpack.c.bf16 %v3344_v38, %v3343_v0 }
 0x29b   : > { %v3241_v13 = vadd.f32 %v7192_v14, %v9261_v1  ;;  %v3232_v36 = vpop.f32.mrb[133].mxu0 }
 0x29c   : > { %v3233_v21 = vadd.f32 %v3232_v36, %v9255_v49  ;;  %v7193_v29 = vpop.f32.mrb[134].mxu0  ;;  %4846 = vmatprep.mubr.bf16.mxu1 %v3520_v37 }
 0x29d   : > { %v3349_v31 = vmax.f32 %v3241_v13, 0.0  ;;  %v3244_v30 = vadd.f32 %v7193_v29, %v9264_v46  ;;  %v3235_v10 = vpop.f32.mrb[135].mxu0  ;;  %v7479_v29 = vld [vmem:[#allocation10 + $0x188] sm:$0xff]  }
 0x29e   : > { %v3347_v19 = vmax.f32 %v3233_v21, 0.0  ;;  %v3236_v3 = vadd.f32 %v3235_v10, %v9258_v28  ;;  %v7475_v28 = vld [vmem:[#allocation10 + $0x180] sm:$0xff]  }
 0x29f   : > { %3381 = vst [vmem:[#allocation2 + $0x48] sm:$0xff] %v3349_v31  ;;  %v3350_v26 = vmax.f32 %v3244_v30, 0.0  ;;  %v3631_v6 = vld [vmem:[#allocation2 + $0x17] sm:$0xff]  ;;  %v7482_v30 = vld [vmem:[#allocation10 + $0x1d0] sm:$0xff]  }
 0x2a0   : > { %3379 = vst [vmem:[#allocation2 + $0x38] sm:$0xff] %v3347_v19  ;;  %v3348_v1 = vmax.f32 %v3236_v3, 0.0  ;;  %v3552_v49 = vld [vmem:[#allocation2 + $0x11] sm:$0xff] }
 0x2a1   : > { %3382 = vst [vmem:[#allocation2 + $0x50] sm:$0xff] %v3350_v26  ;;  %v3632_v52 = vld [vmem:[#allocation2 + $0x1f] sm:$0xff]  ;;  %v3633_v25 = vld [vmem:[#allocation2 + $0x27] sm:$0xff]  ;;  %v3634_v12 = vld [vmem:[#allocation2 + $0x2f] sm:$0xff]  ;;  %v9347_v46 = vpack.c.bf16 %v3350_v26, %v3349_v31  ;;  %v3583_v47 = vpack.c.bf16 %v3552_v49, %v3551_v58 }
 0x2a2   : > { %3380 = vst [vmem:[#allocation2 + $0x40] sm:$0xff] %v3348_v1  ;;  %v7196_v24 = vpop.f32.mrb[136].mxu0  ;;  %v3663_v40 = vpack.c.bf16 %v3632_v52, %v3631_v6  ;;  %v3522_v34 = vpack.c.bf16 %v3348_v1, %v3347_v19  ;;  %v9355_v37 = vpack.c.bf16 %v3634_v12, %v3633_v25  ;;  %v3553_v10 = vld [vmem:[#allocation2 + $0x19] sm:$0xff]  ;;  %v3554_v19 = vld [vmem:[#allocation2 + $0x21] sm:$0xff]  ;;  %v7486_v25 = vld [vmem:[#allocation10 + $0x1d8] sm:$0xff]  }
 0x2a3   : > { %v3257_v0 = vadd.f32 %v7196_v24, %v9273_v63  ;;  %v3248_v53 = vpop.f32.mrb[137].mxu0  ;;  %v7483_v1 = vld [vmem:[#allocation10 + $0x190] sm:$0xff]   ;;  %v9369_v49 = vpack.c.bf16 %v3554_v19, %v3553_v10 }
 0x2a4   : > { %v3249_v38 = vadd.f32 %v3248_v53, %v9267_v55  ;;  %v7197_v14 = vpop.f32.mrb[138].mxu0  ;;  %6146 = vmatprep.mubr.msk.bf16.mxu0 %vm10478_vm2, %v3663_v40  ;;  %6131 = vmatmul.mubr.msk.bf16.gmra.mrb[132].mxu1 %vm10479_vm0, %v3663_v40 }
 0x2a5   : > { %v3353_v13 = vmax.f32 %v3257_v0, 0.0  ;;  %v3260_v36 = vadd.f32 %v7197_v14, %v9276_v15  ;;  %v3251_v21 = vpop.f32.mrb[139].mxu0  ;;  %6147 = vmatmul.mubr.msk.bf16.vlgmr.msra.gmra.mrb[160].mxu0 %vm8105_vm15, %v3583_v47  ;;  %4854 = vmatprep.mubr.bf16.mxu1 %v3521_v9 }
 0x2a6   : > { %v3351_v63 = vmax.f32 %v3249_v38, 0.0  ;;  %v3252_v55 = vadd.f32 %v3251_v21, %v9270_v51  ;;  %6148 = vmatprep.mubr.msk.bf16.mxu0 %vm10479_vm0, %v9355_v37  ;;  %7035 = vmatpush3.bf16.msra.mxu0 %v7475_v28  ;;  %vm10480_vm0 = vnez %v10284_v4  ;;  %v7490_v38 = vld [vmem:[#allocation10 + $0x1e0] sm:$0xff]   ;;  %v3555_v21 = vld [vmem:[#allocation2 + $0x29] sm:$0xff] }
 0x2a7   : > { %3385 = vst [vmem:[#allocation2 + $0x68] sm:$0xff] %v3353_v13  ;;  %v3354_v31 = vmax.f32 %v3260_v36, 0.0  ;;  %7036 = vmatprep.subr.bf16.mxu0 %v7478_v62  ;;  %v3635_v52 = vld [vmem:[#allocation2 + $0x37] sm:$0xff] }
 0x2a8   : > { %3383 = vst [vmem:[#allocation2 + $0x58] sm:$0xff] %v3351_v63  ;;  %v3352_v15 = vmax.f32 %v3252_v55, 0.0  ;;  %v3556_v14 = vld [vmem:[#allocation2 + $0x31] sm:$0xff] }
 0x2a9   : > { %3386 = vst [vmem:[#allocation2 + $0x70] sm:$0xff] %v3354_v31  ;;  %v3636_v3 = vld [vmem:[#allocation2 + $0x3f] sm:$0xff]  ;;  %v9364_v9 = vpack.c.bf16 %v3354_v31, %v3353_v13  ;;  %v3637_v13 = vld [vmem:[#allocation2 + $0x47] sm:$0xff]  ;;  %v3638_v36 = vld [vmem:[#allocation2 + $0x4f] sm:$0xff] }
 0x2aa   : > { %3384 = vst [vmem:[#allocation2 + $0x60] sm:$0xff] %v3352_v15  ;;  %v7200_v51 = vpop.f32.mrb[140].mxu0  ;;  %v9366_v26 = vpack.c.bf16 %v3352_v15, %v3351_v63  ;;  %7037 = vmatpush3.bf16.msra.mxu0 %v7479_v29  ;;  %v9375_v40 = vpack.c.bf16 %v3636_v3, %v3635_v52  ;;  %v7491_v55 = vld [vmem:[#allocation10 + $0x1a0] sm:$0xff]   ;;  %v7492_v15 = vld [vmem:[#allocation10 + $0x1e8] sm:$0xff]   ;;  %v9396_v3 = vpack.c.bf16 %v3638_v36, %v3637_v13 }
 0x2ab   : > { %v3273_v6 = vadd.f32 %v7200_v51, %v9285_v33  ;;  %v3264_v58 = vpop.f32.mrb[141].mxu0  ;;  %7038 = vmatprep.subr.bf16.mxu0 %v7482_v30  ;;  %v9390_v30 = vpack.c.bf16 %v3556_v14, %v3555_v21 }
 0x2ac   : > { %v3265_v12 = vadd.f32 %v3264_v58, %v9279_v59  ;;  %v7201_v24 = vpop.f32.mrb[142].mxu0  ;;  %6132 = vmatmul.mubr.msk.bf16.gmra.mrb[136].mxu1 %vm10480_vm0, %v9355_v37  ;;  %v7487_v59 = vld [vmem:[#allocation10 + $0x198] sm:$0xff]   ;;  %v7493_v58 = vld [vmem:[#allocation10 + $0x1a8] sm:$0xff]  }
 0x2ad   : > { %v3357_v28 = vmax.f32 %v3273_v6, 0.0  ;;  %v3276_v0 = vadd.f32 %v7201_v24, %v9288_v17  ;;  %v3267_v53 = vpop.f32.mrb[143].mxu0  ;;  %6149 = vmatmul.mubr.msk.bf16.gmra.mrb[164].mxu0 %vm8179_vm7, %v9369_v49  ;;  %4862 = vmatprep.mubr.bf16.mxu1 %v3522_v34  ;;  %v3558_v24 = vld [vmem:[#allocation2 + $0x41] sm:$0xff] }
 0x2ae   : > { %v3355_v33 = vmax.f32 %v3265_v12, 0.0  ;;  %v3268_v47 = vadd.f32 %v3267_v53, %v9282_v43  ;;  %6150 = vmatprep.mubr.msk.bf16.mxu0 %vm10480_vm0, %v9375_v40  ;;  %7039 = vmatpush3.bf16.msra.mxu0 %v7483_v1  ;;  %vm10481_vm0 = vnez %v10292_v45  ;;  %v3557_v12 = vld [vmem:[#allocation2 + $0x39] sm:$0xff]  ;;  %v7496_v53 = vld [vmem:[#allocation10 + $0x1b0] sm:$0xff]  }
 0x2af   : > { %3389 = vst [vmem:[#allocation2 + $0x88] sm:$0xff] %v3357_v28  ;;  %v3358_v62 = vmax.f32 %v3276_v0, 0.0  ;;  %7040 = vmatprep.subr.bf16.mxu0 %v7486_v25 }
 0x2b0   : > { %3387 = vst [vmem:[#allocation2 + $0x78] sm:$0xff] %v3355_v33  ;;  %v3356_v17 = vmax.f32 %v3268_v47, 0.0 }
 0x2b1   : > { %3390 = vst [vmem:[#allocation2 + $0x90] sm:$0xff] %v3358_v62  ;;  %v9385_v34 = vpack.c.bf16 %v3358_v62, %v3357_v28  ;;  %v3640_v28 = vld [vmem:[#allocation2 + $0x5f] sm:$0xff]  ;;  %v3639_v62 = vld [vmem:[#allocation2 + $0x57] sm:$0xff] }
 0x2b2   : > { %3388 = vst [vmem:[#allocation2 + $0x80] sm:$0xff] %v3356_v17  ;;  %v7204_v43 = vpop.f32.mrb[144].mxu0  ;;  %v9387_v63 = vpack.c.bf16 %v3356_v17, %v3355_v33  ;;  %7041 = vmatpush3.bf16.msra.mxu0 %v7487_v59  ;;  %v9412_v59 = vpack.c.bf16 %v3558_v24, %v3557_v12  ;;  %v9418_v13 = vpack.c.bf16 %v3640_v28, %v3639_v62 }
 0x2b3   : > { %v3289_v29 = vadd.f32 %v7204_v43, %v9297_v8  ;;  %v3280_v31 = vpop.f32.mrb[145].mxu0  ;;  %7042 = vmatprep.subr.bf16.mxu0 %v7490_v38  ;;  %v7497_v38 = vld [vmem:[#allocation10 + $0x1f8] sm:$0xff]  }
 0x2b4   : > { %v3281_v10 = vadd.f32 %v3280_v31, %v9291_v35  ;;  %v7205_v19 = vpop.f32.mrb[146].mxu0  ;;  %6133 = vmatmul.mubr.msk.bf16.gmra.mrb[140].mxu1 %vm10481_vm0, %v9375_v40  ;;  %v3560_v31 = vld [vmem:[#allocation2 + $0x51] sm:$0xff] }
 0x2b5   : > { %v3361_v51 = vmax.f32 %v3289_v29, 0.0  ;;  %v3292_v1 = vadd.f32 %v7205_v19, %v9300_v44  ;;  %v3283_v6 = vpop.f32.mrb[147].mxu0  ;;  %6151 = vmatmul.mubr.msk.bf16.gmra.mrb[168].mxu0 %vm10472_vm14, %v9390_v30  ;;  %4870 = vmatprep.mubr.bf16.mxu1 %v9347_v46  ;;  %v7494_v44 = vld [vmem:[#allocation10 + $0x1f0] sm:$0xff]  }
 0x2b6   : > { %v3359_v8 = vmax.f32 %v3281_v10, 0.0  ;;  %v3284_v35 = vadd.f32 %v3283_v6, %v9294_v42  ;;  %6152 = vmatprep.mubr.msk.bf16.mxu0 %vm10481_vm0, %v9396_v3  ;;  %7043 = vmatpush3.bf16.msra.mxu0 %v7491_v55  ;;  %vm10482_vm0 = vnez %v10302_v22  ;;  %v7498_v55 = vld [vmem:[#allocation10 + $0x1b8] sm:$0xff]  }
 0x2b7   : > { %3393 = vst [vmem:[#allocation2 + $0xa8] sm:$0xff] %v3361_v51  ;;  %v3362_v52 = vmax.f32 %v3292_v1, 0.0  ;;  %7044 = vmatprep.subr.bf16.mxu0 %v7492_v15  ;;  %v3641_v15 = vld [vmem:[#allocation2 + $0x67] sm:$0xff]  ;;  %v3642_v10 = vld [vmem:[#allocation2 + $0x6f] sm:$0xff] }
 0x2b8   : > { %3391 = vst [vmem:[#allocation2 + $0x98] sm:$0xff] %v3359_v8  ;;  %v3360_v25 = vmax.f32 %v3284_v35, 0.0 }
 0x2b9   : > { %3394 = vst [vmem:[#allocation2 + $0xb0] sm:$0xff] %v3362_v52  ;;  %v9407_v46 = vpack.c.bf16 %v3362_v52, %v3361_v51  ;;  %v10483_v52 = vld [vmem:[#allocation20_spill] sm:$0xff] }
 0x2ba   : > { %3392 = vst [vmem:[#allocation2 + $0xa0] sm:$0xff] %v3360_v25  ;;  %v7208_v42 = vpop.f32.mrb[148].mxu0  ;;  %v9409_v0 = vpack.c.bf16 %v3360_v25, %v3359_v8  ;;  %7045 = vmatpush3.bf16.msra.mxu0 %v7493_v58 }
 0x2bb   : > { %v3305_v33 = vadd.f32 %v7208_v42, %v9309_v57  ;;  %v3296_v47 = vpop.f32.mrb[149].mxu0  ;;  %7046 = vmatprep.subr.bf16.mxu0 %v7494_v44  ;;  %v9440_v44 = vpack.c.bf16 %v3642_v10, %v3641_v15 }
 0x2bc   : > { %v3297_v17 = vadd.f32 %v3296_v47, %v9303_v27  ;;  %v7209_v14 = vpop.f32.mrb[150].mxu0  ;;  %6134 = vmatmul.mubr.msk.bf16.gmra.mrb[144].mxu1 %vm10482_vm0, %v9396_v3  ;;  %v3644_v47 = vld [vmem:[#allocation2 + $0x7f] sm:$0xff] }
 0x2bd   : > { %v3365_v36 = vmax.f32 %v3305_v33, 0.0  ;;  %v3308_v43 = vadd.f32 %v7209_v14, %v9312_v20  ;;  %v3299_v21 = vpop.f32.mrb[151].mxu0  ;;  %6153 = vmatmul.mubr.msk.bf16.gmra.mrb[172].mxu0 %vm10473_vm10, %v9412_v59  ;;  %4878 = vmatprep.mubr.bf16.mxu1 %v9366_v26  ;;  %v3561_v33 = vld [vmem:[#allocation2 + $0x59] sm:$0xff] }
 0x2be   : > { %v3363_v57 = vmax.f32 %v3297_v17, 0.0  ;;  %v3300_v27 = vadd.f32 %v3299_v21, %v9306_v48  ;;  %6154 = vmatprep.mubr.msk.bf16.mxu0 %vm10482_vm0, %v9418_v13  ;;  %7047 = vmatpush3.bf16.msra.mxu0 %v7496_v53  ;;  %v3559_v48 = vld [vmem:[#allocation2 + $0x49] sm:$0xff]  ;;  %vm10484_vm0 = vnez %v10483_v52 }
 0x2bf   : > { %3397 = vst [vmem:[#allocation2 + $0xc8] sm:$0xff] %v3365_v36  ;;  %v3366_v29 = vmax.f32 %v3308_v43, 0.0  ;;  %7048 = vmatprep.subr.bf16.mxu0 %v7497_v38  ;;  %v9434_v8 = vpack.c.bf16 %v3560_v31, %v3559_v48  ;;  %v10488_v31 = vld [vmem:[#allocation22_spill] sm:$0xff] }
 0x2c0   : > { %3395 = vst [vmem:[#allocation2 + $0xb8] sm:$0xff] %v3363_v57  ;;  %v3364_v20 = vmax.f32 %v3300_v27, 0.0  ;;  %v3646_v48 = vld [vmem:[#allocation2 + $0x8f] sm:$0xff] }
 0x2c1   : > { %3398 = vst [vmem:[#allocation2 + $0xd0] sm:$0xff] %v3366_v29  ;;  %v9429_v19 = vpack.c.bf16 %v3366_v29, %v3365_v36  ;;  %v3643_v36 = vld [vmem:[#allocation2 + $0x77] sm:$0xff] }
 0x2c2   : > { %3396 = vst [vmem:[#allocation2 + $0xc0] sm:$0xff] %v3364_v20  ;;  %v7212_v26 = vpop.f32.mrb[152].mxu0  ;;  %v9431_v51 = vpack.c.bf16 %v3364_v20, %v3363_v57  ;;  %7049 = vmatpush3.bf16.msra.mxu0 %v7498_v55  ;;  %v10486_v57 = vld [vmem:[#allocation21_spill] sm:$0xff]  ;;  %v9462_v27 = vpack.c.bf16 %v3644_v47, %v3643_v36 }
 0x2c3   : > { %v3321_v1 = vadd.f32 %v7212_v26, %v9321_v5  ;;  %v3312_v6 = vpop.f32.mrb[153].mxu0  ;;  %v3564_v26 = vld [vmem:[#allocation2 + $0x71] sm:$0xff] }
 0x2c4   : > { %v3313_v35 = vadd.f32 %v3312_v6, %v9315_v56  ;;  %v7213_v58 = vpop.f32.mrb[154].mxu0  ;;  %6135 = vmatmul.mubr.msk.bf16.gmra.mrb[148].mxu1 %vm10484_vm0, %v9418_v13  ;;  %v3650_v47 = vld [vmem:[#allocation2 + $0xaf] sm:$0xff] }
 0x2c5   : > { %v3369_v25 = vmax.f32 %v3321_v1, 0.0  ;;  %v3324_v12 = vadd.f32 %v7213_v58, %v9324_v54  ;;  %v3315_v24 = vpop.f32.mrb[155].mxu0  ;;  %6155 = vmatmul.mubr.msk.bf16.gmra.mrb[176].mxu0 %vm10474_vm8, %v9434_v8  ;;  %4886 = vmatprep.mubr.bf16.mxu1 %v9364_v9  ;;  %v3562_v54 = vld [vmem:[#allocation2 + $0x61] sm:$0xff]  ;;  %v3563_v1 = vld [vmem:[#allocation2 + $0x69] sm:$0xff] }
 0x2c6   : > { %v3367_v5 = vmax.f32 %v3313_v35, 0.0  ;;  %v3316_v56 = vadd.f32 %v3315_v24, %v9318_v41  ;;  %6156 = vmatprep.mubr.msk.bf16.mxu0 %vm10484_vm0, %v9440_v44  ;;  %v9456_v14 = vpack.c.bf16 %v3562_v54, %v3561_v33  ;;  %vm10487_vm0 = vnez %v10486_v57  ;;  %v3648_v24 = vld [vmem:[#allocation2 + $0x9f] sm:$0xff]  ;;  %v3649_v54 = vld [vmem:[#allocation2 + $0xa7] sm:$0xff] }
 0x2c7   : > { %3401 = vst [vmem:[#allocation2 + $0xe8] sm:$0xff] %v3369_v25  ;;  %v3370_v42 = vmax.f32 %v3324_v12, 0.0  ;;  %v3566_v12 = vld [vmem:[#allocation2 + $0x81] sm:$0xff]  ;;  %v9508_v36 = vpack.c.bf16 %v3650_v47, %v3649_v54 }
 0x2c8   : > { %3399 = vst [vmem:[#allocation2 + $0xd8] sm:$0xff] %v3367_v5  ;;  %v3368_v53 = vmax.f32 %v3316_v56, 0.0  ;;  %v3647_v56 = vld [vmem:[#allocation2 + $0x97] sm:$0xff] }
 0x2c9   : > { %3402 = vst [vmem:[#allocation2 + $0xf0] sm:$0xff] %v3370_v42  ;;  %v9451_v62 = vpack.c.bf16 %v3370_v42, %v3369_v25  ;;  %v3565_v25 = vld [vmem:[#allocation2 + $0x79] sm:$0xff]  ;;  %v10492_v42 = vld [vmem:[#allocation25_spill] sm:$0xff] }
 0x2ca   : > { %3400 = vst [vmem:[#allocation2 + $0xe0] sm:$0xff] %v3368_v53  ;;  %v7216_v38 = vpop.f32.mrb[156].mxu0  ;;  %v9453_v9 = vpack.c.bf16 %v3368_v53, %v3367_v5  ;;  %v9489_v5 = vpack.c.bf16 %v3566_v12, %v3565_v25  ;;  %v9494_v53 = vpack.c.bf16 %v3648_v24, %v3647_v56  ;;  %v10501_v25 = vld [vmem:[#allocation31_spill] sm:$0xff] }
 0x2cb   : > { %v3337_v41 = vadd.f32 %v7216_v38, %v9336_v23  ;;  %v3328_v17 = vpop.f32.mrb[157].mxu0  ;;  %v3567_v38 = vld [vmem:[#allocation2 + $0x89] sm:$0xff] }
 0x2cc   : > { %v3329_v43 = vadd.f32 %v3328_v17, %v9327_v39  ;;  %v7217_v21 = vpop.f32.mrb[158].mxu0  ;;  %6136 = vmatmul.mubr.msk.bf16.gmra.mrb[152].mxu1 %vm10487_vm0, %v9440_v44  ;;  %v10495_v17 = vld [vmem:[#allocation27_spill] sm:$0xff] }
 0x2cd   : > { %v3373_v55 = vmax.f32 %v3337_v41, 0.0  ;;  %v3340_v29 = vadd.f32 %v7217_v21, %v9338_v16  ;;  %v3331_v20 = vpop.f32.mrb[159].mxu0  ;;  %6157 = vmatmul.mubr.msk.bf16.gmra.mrb[180].mxu0 %vm10475_vm9, %v9456_v14  ;;  %4894 = vmatprep.mubr.bf16.mxu1 %v9387_v63  ;;  %v3645_v16 = vld [vmem:[#allocation2 + $0x87] sm:$0xff]  ;;  %v9475_v63 = vpack.c.bf16 %v3564_v26, %v3563_v1  ;;  %v3654_v26 = vld [vmem:[#allocation2 + $0xcf] sm:$0xff] }
 0x2ce   : > { %v3371_v23 = vmax.f32 %v3329_v43, 0.0  ;;  %v3332_v39 = vadd.f32 %v3331_v20, %v9330_v60  ;;  %6158 = vmatprep.mubr.msk.bf16.mxu0 %vm10487_vm0, %v9462_v27  ;;  %v10489_v60 = vld [vmem:[#allocation24_spill] sm:$0xff]  ;;  %v9480_v35 = vpack.c.bf16 %v3646_v48, %v3645_v16  ;;  %vm10493_vm0 = vnez %v10492_v42  ;;  %v3651_v20 = vld [vmem:[#allocation2 + $0xb7] sm:$0xff] }
 0x2cf   : > { %3405 = vst [vmem:[#allocation2 + $0x108] sm:$0xff] %v3373_v55  ;;  %v3374_v15 = vmax.f32 %v3340_v29, 0.0  ;;  %vm10490_vm9 = vnez %v10489_v60  ;;  %v3570_v21 = vld [vmem:[#allocation2 + $0xa1] sm:$0xff]  ;;  %v3571_v16 = vld [vmem:[#allocation2 + $0xa9] sm:$0xff] }
 0x2d0   : > { %3403 = vst [vmem:[#allocation2 + $0xf8] sm:$0xff] %v3371_v23  ;;  %v3372_v10 = vmax.f32 %v3332_v39, 0.0  ;;  %v3652_v55 = vld [vmem:[#allocation2 + $0xbf] sm:$0xff] }
 0x2d1   : > { %3406 = vst [vmem:[#allocation2 + $0x110] sm:$0xff] %v3374_v15  ;;  %v9522_v39 = vpack.c.bf16 %v3652_v55, %v3651_v20  ;;  %v3655_v20 = vld [vmem:[#allocation2 + $0xd7] sm:$0xff] }
 0x2d2   : > { %3404 = vst [vmem:[#allocation2 + $0x100] sm:$0xff] %v3372_v10  ;;  %v9473_v6 = vpack.c.bf16 %v3372_v10, %v3371_v23  ;;  %v10498_v23 = vld [vmem:[#allocation29_spill] sm:$0xff] }
 0x2d3   : > { %v3653_v10 = vld [vmem:[#allocation2 + $0xc7] sm:$0xff] }
 0x2d4   : > { %6137 = vmatmul.mubr.msk.bf16.gmra.mrb[156].mxu1 %vm10490_vm9, %v9462_v27  ;;  %v9536_v12 = vpack.c.bf16 %v3654_v26, %v3653_v10  ;;  %v3576_v26 = vld [vmem:[#allocation2 + $0xd1] sm:$0xff] }
 0x2d5   : > { %6159 = vmatmul.mubr.msk.bf16.gmra.mrb[184].mxu0 %vm10476_vm12, %v9475_v63  ;;  %4902 = vmatprep.mubr.bf16.mxu1 %v9385_v34  ;;  %v3568_v34 = vld [vmem:[#allocation2 + $0x91] sm:$0xff] }
 0x2d6   : > { %6160 = vmatprep.mubr.msk.bf16.mxu0 %vm10490_vm9, %v9480_v35  ;;  %v9503_v41 = vpack.c.bf16 %v3568_v34, %v3567_v38  ;;  %vm10496_vm9 = vnez %v10495_v17  ;;  %v3573_v38 = vld [vmem:[#allocation2 + $0xb9] sm:$0xff] }
 0x2dc   : > { %6138 = vmatmul.mubr.msk.bf16.gmra.mrb[160].mxu1 %vm10493_vm0, %v9480_v35 }
 0x2dd   : > { %6161 = vmatmul.mubr.msk.bf16.gmra.mrb[188].mxu0 %vm10477_vm13, %v9489_v5  ;;  %4910 = vmatprep.mubr.bf16.mxu1 %v9409_v0  ;;  %v3569_v0 = vld [vmem:[#allocation2 + $0x99] sm:$0xff] }
 0x2de   : > { %6162 = vmatprep.mubr.msk.bf16.mxu0 %vm10493_vm0, %v9494_v53  ;;  %v9517_v29 = vpack.c.bf16 %v3570_v21, %v3569_v0  ;;  %vm10499_vm0 = vnez %v10498_v23  ;;  %v3574_v0 = vld [vmem:[#allocation2 + $0xc1] sm:$0xff] }
 0x2df   : > { %v3656_v21 = vld [vmem:[#allocation2 + $0xdf] sm:$0xff]  ;;  %v9549_v55 = vpack.c.bf16 %v3574_v0, %v3573_v38 }
 0x2e4   : > { %6139 = vmatmul.mubr.msk.bf16.gmra.mrb[164].mxu1 %vm10496_vm9, %v9494_v53 }
 0x2e5   : > { %6163 = vmatmul.mubr.msk.bf16.gmra.mrb[192].mxu0 %vm10451_vm11, %v9503_v41  ;;  %4918 = vmatprep.mubr.bf16.mxu1 %v9407_v46  ;;  %v3572_v46 = vld [vmem:[#allocation2 + $0xb1] sm:$0xff] }
 0x2e6   : > { %6164 = vmatprep.mubr.msk.bf16.mxu0 %vm10496_vm9, %v9508_v36  ;;  %v9531_v48 = vpack.c.bf16 %v3572_v46, %v3571_v16  ;;  %vm10502_vm9 = vnez %v10501_v25  ;;  %v10504_v46 = vld [vmem:[#allocation34_spill] sm:$0xff]  ;;  %v3657_v16 = vld [vmem:[#allocation2 + $0xe7] sm:$0xff] }
 0x2ec   : > { %6140 = vmatmul.mubr.msk.bf16.gmra.mrb[168].mxu1 %vm10499_vm0, %v9508_v36 }
 0x2ed   : > { %6165 = vmatmul.mubr.msk.bf16.gmra.mrb[196].mxu0 %vm10453_vm6, %v9517_v29  ;;  %4926 = vmatprep.mubr.bf16.mxu1 %v9431_v51 }
 0x2ee   : > { %6166 = vmatprep.mubr.msk.bf16.mxu0 %vm10499_vm0, %v9522_v39  ;;  %v6714_v1 = vpop.f32.mrb[128].mxu1  ;;  %vm10505_vm0 = vnez %v10504_v46  ;;  %v10512_v46 = vld [vmem:[#allocation41_spill] sm:$0xff] }
 0x2ef   : > { %v6715_v24 = vpop.f32.mrb[129].mxu1 }
 0x2f0   : > { %v9542_v56 = vadd.f32 %v6715_v24, %v6714_v1  ;;  %v6717_v34 = vpop.f32.mrb[130].mxu1  ;;  %v3658_v1 = vld [vmem:[#allocation2 + $0xef] sm:$0xff] }
 0x2f1   : > { %v6718_v54 = vpop.f32.mrb[131].mxu1  ;;  %v3575_v24 = vld [vmem:[#allocation2 + $0xc9] sm:$0xff]  ;;  %v9568_v38 = vpack.c.bf16 %v3658_v1, %v3657_v16 }
 0x2f2   : > { %v9547_v47 = vadd.f32 %v6718_v54, %v6717_v34  ;;  %v9563_v34 = vpack.c.bf16 %v3576_v26, %v3575_v24  ;;  %v10508_v54 = vld [vmem:[#allocation36_spill] sm:$0xff]  ;;  %v3659_v24 = vld [vmem:[#allocation2 + $0xf7] sm:$0xff] }
 0x2f3   : > { %10510 = vst [vmem:[#allocation38_spill] sm:$0xff] %v9568_v38  ;;  %v3936_v1 = vld [vmem:[#allocation2 + $0x30] sm:$0xff] }
 0x2f4   : > { %6141 = vmatmul.mubr.msk.bf16.gmra.mrb[172].mxu1 %vm10502_vm9, %v9522_v39 }
 0x2f5   : > { %6167 = vmatmul.mubr.msk.bf16.gmra.mrb[200].mxu0 %vm8799_vm4, %v9531_v48  ;;  %4934 = vmatprep.mubr.bf16.mxu1 %v9429_v19  ;;  %v9554_v19 = vpack.c.bf16 %v3656_v21, %v3655_v20  ;;  %v3578_v21 = vld [vmem:[#allocation2 + $0xe1] sm:$0xff] }
 0x2f6   : > { %6168 = vmatprep.mubr.msk.bf16.mxu0 %vm10502_vm9, %v9536_v12  ;;  %vm10509_vm9 = vnez %v10508_v54  ;;  %v3660_v20 = vld [vmem:[#allocation2 + $0xff] sm:$0xff]  ;;  %v3579_v54 = vld [vmem:[#allocation2 + $0xe9] sm:$0xff] }
 0x2f7   : > { %10506 = vst [vmem:[#allocation35_spill] sm:$0xff] %v9554_v19  ;;  %v9582_v16 = vpack.c.bf16 %v3660_v20, %v3659_v24  ;;  %v10519_v24 = vld [vmem:[#allocation45_spill] sm:$0xff] }
 0x2f9   : > { %10514 = vst [vmem:[#allocation39_spill] sm:$0xff] %v9582_v16 }
 0x2fc   : > { %6142 = vmatmul.mubr.msk.bf16.gmra.mrb[176].mxu1 %vm10505_vm0, %v9536_v12 }
 0x2fd   : > { %6169 = vmatmul.mubr.msk.bf16.gmra.mrb[204].mxu0 %vm8805_vm5, %v9549_v55  ;;  %4942 = vmatprep.mubr.bf16.mxu1 %v9453_v9  ;;  %v3577_v9 = vld [vmem:[#allocation2 + $0xd9] sm:$0xff] }
 0x2fe   : > { %6170 = vmatprep.mubr.msk.bf16.mxu0 %vm10505_vm0, %v9554_v19  ;;  %v9577_v26 = vpack.c.bf16 %v3578_v21, %v3577_v9  ;;  %vm10513_vm0 = vnez %v10512_v46  ;;  %v3661_v9 = vld [vmem:[#allocation2 + $0x107] sm:$0xff]  ;;  %v3662_v21 = vld [vmem:[#allocation2 + $0x10f] sm:$0xff]  ;;  %v3711_v46 = vld [vmem:[#allocation2 + $0x18] sm:$0xff] }
 0x2ff   : > { %v9596_v20 = vpack.c.bf16 %v3662_v21, %v3661_v9  ;;  %v3935_v21 = vld [vmem:[#allocation2 + $0x28] sm:$0xff] }
 0x304   : > { %6143 = vmatmul.mubr.msk.bf16.gmra.mrb[180].mxu1 %vm10509_vm9, %v9554_v19  ;;  %v7499_v19 = vld [vmem:[#allocation10 + $0x208] sm:$0xff]  }
 0x305   : > { %6171 = vmatmul.mubr.msk.bf16.gmra.mrb[208].mxu0 %vm8874_vm3, %v9563_v34  ;;  %4950 = vmatprep.mubr.bf16.mxu1 %v9451_v62  ;;  %v3580_v62 = vld [vmem:[#allocation2 + $0xf1] sm:$0xff] }
 0x306   : > { %6172 = vmatprep.mubr.msk.bf16.mxu0 %vm10509_vm9, %v9568_v38  ;;  %v9591_v25 = vpack.c.bf16 %v3580_v62, %v3579_v54  ;;  %v3581_v54 = vld [vmem:[#allocation2 + $0xf9] sm:$0xff]  ;;  %v3582_v62 = vld [vmem:[#allocation2 + $0x101] sm:$0xff] }
 0x307   : > { %v9607_v9 = vpack.c.bf16 %v3582_v62, %v3581_v54  ;;  %v7501_v54 = vld [vmem:[#allocation10 + $0x218] sm:$0xff]  }
 0x308   : > { %10516 = vst [vmem:[#allocation42_spill] sm:$0xff] %v9591_v25  ;;  %v7505_v62 = vld [vmem:[#allocation10 + $0x238] sm:$0xff]  }
 0x30c   : > { %6144 = vmatmul.mubr.msk.bf16.gmra.mrb[184].mxu1 %vm10513_vm0, %v9568_v38  ;;  %v10517_v38 = vld [vmem:[#allocation43_spill] sm:$0xff] }
 0x30d   : > { %6173 = vmatmul.mubr.msk.bf16.gmra.mrb[212].mxu0 %vm8900_vm1, %v9577_v26  ;;  %4958 = vmatprep.mubr.bf16.mxu1 %v9473_v6  ;;  %vm10518_vm9 = vnez %v10517_v38  ;;  %vm10520_vm1 = vnez %v10519_v24  ;;  %v3712_v6 = vld [vmem:[#allocation2 + $0x20] sm:$0xff]  ;;  %v3967_v24 = vpack.c.bf16 %v3936_v1, %v3935_v21 }
 0x30e   : > { %6174 = vmatprep.mubr.msk.bf16.mxu0 %vm10513_vm0, %v9582_v16  ;;  %v7503_v1 = vld [vmem:[#allocation10 + $0x228] sm:$0xff]  }
 0x314   : > { %6145 = vmatmul.mubr.msk.bf16.gmra.mrb[188].mxu1 %vm10518_vm9, %v9582_v16  ;;  %v3743_v16 = vpack.c.bf16 %v3712_v6, %v3711_v46  ;;  %v3938_v46 = vld [vmem:[#allocation2 + $0x40] sm:$0xff]  ;;  %v3937_v6 = vld [vmem:[#allocation2 + $0x38] sm:$0xff] }
 0x315   : > { %6175 = vmatmul.mubr.msk.bf16.gmra.mrb[216].mxu0 %vm10520_vm1, %v9591_v25  ;;  %6178 = vmatprep.mubr.msk.bf16.mxu1 %vm8105_vm15, %v9369_v49  ;;  %v10521_v25 = vld [vmem:[#allocation48_spill] sm:$0xff] }
 0x316   : > { %6176 = vmatprep.mubr.msk.bf16.mxu0 %vm10518_vm9, %v9596_v20  ;;  %vm10522_vm0 = vnez %v10521_v25  ;;  %v7500_v49 = vld [vmem:[#allocation10 + $0x210] sm:$0xff]   ;;  %vm10523_vm9 = vnez %v10273_v32  ;;  %v3944_v32 = vld [vmem:[#allocation2 + $0x70] sm:$0xff] }
 0x31c   : > { %5161 = vmatmul.mubr.bf16.vlgmr.msra.gmra.mrb[192].mxu1 %v3743_v16  ;;  %v3968_v16 = vpack.c.bf16 %v3938_v46, %v3937_v6 }
 0x31d   : > { %6177 = vmatmul.mubr.msk.bf16.gmra.mrb[220].mxu0 %vm10522_vm0, %v9607_v9  ;;  %6179 = vmatprep.mubr.msk.bf16.mxu1 %vm8179_vm7, %v9390_v30  ;;  %v3940_v30 = vld [vmem:[#allocation2 + $0x50] sm:$0xff] }
 0x31e   : > { %5321 = vmatprep.mubr.bf16.mxu0 %v3967_v24  ;;  %7219 = vmatpush3.bf16.msra.mxu1 %v9343_v2  ;;  %v7502_v2 = vld [vmem:[#allocation10 + $0x220] sm:$0xff]  }
 0x31f   : > { %7220 = vmatprep.subr.bf16.mxu1 %v7499_v19 }
 0x322   : > { %7221 = vmatpush3.bf16.msra.mxu1 %v7499_v19  ;;  %v3939_v19 = vld [vmem:[#allocation2 + $0x48] sm:$0xff] }
 0x323   : > { %7222 = vmatprep.subr.bf16.mxu1 %v7500_v49 }
 0x324   : > { %5169 = vmatmul.mubr.bf16.gmra.mrb[196].mxu1 %v3967_v24  ;;  %v3969_v24 = vpack.c.bf16 %v3940_v30, %v3939_v19 }
 0x325   : > { %6194 = vmatmul.mubr.msk.bf16.vlgmr.msra.gmra.mrb[224].mxu0 %vm10478_vm2, %v9355_v37  ;;  %6180 = vmatprep.mubr.msk.bf16.mxu1 %vm10472_vm14, %v9412_v59  ;;  %v3942_v37 = vld [vmem:[#allocation2 + $0x60] sm:$0xff]  ;;  %v3941_v59 = vld [vmem:[#allocation2 + $0x58] sm:$0xff]  ;;  %vm10524_vm2 = vnez %v10284_v4 }
 0x326   : > { %5329 = vmatprep.mubr.bf16.mxu0 %v3968_v16  ;;  %7223 = vmatpush3.bf16.msra.mxu1 %v7500_v49  ;;  %v3970_v21 = vpack.c.bf16 %v3942_v37, %v3941_v59  ;;  %v3946_v4 = vld [vmem:[#allocation2 + $0x80] sm:$0xff] }
 0x327   : > { %7224 = vmatprep.subr.bf16.mxu1 %v7501_v54 }
 0x32a   : > { %7225 = vmatpush3.bf16.msra.mxu1 %v7501_v54 }
 0x32b   : > { %7226 = vmatprep.subr.bf16.mxu1 %v7502_v2 }
 0x32c   : > { %5177 = vmatmul.mubr.bf16.gmra.mrb[200].mxu1 %v3968_v16  ;;  %v3960_v16 = vld [vmem:[#allocation2 + $0xf0] sm:$0xff] }
 0x32d   : > { %6195 = vmatmul.mubr.msk.bf16.gmra.mrb[228].mxu0 %vm10523_vm9, %v9375_v40  ;;  %6181 = vmatprep.mubr.msk.bf16.mxu1 %vm10473_vm10, %v9434_v8  ;;  %v3943_v40 = vld [vmem:[#allocation2 + $0x68] sm:$0xff]  ;;  %vm10525_vm9 = vnez %v10292_v45  ;;  %vm10526_vm10 = vnez %v10488_v31  ;;  %v3948_v45 = vld [vmem:[#allocation2 + $0x90] sm:$0xff] }
 0x32e   : > { %5337 = vmatprep.mubr.bf16.mxu0 %v3969_v24  ;;  %7227 = vmatpush3.bf16.msra.mxu1 %v7502_v2  ;;  %v3971_v8 = vpack.c.bf16 %v3944_v32, %v3943_v40  ;;  %v10537_v32 = vld [vmem:[#allocation42_spill] sm:$0xff] }
 0x32f   : > { %7228 = vmatprep.subr.bf16.mxu1 %v7503_v1 }
 0x332   : > { %7229 = vmatpush3.bf16.msra.mxu1 %v7503_v1 }
 0x333   : > { %7230 = vmatprep.subr.bf16.mxu1 %v7504_v61 }
 0x334   : > { %5185 = vmatmul.mubr.bf16.gmra.mrb[204].mxu1 %v3969_v24  ;;  %v3959_v24 = vld [vmem:[#allocation2 + $0xe8] sm:$0xff] }
 0x335   : > { %6196 = vmatmul.mubr.msk.bf16.gmra.mrb[232].mxu0 %vm10524_vm2, %v9396_v3  ;;  %6182 = vmatprep.mubr.msk.bf16.mxu1 %vm10474_vm8, %v9456_v14  ;;  %v3945_v3 = vld [vmem:[#allocation2 + $0x78] sm:$0xff]  ;;  %vm10527_vm2 = vnez %v10302_v22  ;;  %v3950_v22 = vld [vmem:[#allocation2 + $0xa0] sm:$0xff]  ;;  %v3979_v59 = vpack.c.bf16 %v3960_v16, %v3959_v24 }
 0x336   : > { %5345 = vmatprep.mubr.bf16.mxu0 %v3970_v21  ;;  %7231 = vmatpush3.bf16.msra.mxu1 %v7504_v61  ;;  %v3972_v14 = vpack.c.bf16 %v3946_v4, %v3945_v3 }
 0x337   : > { %7232 = vmatprep.subr.bf16.mxu1 %v7505_v62 }
 0x33a   : > { %7233 = vmatpush3.bf16.msra.mxu1 %v7505_v62  ;;  %v10534_v62 = vld [vmem:[#allocation35_spill] sm:$0xff] }
 0x33c   : > { %5193 = vmatmul.mubr.bf16.gmra.mrb[208].mxu1 %v3970_v21  ;;  %v10535_v21 = vld [vmem:[#allocation31_spill] sm:$0xff] }
 0x33d   : > { %6197 = vmatmul.mubr.msk.bf16.gmra.mrb[236].mxu0 %vm10525_vm9, %v9418_v13  ;;  %6183 = vmatprep.mubr.msk.bf16.mxu1 %vm10526_vm10, %v9475_v63  ;;  %v3947_v13 = vld [vmem:[#allocation2 + $0x88] sm:$0xff]  ;;  %vm10528_vm9 = vnez %v10483_v52  ;;  %v3952_v52 = vld [vmem:[#allocation2 + $0xb0] sm:$0xff] }
 0x33e   : > { %5353 = vmatprep.mubr.bf16.mxu0 %v3971_v8  ;;  %v3973_v49 = vpack.c.bf16 %v3948_v45, %v3947_v13  ;;  %v3962_v13 = vld [vmem:[#allocation2 + $0x100] sm:$0xff] }
 0x344   : > { %5201 = vmatmul.mubr.bf16.gmra.mrb[212].mxu1 %v3971_v8 }
 0x345   : > { %6198 = vmatmul.mubr.msk.bf16.gmra.mrb[240].mxu0 %vm10527_vm2, %v9440_v44  ;;  %6184 = vmatprep.mubr.msk.bf16.mxu1 %vm10476_vm12, %v9489_v5  ;;  %v3949_v44 = vld [vmem:[#allocation2 + $0x98] sm:$0xff]  ;;  %vm10529_vm2 = vnez %v10486_v57  ;;  %v3954_v57 = vld [vmem:[#allocation2 + $0xc0] sm:$0xff] }
 0x346   : > { %5361 = vmatprep.mubr.bf16.mxu0 %v3972_v14  ;;  %v3974_v63 = vpack.c.bf16 %v3950_v22, %v3949_v44 }
 0x34c   : > { %5209 = vmatmul.mubr.bf16.gmra.mrb[216].mxu1 %v3972_v14 }
 0x34d   : > { %6199 = vmatmul.mubr.msk.bf16.gmra.mrb[244].mxu0 %vm10528_vm9, %v9462_v27  ;;  %6185 = vmatprep.mubr.msk.bf16.mxu1 %vm10477_vm13, %v9503_v41  ;;  %v3951_v27 = vld [vmem:[#allocation2 + $0xa8] sm:$0xff]  ;;  %vm10530_vm9 = vnez %v10489_v60  ;;  %v3956_v60 = vld [vmem:[#allocation2 + $0xd0] sm:$0xff] }
 0x34e   : > { %5369 = vmatprep.mubr.bf16.mxu0 %v3973_v49  ;;  %v3975_v5 = vpack.c.bf16 %v3952_v52, %v3951_v27 }
 0x354   : > { %5217 = vmatmul.mubr.bf16.gmra.mrb[220].mxu1 %v3973_v49 }
 0x355   : > { %6200 = vmatmul.mubr.msk.bf16.gmra.mrb[248].mxu0 %vm10529_vm2, %v9480_v35  ;;  %6186 = vmatprep.mubr.msk.bf16.mxu1 %vm10451_vm11, %v9517_v29  ;;  %v3953_v35 = vld [vmem:[#allocation2 + $0xb8] sm:$0xff]  ;;  %vm10531_vm2 = vnez %v10492_v42  ;;  %v3958_v42 = vld [vmem:[#allocation2 + $0xe0] sm:$0xff] }
 0x356   : > { %5377 = vmatprep.mubr.bf16.mxu0 %v3974_v63  ;;  %v3976_v41 = vpack.c.bf16 %v3954_v57, %v3953_v35 }
 0x35c   : > { %5225 = vmatmul.mubr.bf16.gmra.mrb[224].mxu1 %v3974_v63 }
 0x35d   : > { %6201 = vmatmul.mubr.msk.bf16.gmra.mrb[252].mxu0 %vm10530_vm9, %v9494_v53  ;;  %6187 = vmatprep.mubr.msk.bf16.mxu1 %vm10453_vm6, %v9531_v48  ;;  %v3955_v53 = vld [vmem:[#allocation2 + $0xc8] sm:$0xff]  ;;  %vm10532_vm9 = vnez %v10495_v17  ;;  %v9682_v17 = vld [vmem:[#allocation12] ss:$0 sm:$0xff] }
 0x35e   : > { %5385 = vmatprep.mubr.bf16.mxu0 %v3975_v5  ;;  %v3977_v29 = vpack.c.bf16 %v3956_v60, %v3955_v53  ;;  %v4841_v2 = vadd.f32 %v9542_v56, %v9682_v17  ;;  %v10538_v56 = vld [vmem:[#allocation40_spill] sm:$0xff]  ;;  %v10540_v53 = vld [vmem:[#allocation38_spill] sm:$0xff] }
 0x364   : > { %5233 = vmatmul.mubr.bf16.gmra.mrb[228].mxu1 %v3975_v5  ;;  %v3961_v5 = vld [vmem:[#allocation2 + $0xf8] sm:$0xff] }
 0x365   : > { %6202 = vmatmul.mubr.msk.bf16.gmra.mrb[0].mxu0 %vm10531_vm2, %v9508_v36  ;;  %6188 = vmatprep.mubr.msk.bf16.mxu1 %vm8799_vm4, %v9549_v55  ;;  %v3957_v36 = vld [vmem:[#allocation2 + $0xd8] sm:$0xff]  ;;  %vm10533_vm2 = vnez %v10498_v23  ;;  %v3980_v60 = vpack.c.bf16 %v3962_v13, %v3961_v5  ;;  %v3999_v5 = vld [vmem:[#allocation2 + $0x29] sm:$0xff] }
 0x366   : > { %5393 = vmatprep.mubr.bf16.mxu0 %v3976_v41  ;;  %v3978_v48 = vpack.c.bf16 %v3958_v42, %v3957_v36 }
 0x36c   : > { %5241 = vmatmul.mubr.bf16.gmra.mrb[232].mxu1 %v3976_v41 }
 0x36d   : > { %6203 = vmatmul.mubr.msk.bf16.gmra.mrb[4].mxu0 %vm10532_vm9, %v9522_v39  ;;  %6189 = vmatprep.mubr.msk.bf16.mxu1 %vm8805_vm5, %v9563_v34  ;;  %vm10536_vm9 = vnez %v10535_v21 }
 0x36e   : > { %5401 = vmatprep.mubr.bf16.mxu0 %v3977_v29 }
 0x374   : > { %5249 = vmatmul.mubr.bf16.gmra.mrb[236].mxu1 %v3977_v29  ;;  %v10541_v29 = vld [vmem:[#allocation34_spill] sm:$0xff] }
 0x375   : > { %6204 = vmatmul.mubr.msk.bf16.gmra.mrb[8].mxu0 %vm10533_vm2, %v9536_v12  ;;  %6190 = vmatprep.mubr.msk.bf16.mxu1 %vm8874_vm3, %v9577_v26  ;;  %v4844_v26 = vadd.f32 %v9547_v47, %v9682_v17  ;;  %vm10539_vm2 = vnez %v10538_v56 }
 0x376   : > { %5409 = vmatprep.mubr.bf16.mxu0 %v3978_v48 }
 0x377   : > { %v6720_v39 = vpop.f32.mrb[132].mxu1 }
 0x378   : > { %v6826_v55 = vpop.f32.mrb[160].mxu0  ;;  %v6721_v46 = vpop.f32.mrb[133].mxu1 }
 0x379   : > { %v6722_v34 = vadd.f32 %v6721_v46, %v6720_v39  ;;  %v6827_v6 = vpop.f32.mrb[161].mxu0  ;;  %v6723_v54 = vpop.f32.mrb[134].mxu1  ;;  %v3805_v46 = vld [vmem:[#allocation2 + $0x109] sm:$0xff] }
 0x37a   : > { %v6828_v30 = vadd.f32 %v6827_v6, %v6826_v55  ;;  %v6829_v23 = vpop.f32.mrb[162].mxu0  ;;  %v6724_v12 = vpop.f32.mrb[135].mxu1 }
 0x37b   : > { %v6725_v19 = vadd.f32 %v6724_v12, %v6723_v54  ;;  %v6830_v1 = vpop.f32.mrb[163].mxu0  ;;  %v4849_v49 = vadd.f32 %v6722_v34, %v9682_v17  ;;  %v3806_v34 = vld [vmem:[#allocation2 + $0x111] sm:$0xff] }
 0x37c   : > { %v9688_v61 = vadd.f32 %v6828_v30, %v4841_v2  ;;  %v6831_v37 = vadd.f32 %v6830_v1, %v6829_v23  ;;  %5257 = vmatmul.mubr.bf16.gmra.mrb[240].mxu1 %v3978_v48  ;;  %v3964_v2 = vld [vmem:[#allocation2 + $0x110] sm:$0xff] }
 0x37d   : > { %6205 = vmatmul.mubr.msk.bf16.gmra.mrb[12].mxu0 %vm10536_vm9, %v10534_v62  ;;  %6191 = vmatprep.mubr.msk.bf16.mxu1 %vm10539_vm2, %v10537_v32  ;;  %v4852_v57 = vadd.f32 %v6725_v19, %v9682_v17  ;;  %vm10542_vm9 = vnez %v10541_v29  ;;  %v10544_v32 = vld [vmem:[#allocation39_spill] sm:$0xff] }
 0x37e   : > { %v9696_v40 = vadd.f32 %v6831_v37, %v4844_v26  ;;  %5417 = vmatprep.mubr.bf16.mxu0 %v3979_v59  ;;  %v3963_v26 = vld [vmem:[#allocation2 + $0x108] sm:$0xff] }
 0x37f   : > { %v6726_v8 = vpop.f32.mrb[136].mxu1  ;;  %v3981_v21 = vpack.c.bf16 %v3964_v2, %v3963_v26 }
 0x380   : > { %v6832_v4 = vpop.f32.mrb[164].mxu0  ;;  %v6727_v3 = vpop.f32.mrb[137].mxu1 }
 0x381   : > { %v6728_v47 = vadd.f32 %v6727_v3, %v6726_v8  ;;  %v6833_v14 = vpop.f32.mrb[165].mxu0  ;;  %v6729_v45 = vpop.f32.mrb[138].mxu1  ;;  %v10545_v8 = vld [vmem:[#allocation36_spill] sm:$0xff] }
 0x382   : > { %v6834_v22 = vadd.f32 %v6833_v14, %v6832_v4  ;;  %v6835_v44 = vpop.f32.mrb[166].mxu0  ;;  %v6730_v63 = vpop.f32.mrb[139].mxu1 }
 0x383   : > { %v6731_v52 = vadd.f32 %v6730_v63, %v6729_v45  ;;  %v6836_v27 = vpop.f32.mrb[167].mxu0  ;;  %v4857_v30 = vadd.f32 %v6728_v47, %v9682_v17  ;;  %v4000_v45 = vld [vmem:[#allocation2 + $0x31] sm:$0xff] }
 0x384   : > { %v9700_v35 = vadd.f32 %v6834_v22, %v4849_v49  ;;  %v6837_v41 = vadd.f32 %v6836_v27, %v6835_v44  ;;  %5265 = vmatmul.mubr.bf16.gmra.mrb[244].mxu1 %v3979_v59  ;;  %v4031_v29 = vpack.c.bf16 %v4000_v45, %v3999_v5 }
 0x385   : > { %6206 = vmatmul.mubr.msk.bf16.gmra.mrb[16].mxu0 %vm10542_vm9, %v10540_v53  ;;  %6192 = vmatprep.mubr.msk.bf16.mxu1 %vm10520_vm1, %v9607_v9  ;;  %v9711_v9 = vpack.c.bf16 %v3806_v34, %v3805_v46  ;;  %v4860_v37 = vadd.f32 %v6731_v52, %v9682_v17  ;;  %vm10546_vm9 = vnez %v10545_v8  ;;  %v10547_v46 = vld [vmem:[#allocation41_spill] sm:$0xff] }
 0x386   : > { %v9708_v36 = vadd.f32 %v6837_v41, %v4852_v57  ;;  %5425 = vmatprep.mubr.bf16.mxu0 %v3980_v60  ;;  %v7507_v57 = vld [vmem:[#allocation2 + $0x8] sm:$0xff] }
 0x387   : > { %v6732_v48 = vpop.f32.mrb[140].mxu1  ;;  %v3982_v41 = vpack.c.bf16 %v7507_v57, %v7507_v57  ;;  %v4008_v57 = vld [vmem:[#allocation2 + $0x71] sm:$0xff] }
 0x388   : > { %v6838_v39 = vpop.f32.mrb[168].mxu0  ;;  %v6733_v55 = vpop.f32.mrb[141].mxu1 }
 0x389   : > { %v6734_v6 = vadd.f32 %v6733_v55, %v6732_v48  ;;  %v6839_v54 = vpop.f32.mrb[169].mxu0  ;;  %v6735_v16 = vpop.f32.mrb[142].mxu1 }
 0x38a   : > { %v6840_v23 = vadd.f32 %v6839_v54, %v6838_v39  ;;  %v6841_v12 = vpop.f32.mrb[170].mxu0  ;;  %v6736_v19 = vpop.f32.mrb[143].mxu1  ;;  %v4001_v54 = vld [vmem:[#allocation2 + $0x39] sm:$0xff] }
 0x38b   : > { %v6737_v1 = vadd.f32 %v6736_v19, %v6735_v16  ;;  %v6842_v24 = vpop.f32.mrb[171].mxu0  ;;  %v4865_v44 = vadd.f32 %v6734_v6, %v9682_v17  ;;  %v4002_v16 = vld [vmem:[#allocation2 + $0x41] sm:$0xff]  ;;  %v4004_v19 = vld [vmem:[#allocation2 + $0x51] sm:$0xff] }
 0x38c   : > { %v9714_v59 = vadd.f32 %v6840_v23, %v4857_v30  ;;  %v6843_v62 = vadd.f32 %v6842_v24, %v6841_v12  ;;  %5273 = vmatmul.mubr.bf16.gmra.mrb[248].mxu1 %v3980_v60  ;;  %v3885_v23 = vld [vmem:[#allocation2 + $0x117] sm:$0xff]  ;;  %v3886_v12 = vld [vmem:[#allocation2 + $0x11f] sm:$0xff] }
 0x38d   : > { %6207 = vmatmul.mubr.msk.bf16.gmra.mrb[20].mxu0 %vm10546_vm9, %v10544_v32  ;;  %6193 = vmatprep.mubr.msk.bf16.mxu1 %vm10522_vm0, %v9711_v9  ;;  %v4868_v48 = vadd.f32 %v6737_v1, %v9682_v17  ;;  %vm10548_vm9 = vnez %v10547_v46  ;;  %v4003_v32 = vld [vmem:[#allocation2 + $0x49] sm:$0xff] }
 0x38e   : > { %v9722_v4 = vadd.f32 %v6843_v62, %v4860_v37  ;;  %5433 = vmatprep.mubr.bf16.mxu0 %v3981_v21  ;;  %v4007_v46 = vld [vmem:[#allocation2 + $0x69] sm:$0xff] }
 0x38f   : > { %v6738_v3 = vpop.f32.mrb[144].mxu1 }
 0x390   : > { %v6844_v47 = vpop.f32.mrb[172].mxu0  ;;  %v6739_v14 = vpop.f32.mrb[145].mxu1 }
 0x391   : > { %v6740_v13 = vadd.f32 %v6739_v14, %v6738_v3  ;;  %v6845_v49 = vpop.f32.mrb[173].mxu0  ;;  %v6741_v22 = vpop.f32.mrb[146].mxu1  ;;  %v4033_v14 = vpack.c.bf16 %v4004_v19, %v4003_v32  ;;  %v4009_v19 = vld [vmem:[#allocation2 + $0x79] sm:$0xff] }
 0x392   : > { %v6846_v63 = vadd.f32 %v6845_v49, %v6844_v47  ;;  %v6847_v52 = vpop.f32.mrb[174].mxu0  ;;  %v6742_v27 = vpop.f32.mrb[147].mxu1  ;;  %v3902_v47 = vpack.c.bf16 %v3886_v12, %v3885_v23 }
 0x393   : > { %v6743_v60 = vadd.f32 %v6742_v27, %v6741_v22  ;;  %v6848_v53 = vpop.f32.mrb[175].mxu0  ;;  %v4873_v37 = vadd.f32 %v6740_v13, %v9682_v17 }
 0x394   : > { %v9726_v39 = vadd.f32 %v6846_v63, %v4865_v44  ;;  %v6849_v55 = vadd.f32 %v6848_v53, %v6847_v52  ;;  %5281 = vmatmul.mubr.bf16.gmra.mrb[252].mxu1 %v3981_v21  ;;  %v4032_v21 = vpack.c.bf16 %v4002_v16, %v4001_v54  ;;  %v4005_v63 = vld [vmem:[#allocation2 + $0x59] sm:$0xff]  ;;  %v4006_v52 = vld [vmem:[#allocation2 + $0x61] sm:$0xff]  ;;  %v4035_v54 = vpack.c.bf16 %v4008_v57, %v4007_v46 }
 0x395   : > { %6208 = vmatmul.mubr.msk.bf16.gmra.mrb[24].mxu0 %vm10548_vm9, %v9596_v20  ;;  %7234 = vmatprep.mubr.msk.bf16.mxu1 %vm8105_vm15, %v4031_v29  ;;  %v4876_v45 = vadd.f32 %v6743_v60, %v9682_v17  ;;  %vm10549_vm15 = vnez %v10517_v38  ;;  %v4014_v57 = vld [vmem:[#allocation2 + $0xa1] sm:$0xff] }
 0x396   : > { %v9733_v34 = vadd.f32 %v6849_v55, %v4868_v48  ;;  %5441 = vmatprep.mubr.bf16.mxu0 %v3982_v41  ;;  %v4034_v55 = vpack.c.bf16 %v4006_v52, %v4005_v63 }
 0x397   : > { %v6744_v6 = vpop.f32.mrb[148].mxu1 }
 0x398   : > { %v6850_v2 = vpop.f32.mrb[176].mxu0  ;;  %v6745_v30 = vpop.f32.mrb[149].mxu1 }
 0x399   : > { %v6746_v1 = vadd.f32 %v6745_v30, %v6744_v6  ;;  %v6851_v24 = vpop.f32.mrb[177].mxu0  ;;  %v6747_v26 = vpop.f32.mrb[150].mxu1 }
 0x39a   : > { %v6852_v20 = vadd.f32 %v6851_v24, %v6850_v2  ;;  %v6853_v62 = vpop.f32.mrb[178].mxu0  ;;  %v6748_v18 = vpop.f32.mrb[151].mxu1 }
 0x39b   : > { %v6749_v8 = vadd.f32 %v6748_v18, %v6747_v26  ;;  %v6854_v3 = vpop.f32.mrb[179].mxu0  ;;  %v4881_v7 = vadd.f32 %v6746_v1, %v9682_v17  ;;  %v4010_v1 = vld [vmem:[#allocation2 + $0x81] sm:$0xff] }
 0x39c   : > { %v9737_v49 = vadd.f32 %v6852_v20, %v4873_v37  ;;  %v6855_v22 = vadd.f32 %v6854_v3, %v6853_v62  ;;  %7235 = vmatmul.mubr.msk.bf16.vlgmr.msra.gmra.mrb[0].mxu1 %vm8179_vm7, %v4032_v21  ;;  %vm10550_vm7 = vnez %v10298_v11  ;;  %v4012_v37 = vld [vmem:[#allocation2 + $0x91] sm:$0xff]  ;;  %v4036_v3 = vpack.c.bf16 %v4010_v1, %v4009_v19 }
 0x39d   : > { %6209 = vmatmul.mubr.msk.bf16.gmra.mrb[28].mxu0 %vm10549_vm15, %v3902_v47  ;;  %7238 = vmatprep.mubr.msk.bf16.mxu1 %vm10472_vm14, %v4033_v14  ;;  %v4884_v16 = vadd.f32 %v6749_v8, %v9682_v17  ;;  %v4011_v47 = vld [vmem:[#allocation2 + $0x89] sm:$0xff] }
 0x39e   : > { %v9745_v13 = vadd.f32 %v6855_v22, %v4876_v45  ;;  %v4037_v45 = vpack.c.bf16 %v4012_v37, %v4011_v47  ;;  %v4018_v37 = vld [vmem:[#allocation2 + $0xc1] sm:$0xff] }
 0x39f   : > { %v6750_v44 = vpop.f32.mrb[152].mxu1 }
 0x3a0   : > { %v6856_v27 = vpop.f32.mrb[180].mxu0  ;;  %v6751_v5 = vpop.f32.mrb[153].mxu1 }
 0x3a1   : > { %v6752_v41 = vadd.f32 %v6751_v5, %v6750_v44  ;;  %v6857_v60 = vpop.f32.mrb[181].mxu0  ;;  %v6753_v53 = vpop.f32.mrb[154].mxu1  ;;  %v4013_v5 = vld [vmem:[#allocation2 + $0x99] sm:$0xff] }
 0x3a2   : > { %v6858_v29 = vadd.f32 %v6857_v60, %v6856_v27  ;;  %v6859_v48 = vpop.f32.mrb[182].mxu0  ;;  %v6754_v38 = vpop.f32.mrb[155].mxu1 }
 0x3a3   : > { %v6755_v50 = vadd.f32 %v6754_v38, %v6753_v53  ;;  %v6860_v6 = vpop.f32.mrb[183].mxu0  ;;  %v4889_v21 = vadd.f32 %v6752_v41, %v9682_v17  ;;  %v4016_v53 = vld [vmem:[#allocation2 + $0xb1] sm:$0xff] }
 0x3a4   : > { %v9749_v2 = vadd.f32 %v6858_v29, %v4881_v7  ;;  %v6861_v30 = vadd.f32 %v6860_v6, %v6859_v48  ;;  %7239 = vmatmul.mubr.msk.bf16.gmra.mrb[4].mxu1 %vm10550_vm7, %v4034_v55  ;;  %v4015_v6 = vld [vmem:[#allocation2 + $0xa9] sm:$0xff] }
 0x3a5   : > { %7242 = vmatprep.mubr.msk.bf16.mxu1 %vm10474_vm8, %v4035_v54  ;;  %v4892_v22 = vadd.f32 %v6755_v50, %v9682_v17  ;;  %v4038_v50 = vpack.c.bf16 %v4014_v57, %v4013_v5 }
 0x3a6   : > { %v9755_v23 = vadd.f32 %v6861_v30, %v4884_v16  ;;  %v4039_v16 = vpack.c.bf16 %v4016_v53, %v4015_v6  ;;  %v4022_v53 = vld [vmem:[#allocation2 + $0xe1] sm:$0xff] }
 0x3a7   : > { %v6756_v12 = vpop.f32.mrb[156].mxu1 }
 0x3a8   : > { %v6862_v24 = vpop.f32.mrb[184].mxu0  ;;  %v6757_v26 = vpop.f32.mrb[157].mxu1 }
 0x3a9   : > { %v6758_v20 = vadd.f32 %v6757_v26, %v6756_v12  ;;  %v6863_v62 = vpop.f32.mrb[185].mxu0  ;;  %v6759_v18 = vpop.f32.mrb[158].mxu1  ;;  %v4017_v26 = vld [vmem:[#allocation2 + $0xb9] sm:$0xff] }
 0x3aa   : > { %v6864_v32 = vadd.f32 %v6863_v62, %v6862_v24  ;;  %v6865_v8 = vpop.f32.mrb[186].mxu0  ;;  %v6760_v11 = vpop.f32.mrb[159].mxu1 }
 0x3ab   : > { %v6761_v28 = vadd.f32 %v6760_v11, %v6759_v18  ;;  %v6866_v14 = vpop.f32.mrb[187].mxu0  ;;  %v4897_v38 = vadd.f32 %v6758_v20, %v9682_v17  ;;  %v4020_v18 = vld [vmem:[#allocation2 + $0xd1] sm:$0xff] }
 0x3ac   : > { %v9759_v44 = vadd.f32 %v6864_v32, %v4889_v21  ;;  %v6867_v63 = vadd.f32 %v6866_v14, %v6865_v8  ;;  %7243 = vmatmul.mubr.msk.bf16.gmra.mrb[8].mxu1 %vm10526_vm10, %v4036_v3  ;;  %v4019_v14 = vld [vmem:[#allocation2 + $0xc9] sm:$0xff] }
 0x3ad   : > { %7246 = vmatprep.mubr.msk.bf16.mxu1 %vm10476_vm12, %v4037_v45  ;;  %v4900_v30 = vadd.f32 %v6761_v28, %v9682_v17  ;;  %v4040_v28 = vpack.c.bf16 %v4018_v37, %v4017_v26 }
 0x3ae   : > { %v9765_v52 = vadd.f32 %v6867_v63, %v4892_v22  ;;  %v4041_v22 = vpack.c.bf16 %v4020_v18, %v4019_v14  ;;  %v4026_v18 = vld [vmem:[#allocation2 + $0x101] sm:$0xff] }
 0x3af   : > { %v6762_v27 = vpop.f32.mrb[160].mxu1 }
 0x3b0   : > { %v6868_v41 = vpop.f32.mrb[188].mxu0  ;;  %v6763_v60 = vpop.f32.mrb[161].mxu1 }
 0x3b1   : > { %v6764_v7 = vadd.f32 %v6763_v60, %v6762_v27  ;;  %v6869_v29 = vpop.f32.mrb[189].mxu0  ;;  %v6765_v48 = vpop.f32.mrb[162].mxu1  ;;  %v4021_v60 = vld [vmem:[#allocation2 + $0xd9] sm:$0xff] }
 0x3b2   : > { %v6870_v55 = vadd.f32 %v6869_v29, %v6868_v41  ;;  %v6871_v46 = vpop.f32.mrb[190].mxu0  ;;  %v6766_v31 = vpop.f32.mrb[163].mxu1 }
 0x3b3   : > { %v6767_v58 = vadd.f32 %v6766_v31, %v6765_v48  ;;  %v6872_v54 = vpop.f32.mrb[191].mxu0  ;;  %v4905_v11 = vadd.f32 %v6764_v7, %v9682_v17  ;;  %v4024_v48 = vld [vmem:[#allocation2 + $0xf1] sm:$0xff] }
 0x3b4   : > { %v9769_v12 = vadd.f32 %v6870_v55, %v4897_v38  ;;  %v6873_v19 = vadd.f32 %v6872_v54, %v6871_v46  ;;  %7247 = vmatmul.mubr.msk.bf16.gmra.mrb[12].mxu1 %vm10477_vm13, %v4038_v50  ;;  %v4023_v54 = vld [vmem:[#allocation2 + $0xe9] sm:$0xff] }
 0x3b5   : > { %7250 = vmatprep.mubr.msk.bf16.mxu1 %vm10451_vm11, %v4039_v16  ;;  %v4908_v63 = vadd.f32 %v6767_v58, %v9682_v17  ;;  %v4042_v58 = vpack.c.bf16 %v4022_v53, %v4021_v60 }
 0x3b6   : > { %v9775_v1 = vadd.f32 %v6873_v19, %v4900_v30  ;;  %v4043_v30 = vpack.c.bf16 %v4024_v48, %v4023_v54 }
 0x3b7   : > { %v6768_v24 = vpop.f32.mrb[164].mxu1 }
 0x3b8   : > { %v6874_v20 = vpop.f32.mrb[192].mxu0  ;;  %v6769_v62 = vpop.f32.mrb[165].mxu1 }
 0x3b9   : > { %v6770_v21 = vadd.f32 %v6769_v62, %v6768_v24  ;;  %v6875_v32 = vpop.f32.mrb[193].mxu0  ;;  %v6771_v8 = vpop.f32.mrb[166].mxu1  ;;  %v4025_v62 = vld [vmem:[#allocation2 + $0xf9] sm:$0xff] }
 0x3ba   : > { %v6876_v3 = vadd.f32 %v6875_v32, %v6874_v20  ;;  %v6877_v47 = vpop.f32.mrb[194].mxu0  ;;  %v6772_v33 = vpop.f32.mrb[167].mxu1  ;;  %v4044_v10 = vpack.c.bf16 %v4026_v18, %v4025_v62 }
 0x3bb   : > { %v6773_v43 = vadd.f32 %v6772_v33, %v6771_v8  ;;  %v6878_v45 = vpop.f32.mrb[195].mxu0  ;;  %v4913_v31 = vadd.f32 %v6770_v21, %v9682_v17 }
 0x3bc   : > { %v9779_v27 = vadd.f32 %v6876_v3, %v4905_v11  ;;  %v6879_v5 = vadd.f32 %v6878_v45, %v6877_v47  ;;  %7251 = vmatmul.mubr.msk.bf16.gmra.mrb[16].mxu1 %vm10453_vm6, %v4040_v28 }
 0x3bd   : > { %7254 = vmatprep.mubr.msk.bf16.mxu1 %vm8799_vm4, %v4041_v22  ;;  %v4916_v19 = vadd.f32 %v6773_v43, %v9682_v17 }
 0x3be   : > { %v9785_v57 = vadd.f32 %v6879_v5, %v4908_v63  ;;  %v4029_v5 = vld [vmem:[#allocation2 + $0x119] sm:$0xff] }
 0x3bf   : > { %v6774_v41 = vpop.f32.mrb[168].mxu1 }
 0x3c0   : > { %v6880_v7 = vpop.f32.mrb[196].mxu0  ;;  %v6775_v29 = vpop.f32.mrb[169].mxu1 }
 0x3c1   : > { %v6776_v38 = vadd.f32 %v6775_v29, %v6774_v41  ;;  %v6881_v55 = vpop.f32.mrb[197].mxu0  ;;  %v6777_v46 = vpop.f32.mrb[170].mxu1  ;;  %v4030_v41 = vld [vmem:[#allocation2 + $0x121] sm:$0xff] }
 0x3c2   : > { %v6882_v50 = vadd.f32 %v6881_v55, %v6880_v7  ;;  %v6883_v6 = vpop.f32.mrb[198].mxu0  ;;  %v6778_v15 = vpop.f32.mrb[171].mxu1  ;;  %v4046_v48 = vpack.c.bf16 %v4030_v41, %v4029_v5 }
 0x3c3   : > { %v6779_v51 = vadd.f32 %v6778_v15, %v6777_v46  ;;  %v6884_v16 = vpop.f32.mrb[199].mxu0  ;;  %v4921_v47 = vadd.f32 %v6776_v38, %v9682_v17 }
 0x3c4   : > { %v9789_v24 = vadd.f32 %v6882_v50, %v4913_v31  ;;  %v6885_v26 = vadd.f32 %v6884_v16, %v6883_v6  ;;  %7255 = vmatmul.mubr.msk.bf16.gmra.mrb[20].mxu1 %vm8805_vm5, %v4042_v58 }
 0x3c5   : > { %7258 = vmatprep.mubr.msk.bf16.mxu1 %vm8874_vm3, %v4043_v30  ;;  %v4924_v0 = vadd.f32 %v6779_v51, %v9682_v17 }
 0x3c6   : > { %v9795_v37 = vadd.f32 %v6885_v26, %v4916_v19 }
 0x3c7   : > { %v6780_v20 = vpop.f32.mrb[172].mxu1 }
 0x3c8   : > { %v6886_v21 = vpop.f32.mrb[200].mxu0  ;;  %v6781_v32 = vpop.f32.mrb[173].mxu1 }
 0x3c9   : > { %v6782_v8 = vadd.f32 %v6781_v32, %v6780_v20  ;;  %v6887_v11 = vpop.f32.mrb[201].mxu0  ;;  %v6783_v3 = vpop.f32.mrb[174].mxu1 }
 0x3ca   : > { %v6888_v33 = vadd.f32 %v6887_v11, %v6886_v21  ;;  %v6889_v28 = vpop.f32.mrb[202].mxu0  ;;  %v6784_v14 = vpop.f32.mrb[175].mxu1 }
 0x3cb   : > { %v6785_v43 = vadd.f32 %v6784_v14, %v6783_v3  ;;  %v6890_v45 = vpop.f32.mrb[203].mxu0  ;;  %v4929_v31 = vadd.f32 %v6782_v8, %v9682_v17 }
 0x3cc   : > { %v9799_v22 = vadd.f32 %v6888_v33, %v4921_v47  ;;  %v6891_v63 = vadd.f32 %v6890_v45, %v6889_v28  ;;  %7259 = vmatmul.mubr.msk.bf16.gmra.mrb[24].mxu1 %vm10539_vm2, %v4044_v10 }
 0x3cd   : > { %7262 = vmatprep.mubr.msk.bf16.mxu1 %vm10520_vm1, %v9711_v9  ;;  %v4932_v42 = vadd.f32 %v6785_v43, %v9682_v17 }
 0x3ce   : > { %v9806_v60 = vadd.f32 %v6891_v63, %v4924_v0 }
 0x3cf   : > { %v6786_v53 = vpop.f32.mrb[176].mxu1 }
 0x3d0   : > { %v6892_v7 = vpop.f32.mrb[204].mxu0  ;;  %v6787_v29 = vpop.f32.mrb[177].mxu1 }
 0x3d1   : > { %v6788_v38 = vadd.f32 %v6787_v29, %v6786_v53  ;;  %v6893_v55 = vpop.f32.mrb[205].mxu0  ;;  %v6789_v46 = vpop.f32.mrb[178].mxu1 }
 0x3d2   : > { %v6894_v50 = vadd.f32 %v6893_v55, %v6892_v7  ;;  %v6895_v56 = vpop.f32.mrb[206].mxu0  ;;  %v6790_v6 = vpop.f32.mrb[179].mxu1 }
 0x3d3   : > { %v6791_v15 = vadd.f32 %v6790_v6, %v6789_v46  ;;  %v6896_v58 = vpop.f32.mrb[207].mxu0  ;;  %v4937_v18 = vadd.f32 %v6788_v38, %v9682_v17 }
 0x3d4   : > { %v9810_v9 = vadd.f32 %v6894_v50, %v4929_v31  ;;  %v6897_v54 = vadd.f32 %v6896_v58, %v6895_v56  ;;  %7263 = vmatmul.mubr.msk.bf16.gmra.mrb[28].mxu1 %vm10522_vm0, %v4046_v48 }
 0x3d5   : > { %v4940_v47 = vadd.f32 %v6791_v15, %v9682_v17 }
 0x3d6   : > { %v9814_v51 = vadd.f32 %v6897_v54, %v4932_v42 }
 0x3d7   : > { %v6792_v16 = vpop.f32.mrb[180].mxu1 }
 0x3d8   : > { %v6898_v30 = vpop.f32.mrb[208].mxu0  ;;  %v6793_v19 = vpop.f32.mrb[181].mxu1 }
 0x3d9   : > { %v6794_v26 = vadd.f32 %v6793_v19, %v6792_v16  ;;  %v6899_v20 = vpop.f32.mrb[209].mxu0  ;;  %v6795_v62 = vpop.f32.mrb[182].mxu1 }
 0x3da   : > { %v6900_v21 = vadd.f32 %v6899_v20, %v6898_v30  ;;  %v6901_v32 = vpop.f32.mrb[210].mxu0  ;;  %v6796_v8 = vpop.f32.mrb[183].mxu1 }
 0x3db   : > { %v6797_v11 = vadd.f32 %v6796_v8, %v6795_v62  ;;  %v6902_v3 = vpop.f32.mrb[211].mxu0  ;;  %v4945_v5 = vadd.f32 %v6794_v26, %v9682_v17 }
 0x3dc   : > { %v9818_v33 = vadd.f32 %v6900_v21, %v4937_v18  ;;  %v6903_v25 = vadd.f32 %v6902_v3, %v6901_v32 }
 0x3dd   : > { %v4948_v38 = vadd.f32 %v6797_v11, %v9682_v17 }
 0x3de   : > { %v9820_v28 = vadd.f32 %v6903_v25, %v4940_v47 }
 0x3df   : > { %v6798_v14 = vpop.f32.mrb[184].mxu1 }
 0x3e0   : > { %v6904_v10 = vpop.f32.mrb[212].mxu0  ;;  %v6799_v43 = vpop.f32.mrb[185].mxu1 }
 0x3e1   : > { %v6800_v45 = vadd.f32 %v6799_v43, %v6798_v14  ;;  %v6905_v0 = vpop.f32.mrb[213].mxu0  ;;  %v6801_v63 = vpop.f32.mrb[186].mxu1 }
 0x3e2   : > { %v6906_v41 = vadd.f32 %v6905_v0, %v6904_v10  ;;  %v6907_v53 = vpop.f32.mrb[214].mxu0  ;;  %v6802_v7 = vpop.f32.mrb[187].mxu1 }
 0x3e3   : > { %v6803_v29 = vadd.f32 %v6802_v7, %v6801_v63  ;;  %v6908_v48 = vpop.f32.mrb[215].mxu0  ;;  %v4953_v54 = vadd.f32 %v6800_v45, %v9682_v17 }
 0x3e4   : > { %v9824_v55 = vadd.f32 %v6906_v41, %v4945_v5  ;;  %v6909_v46 = vadd.f32 %v6908_v48, %v6907_v53 }
 0x3e5   : > { %v4956_v62 = vadd.f32 %v6803_v29, %v9682_v17 }
 0x3e6   : > { %v9826_v31 = vadd.f32 %v6909_v46, %v4948_v38 }
 0x3e7   : > { %v6804_v50 = vpop.f32.mrb[188].mxu1 }
 0x3e8   : > { %v6910_v56 = vpop.f32.mrb[216].mxu0  ;;  %v6805_v6 = vpop.f32.mrb[189].mxu1 }
 0x3e9   : > { %v6806_v15 = vadd.f32 %v6805_v6, %v6804_v50  ;;  %v6911_v58 = vpop.f32.mrb[217].mxu0  ;;  %v6807_v42 = vpop.f32.mrb[190].mxu1 }
 0x3ea   : > { %v6912_v16 = vadd.f32 %v6911_v58, %v6910_v56  ;;  %v6913_v30 = vpop.f32.mrb[218].mxu0  ;;  %v6808_v19 = vpop.f32.mrb[191].mxu1 }
 0x3eb   : > { %v6809_v26 = vadd.f32 %v6808_v19, %v6807_v42  ;;  %v6914_v20 = vpop.f32.mrb[219].mxu0  ;;  %v4961_v10 = vadd.f32 %v6806_v15, %v9682_v17 }
 0x3ec   : > { %v9830_v18 = vadd.f32 %v6912_v16, %v4953_v54  ;;  %v6915_v21 = vadd.f32 %v6914_v20, %v6913_v30 }
 0x3ed   : > { %v4964_v53 = vadd.f32 %v6809_v26, %v9682_v17 }
 0x3ee   : > { %v9832_v32 = vadd.f32 %v6915_v21, %v4956_v62 }
 0x3ef   : > { %v6938_v8 = vpop.f32.mrb[192].mxu1 }
 0x3f0   : > { %v6916_v11 = vpop.f32.mrb[220].mxu0  ;;  %v6939_v3 = vpop.f32.mrb[193].mxu1 }
 0x3f1   : > { %v6917_v47 = vpop.f32.mrb[221].mxu0  ;;  %v6940_v25 = vadd.f32 %v6939_v3, %v6938_v8  ;;  %v6941_v14 = vpop.f32.mrb[194].mxu1 }
 0x3f2   : > { %v6918_v43 = vadd.f32 %v6917_v47, %v6916_v11  ;;  %v6919_v45 = vpop.f32.mrb[222].mxu0  ;;  %v6942_v0 = vpop.f32.mrb[195].mxu1 }
 0x3f3   : > { %v5163_v63 = vadd.f32 %v6940_v25, %v9688_v61  ;;  %v6920_v5 = vpop.f32.mrb[223].mxu0  ;;  %v6943_v41 = vadd.f32 %v6942_v0, %v6941_v14 }
 0x3f4   : > { %v9837_v7 = vadd.f32 %v6918_v43, %v4961_v10  ;;  %v6921_v29 = vadd.f32 %v6920_v5, %v6919_v45 }
 0x3f5   : > { %v5166_v48 = vadd.f32 %v6943_v41, %v9696_v40 }
 0x3f6   : > { %v9840_v38 = vadd.f32 %v6921_v29, %v4964_v53 }
 0x3f7   : > { %v6944_v46 = vpop.f32.mrb[196].mxu1 }
 0x3f8   : > { %v7050_v50 = vpop.f32.mrb[224].mxu0  ;;  %v6945_v56 = vpop.f32.mrb[197].mxu1 }
 0x3f9   : > { %v6946_v6 = vadd.f32 %v6945_v56, %v6944_v46  ;;  %v7051_v15 = vpop.f32.mrb[225].mxu0  ;;  %v6947_v58 = vpop.f32.mrb[198].mxu1 }
 0x3fa   : > { %v7052_v42 = vadd.f32 %v7051_v15, %v7050_v50  ;;  %v7053_v54 = vpop.f32.mrb[226].mxu0  ;;  %v6948_v61 = vpop.f32.mrb[199].mxu1 }
 0x3fb   : > { %v5171_v16 = vadd.f32 %v6946_v6, %v9700_v35  ;;  %v6949_v30 = vadd.f32 %v6948_v61, %v6947_v58  ;;  %v7054_v17 = vpop.f32.mrb[227].mxu0 }
 0x3fc   : > { %v7055_v19 = vadd.f32 %v7054_v17, %v7053_v54  ;;  %v9843_v26 = vadd.f32 %v7052_v42, %v5163_v63 }
 0x3fd   : > { %v5174_v40 = vadd.f32 %v6949_v30, %v9708_v36 }
 0x3fe   : > { %v9846_v20 = vadd.f32 %v7055_v19, %v5166_v48 }
 0x3ff   : > { %v6950_v62 = vpop.f32.mrb[200].mxu1 }
 0x400   : > { %v7056_v21 = vpop.f32.mrb[228].mxu0  ;;  %v6951_v8 = vpop.f32.mrb[201].mxu1 }
 0x401   : > { %v6952_v11 = vadd.f32 %v6951_v8, %v6950_v62  ;;  %v7057_v3 = vpop.f32.mrb[229].mxu0  ;;  %v6953_v47 = vpop.f32.mrb[202].mxu1 }
 0x402   : > { %v7058_v25 = vadd.f32 %v7057_v3, %v7056_v21  ;;  %v7059_v14 = vpop.f32.mrb[230].mxu0  ;;  %v6954_v10 = vpop.f32.mrb[203].mxu1 }
 0x403   : > { %v5179_v35 = vadd.f32 %v6952_v11, %v9714_v59  ;;  %v6955_v43 = vadd.f32 %v6954_v10, %v6953_v47  ;;  %v7060_v45 = vpop.f32.mrb[231].mxu0 }
 0x404   : > { %v7061_v0 = vadd.f32 %v7060_v45, %v7059_v14  ;;  %v9849_v63 = vadd.f32 %v7058_v25, %v5171_v16 }
 0x405   : > { %v5182_v36 = vadd.f32 %v6955_v43, %v9722_v4 }
 0x406   : > { %v9852_v5 = vadd.f32 %v7061_v0, %v5174_v40 }
 0x407   : > { %v6956_v41 = vpop.f32.mrb[204].mxu1 }
 0x408   : > { %v7062_v53 = vpop.f32.mrb[232].mxu0  ;;  %v6957_v29 = vpop.f32.mrb[205].mxu1 }
 0x409   : > { %v6958_v48 = vadd.f32 %v6957_v29, %v6956_v41  ;;  %v7063_v46 = vpop.f32.mrb[233].mxu0  ;;  %v6959_v50 = vpop.f32.mrb[206].mxu1 }
 0x40a   : > { %v7064_v56 = vadd.f32 %v7063_v46, %v7062_v53  ;;  %v7065_v6 = vpop.f32.mrb[234].mxu0  ;;  %v6960_v15 = vpop.f32.mrb[207].mxu1 }
 0x40b   : > { %v5187_v59 = vadd.f32 %v6958_v48, %v9726_v39  ;;  %v6961_v58 = vadd.f32 %v6960_v15, %v6959_v50  ;;  %v7066_v42 = vpop.f32.mrb[235].mxu0 }
 0x40c   : > { %v7067_v54 = vadd.f32 %v7066_v42, %v7065_v6  ;;  %v9855_v61 = vadd.f32 %v7064_v56, %v5179_v35 }
 0x40d   : > { %v5190_v4 = vadd.f32 %v6961_v58, %v9733_v34 }
 0x40e   : > { %v9858_v16 = vadd.f32 %v7067_v54, %v5182_v36 }
 0x40f   : > { %v6962_v30 = vpop.f32.mrb[208].mxu1 }
 0x410   : > { %v7068_v17 = vpop.f32.mrb[236].mxu0  ;;  %v6963_v19 = vpop.f32.mrb[209].mxu1 }
 0x411   : > { %v6964_v40 = vadd.f32 %v6963_v19, %v6962_v30  ;;  %v7069_v62 = vpop.f32.mrb[237].mxu0  ;;  %v6965_v21 = vpop.f32.mrb[210].mxu1 }
 0x412   : > { %v7070_v8 = vadd.f32 %v7069_v62, %v7068_v17  ;;  %v7071_v11 = vpop.f32.mrb[238].mxu0  ;;  %v6966_v3 = vpop.f32.mrb[211].mxu1 }
 0x413   : > { %v5195_v39 = vadd.f32 %v6964_v40, %v9737_v49  ;;  %v6967_v47 = vadd.f32 %v6966_v3, %v6965_v21  ;;  %v7072_v25 = vpop.f32.mrb[239].mxu0 }
 0x414   : > { %v7073_v14 = vadd.f32 %v7072_v25, %v7071_v11  ;;  %v9861_v10 = vadd.f32 %v7070_v8, %v5187_v59 }
 0x415   : > { %v5198_v34 = vadd.f32 %v6967_v47, %v9745_v13 }
 0x416   : > { %v9864_v35 = vadd.f32 %v7073_v14, %v5190_v4 }
 0x417   : > { %v6968_v43 = vpop.f32.mrb[212].mxu1 }
 0x418   : > { %v7074_v45 = vpop.f32.mrb[240].mxu0  ;;  %v6969_v0 = vpop.f32.mrb[213].mxu1 }
 0x419   : > { %v6970_v36 = vadd.f32 %v6969_v0, %v6968_v43  ;;  %v7075_v41 = vpop.f32.mrb[241].mxu0  ;;  %v6971_v53 = vpop.f32.mrb[214].mxu1 }
 0x41a   : > { %v7076_v29 = vadd.f32 %v7075_v41, %v7074_v45  ;;  %v7077_v48 = vpop.f32.mrb[242].mxu0  ;;  %v6972_v46 = vpop.f32.mrb[215].mxu1 }
 0x41b   : > { %v5203_v49 = vadd.f32 %v6970_v36, %v9749_v2  ;;  %v6973_v50 = vadd.f32 %v6972_v46, %v6971_v53  ;;  %v7078_v56 = vpop.f32.mrb[243].mxu0 }
 0x41c   : > { %v7079_v6 = vadd.f32 %v7078_v56, %v7077_v48  ;;  %v9867_v15 = vadd.f32 %v7076_v29, %v5195_v39 }
 0x41d   : > { %v5206_v13 = vadd.f32 %v6973_v50, %v9755_v23 }
 0x41e   : > { %v9870_v59 = vadd.f32 %v7079_v6, %v5198_v34 }
 0x41f   : > { %v6974_v58 = vpop.f32.mrb[216].mxu1 }
 0x420   : > { %v7080_v42 = vpop.f32.mrb[244].mxu0  ;;  %v6975_v54 = vpop.f32.mrb[217].mxu1 }
 0x421   : > { %v6976_v4 = vadd.f32 %v6975_v54, %v6974_v58  ;;  %v7081_v30 = vpop.f32.mrb[245].mxu0  ;;  %v6977_v17 = vpop.f32.mrb[218].mxu1 }
 0x422   : > { %v7082_v19 = vadd.f32 %v7081_v30, %v7080_v42  ;;  %v7083_v40 = vpop.f32.mrb[246].mxu0  ;;  %v6978_v62 = vpop.f32.mrb[219].mxu1 }
 0x423   : > { %v5211_v2 = vadd.f32 %v6976_v4, %v9759_v44  ;;  %v6979_v21 = vadd.f32 %v6978_v62, %v6977_v17  ;;  %v7084_v8 = vpop.f32.mrb[247].mxu0 }
 0x424   : > { %v7085_v11 = vadd.f32 %v7084_v8, %v7083_v40  ;;  %v9873_v3 = vadd.f32 %v7082_v19, %v5203_v49 }
 0x425   : > { %v5214_v23 = vadd.f32 %v6979_v21, %v9765_v52 }
 0x426   : > { %v9876_v39 = vadd.f32 %v7085_v11, %v5206_v13 }
 0x427   : > { %v6980_v47 = vpop.f32.mrb[220].mxu1 }
 0x428   : > { %v7086_v25 = vpop.f32.mrb[248].mxu0  ;;  %v6981_v14 = vpop.f32.mrb[221].mxu1 }
 0x429   : > { %v6982_v34 = vadd.f32 %v6981_v14, %v6980_v47  ;;  %v7087_v43 = vpop.f32.mrb[249].mxu0  ;;  %v6983_v45 = vpop.f32.mrb[222].mxu1 }
 0x42a   : > { %v7088_v0 = vadd.f32 %v7087_v43, %v7086_v25  ;;  %v7089_v36 = vpop.f32.mrb[250].mxu0  ;;  %v6984_v41 = vpop.f32.mrb[223].mxu1 }
 0x42b   : > { %v5219_v44 = vadd.f32 %v6982_v34, %v9769_v12  ;;  %v6985_v53 = vadd.f32 %v6984_v41, %v6983_v45  ;;  %v7090_v29 = vpop.f32.mrb[251].mxu0 }
 0x42c   : > { %v7091_v48 = vadd.f32 %v7090_v29, %v7089_v36  ;;  %v9879_v46 = vadd.f32 %v7088_v0, %v5211_v2 }
 0x42d   : > { %v5222_v52 = vadd.f32 %v6985_v53, %v9775_v1 }
 0x42e   : > { %v9882_v49 = vadd.f32 %v7091_v48, %v5214_v23 }
 0x42f   : > { %v6986_v50 = vpop.f32.mrb[224].mxu1 }
 0x430   : > { %v7092_v56 = vpop.f32.mrb[252].mxu0  ;;  %v6987_v6 = vpop.f32.mrb[225].mxu1 }
 0x431   : > { %v6988_v13 = vadd.f32 %v6987_v6, %v6986_v50  ;;  %v7093_v58 = vpop.f32.mrb[253].mxu0  ;;  %v6989_v42 = vpop.f32.mrb[226].mxu1 }
 0x432   : > { %v7094_v54 = vadd.f32 %v7093_v58, %v7092_v56  ;;  %v7095_v4 = vpop.f32.mrb[254].mxu0  ;;  %v6990_v30 = vpop.f32.mrb[227].mxu1 }
 0x433   : > { %v5227_v12 = vadd.f32 %v6988_v13, %v9779_v27  ;;  %v6991_v17 = vadd.f32 %v6990_v30, %v6989_v42  ;;  %v7096_v19 = vpop.f32.mrb[255].mxu0 }
 0x434   : > { %v7097_v40 = vadd.f32 %v7096_v19, %v7095_v4  ;;  %v9885_v62 = vadd.f32 %v7094_v54, %v5219_v44 }
 0x435   : > { %v5230_v1 = vadd.f32 %v6991_v17, %v9785_v57 }
 0x436   : > { %v9888_v2 = vadd.f32 %v7097_v40, %v5222_v52 }
 0x437   : > { %v6992_v21 = vpop.f32.mrb[228].mxu1 }
 0x438   : > { %v7098_v8 = vpop.f32.mrb[0].mxu0  ;;  %v6993_v11 = vpop.f32.mrb[229].mxu1 }
 0x439   : > { %v6994_v23 = vadd.f32 %v6993_v11, %v6992_v21  ;;  %v7099_v47 = vpop.f32.mrb[1].mxu0  ;;  %v6995_v25 = vpop.f32.mrb[230].mxu1 }
 0x43a   : > { %v7100_v14 = vadd.f32 %v7099_v47, %v7098_v8  ;;  %v7101_v34 = vpop.f32.mrb[2].mxu0  ;;  %v6996_v43 = vpop.f32.mrb[231].mxu1 }
 0x43b   : > { %v5235_v27 = vadd.f32 %v6994_v23, %v9789_v24  ;;  %v6997_v45 = vadd.f32 %v6996_v43, %v6995_v25  ;;  %v7102_v0 = vpop.f32.mrb[3].mxu0 }
 0x43c   : > { %v7103_v36 = vadd.f32 %v7102_v0, %v7101_v34  ;;  %v9891_v41 = vadd.f32 %v7100_v14, %v5227_v12 }
 0x43d   : > { %v5238_v57 = vadd.f32 %v6997_v45, %v9795_v37 }
 0x43e   : > { %v9894_v44 = vadd.f32 %v7103_v36, %v5230_v1 }
 0x43f   : > { %v6998_v53 = vpop.f32.mrb[232].mxu1 }
 0x440   : > { %v7104_v29 = vpop.f32.mrb[4].mxu0  ;;  %v6999_v48 = vpop.f32.mrb[233].mxu1 }
 0x441   : > { %v7000_v52 = vadd.f32 %v6999_v48, %v6998_v53  ;;  %v7105_v50 = vpop.f32.mrb[5].mxu0  ;;  %v7001_v56 = vpop.f32.mrb[234].mxu1 }
 0x442   : > { %v7106_v6 = vadd.f32 %v7105_v50, %v7104_v29  ;;  %v7107_v13 = vpop.f32.mrb[6].mxu0  ;;  %v7002_v58 = vpop.f32.mrb[235].mxu1 }
 0x443   : > { %v5243_v24 = vadd.f32 %v7000_v52, %v9799_v22  ;;  %v7003_v42 = vadd.f32 %v7002_v58, %v7001_v56  ;;  %v7108_v54 = vpop.f32.mrb[7].mxu0 }
 0x444   : > { %v7109_v4 = vadd.f32 %v7108_v54, %v7107_v13  ;;  %v9897_v30 = vadd.f32 %v7106_v6, %v5235_v27 }
 0x445   : > { %v5246_v37 = vadd.f32 %v7003_v42, %v9806_v60 }
 0x446   : > { %v9900_v12 = vadd.f32 %v7109_v4, %v5238_v57 }
 0x447   : > { %v7004_v17 = vpop.f32.mrb[236].mxu1 }
 0x448   : > { %v7110_v19 = vpop.f32.mrb[8].mxu0  ;;  %v7005_v40 = vpop.f32.mrb[237].mxu1 }
 0x449   : > { %v7006_v1 = vadd.f32 %v7005_v40, %v7004_v17  ;;  %v7111_v21 = vpop.f32.mrb[9].mxu0  ;;  %v7007_v8 = vpop.f32.mrb[238].mxu1 }
 0x44a   : > { %v7112_v11 = vadd.f32 %v7111_v21, %v7110_v19  ;;  %v7113_v23 = vpop.f32.mrb[10].mxu0  ;;  %v7008_v47 = vpop.f32.mrb[239].mxu1 }
 0x44b   : > { %v5251_v22 = vadd.f32 %v7006_v1, %v9810_v9  ;;  %v7009_v25 = vadd.f32 %v7008_v47, %v7007_v8  ;;  %v7114_v14 = vpop.f32.mrb[11].mxu0 }
 0x44c   : > { %v7115_v34 = vadd.f32 %v7114_v14, %v7113_v23  ;;  %v9903_v43 = vadd.f32 %v7112_v11, %v5243_v24 }
 0x44d   : > { %v5254_v60 = vadd.f32 %v7009_v25, %v9814_v51 }
 0x44e   : > { %v9906_v27 = vadd.f32 %v7115_v34, %v5246_v37 }
 0x44f   : > { %v7010_v45 = vpop.f32.mrb[240].mxu1 }
 0x450   : > { %v7116_v0 = vpop.f32.mrb[12].mxu0  ;;  %v7011_v36 = vpop.f32.mrb[241].mxu1 }
 0x451   : > { %v7012_v57 = vadd.f32 %v7011_v36, %v7010_v45  ;;  %v7117_v53 = vpop.f32.mrb[13].mxu0  ;;  %v7013_v29 = vpop.f32.mrb[242].mxu1 }
 0x452   : > { %v7118_v48 = vadd.f32 %v7117_v53, %v7116_v0  ;;  %v7119_v52 = vpop.f32.mrb[14].mxu0  ;;  %v7014_v50 = vpop.f32.mrb[243].mxu1 }
 0x453   : > { %v5259_v9 = vadd.f32 %v7012_v57, %v9818_v33  ;;  %v7015_v56 = vadd.f32 %v7014_v50, %v7013_v29  ;;  %v7120_v6 = vpop.f32.mrb[15].mxu0 }
 0x454   : > { %v7121_v13 = vadd.f32 %v7120_v6, %v7119_v52  ;;  %v9909_v58 = vadd.f32 %v7118_v48, %v5251_v22 }
 0x455   : > { %v5262_v51 = vadd.f32 %v7015_v56, %v9820_v28 }
 0x456   : > { %v9912_v24 = vadd.f32 %v7121_v13, %v5254_v60 }
 0x457   : > { %v7016_v42 = vpop.f32.mrb[244].mxu1 }
 0x458   : > { %v7122_v54 = vpop.f32.mrb[16].mxu0  ;;  %v7017_v4 = vpop.f32.mrb[245].mxu1 }
 0x459   : > { %v7018_v37 = vadd.f32 %v7017_v4, %v7016_v42  ;;  %v7123_v17 = vpop.f32.mrb[17].mxu0  ;;  %v7019_v19 = vpop.f32.mrb[246].mxu1 }
 0x45a   : > { %v7124_v40 = vadd.f32 %v7123_v17, %v7122_v54  ;;  %v7125_v1 = vpop.f32.mrb[18].mxu0  ;;  %v7020_v21 = vpop.f32.mrb[247].mxu1 }
 0x45b   : > { %v5267_v33 = vadd.f32 %v7018_v37, %v9824_v55  ;;  %v7021_v8 = vadd.f32 %v7020_v21, %v7019_v19  ;;  %v7126_v11 = vpop.f32.mrb[19].mxu0 }
 0x45c   : > { %v7127_v23 = vadd.f32 %v7126_v11, %v7125_v1  ;;  %v9915_v47 = vadd.f32 %v7124_v40, %v5259_v9  ;;  %v5613_v11 = vld [vmem:[%s7989_s17 + $0x10] sm:$0xff] }
 0x45d   : > { %v5270_v28 = vadd.f32 %v7021_v8, %v9826_v31 }
 0x45e   : > { %v9918_v22 = vadd.f32 %v7127_v23, %v5262_v51 }
 0x45f   : > { %v7022_v25 = vpop.f32.mrb[248].mxu1 }
 0x460   : > { %v7128_v14 = vpop.f32.mrb[20].mxu0  ;;  %v7023_v34 = vpop.f32.mrb[249].mxu1 }
 0x461   : > { %v7024_v60 = vadd.f32 %v7023_v34, %v7022_v25  ;;  %v7129_v45 = vpop.f32.mrb[21].mxu0  ;;  %v7025_v0 = vpop.f32.mrb[250].mxu1 }
 0x462   : > { %v7130_v36 = vadd.f32 %v7129_v45, %v7128_v14  ;;  %v7131_v57 = vpop.f32.mrb[22].mxu0  ;;  %v7026_v53 = vpop.f32.mrb[251].mxu1  ;;  %v5611_v14 = vld [vmem:[%s7989_s17] sm:$0xff]  ;;  %v5614_v45 = vld [vmem:[%s7989_s17 + $0x18] sm:$0xff] }
 0x463   : > { %v5275_v55 = vadd.f32 %v7024_v60, %v9830_v18  ;;  %v7027_v29 = vadd.f32 %v7026_v53, %v7025_v0  ;;  %v7132_v48 = vpop.f32.mrb[23].mxu0 }
 0x464   : > { %v7133_v52 = vadd.f32 %v7132_v48, %v7131_v57  ;;  %v9921_v50 = vadd.f32 %v7130_v36, %v5267_v33 }
 0x465   : > { %v5278_v31 = vadd.f32 %v7027_v29, %v9832_v32 }
 0x466   : > { %v9924_v9 = vadd.f32 %v7133_v52, %v5270_v28 }
 0x467   : > { %v7028_v56 = vpop.f32.mrb[252].mxu1 }
 0x468   : > { %v7134_v6 = vpop.f32.mrb[24].mxu0  ;;  %v7029_v13 = vpop.f32.mrb[253].mxu1 }
 0x469   : > { %v7030_v51 = vadd.f32 %v7029_v13, %v7028_v56  ;;  %v7135_v42 = vpop.f32.mrb[25].mxu0  ;;  %v7031_v54 = vpop.f32.mrb[254].mxu1 }
 0x46a   : > { %v7136_v4 = vadd.f32 %v7135_v42, %v7134_v6  ;;  %v7137_v37 = vpop.f32.mrb[26].mxu0  ;;  %v7032_v18 = vpop.f32.mrb[255].mxu1  ;;  %v5617_v6 = vld [vmem:[%s7989_s17 + $0x30] sm:$0xff]  ;;  %v5615_v42 = vld [vmem:[%s7989_s17 + $0x20] sm:$0xff] }
 0x46b   : > { %v5283_v17 = vadd.f32 %v7030_v51, %v9837_v7  ;;  %v7033_v19 = vadd.f32 %v7032_v18, %v7031_v54  ;;  %v7138_v40 = vpop.f32.mrb[27].mxu0 }
 0x46c   : > { %v7139_v1 = vadd.f32 %v7138_v40, %v7137_v37  ;;  %v9927_v32 = vadd.f32 %v7136_v4, %v5275_v55  ;;  %v5612_v55 = vld [vmem:[%s7989_s17 + $0x8] sm:$0xff]  ;;  %v5618_v37 = vld [vmem:[%s7989_s17 + $0x38] sm:$0xff] }
 0x46d   : > { %v5286_v21 = vadd.f32 %v7033_v19, %v9840_v38  ;;  %v5616_v40 = vld [vmem:[%s7989_s17 + $0x28] sm:$0xff] }
 0x46e   : > { %v9930_v33 = vadd.f32 %v7139_v1, %v5278_v31 }
 0x46f   : > { %v7236_v8 = vpop.f32.mrb[0].mxu1 }
 0x470   : > { %v7140_v23 = vpop.f32.mrb[28].mxu0  ;;  %v5493_v28 = vadd.f32 %v7236_v8, %v9849_v63  ;;  %v5484_v25 = vpop.f32.mrb[1].mxu1 }
 0x471   : > { %v7141_v7 = vpop.f32.mrb[29].mxu0  ;;  %v5485_v34 = vadd.f32 %v5484_v25, %v9843_v26  ;;  %v7237_v60 = vpop.f32.mrb[2].mxu1 }
 0x472   : > { %v5645_v0 = vadd.f32 %v5613_v11, %v5493_v28  ;;  %v7142_v36 = vadd.f32 %v7141_v7, %v7140_v23  ;;  %v7143_v57 = vpop.f32.mrb[30].mxu0  ;;  %v5496_v38 = vadd.f32 %v7237_v60, %v9852_v5  ;;  %v5487_v53 = vpop.f32.mrb[3].mxu1  ;;  %v5621_v11 = vld [vmem:[%s7989_s17 + $0x50] sm:$0xff]  ;;  %v5619_v28 = vld [vmem:[%s7989_s17 + $0x40] sm:$0xff] }
 0x473   : > { %v5643_v29 = vadd.f32 %v5611_v14, %v5485_v34  ;;  %v7144_v48 = vpop.f32.mrb[31].mxu0  ;;  %v5488_v63 = vadd.f32 %v5487_v53, %v9846_v20  ;;  %v5622_v14 = vld [vmem:[%s7989_s17 + $0x58] sm:$0xff] }
 0x474   : > { %5677 = vst [vmem:[%s9942_s24 + $0x10] sm:$0xff] %v5645_v0  ;;  %v5646_v26 = vadd.f32 %v5614_v45, %v5496_v38  ;;  %v7145_v52 = vadd.f32 %v7144_v48, %v7143_v57  ;;  %v9945_v5 = vadd.f32 %v7142_v36, %v5283_v17  ;;  %v5620_v45 = vld [vmem:[%s7989_s17 + $0x48] sm:$0xff]  ;;  %v5625_v38 = vld [vmem:[%s7989_s17 + $0x70] sm:$0xff]  ;;  %v5626_v48 = vld [vmem:[%s7989_s17 + $0x78] sm:$0xff] }
 0x475   : > { %5675 = vst [vmem:[%s9942_s24] sm:$0xff] %v5643_v29  ;;  %v5644_v31 = vadd.f32 %v5612_v55, %v5488_v63  ;;  %v5623_v55 = vld [vmem:[%s7989_s17 + $0x60] sm:$0xff] }
 0x476   : > { %5678 = vst [vmem:[%s9942_s24 + $0x18] sm:$0xff] %v5646_v26  ;;  %v9949_v56 = vadd.f32 %v7145_v52, %v5286_v21 }
 0x477   : > { %5676 = vst [vmem:[%s9942_s24 + $0x8] sm:$0xff] %v5644_v31  ;;  %v7240_v20 = vpop.f32.mrb[4].mxu1  ;;  %v5624_v31 = vld [vmem:[%s7989_s17 + $0x68] sm:$0xff] }
 0x478   : > { %v5509_v13 = vadd.f32 %v7240_v20, %v9861_v10  ;;  %v5500_v51 = vpop.f32.mrb[5].mxu1 }
 0x479   : > { %v5501_v54 = vadd.f32 %v5500_v51, %v9855_v61  ;;  %v7241_v4 = vpop.f32.mrb[6].mxu1  ;;  %v5629_v51 = vld [vmem:[%s7989_s17 + $0x90] sm:$0xff] }
 0x47a   : > { %v5649_v18 = vadd.f32 %v5617_v6, %v5509_v13  ;;  %v5512_v17 = vadd.f32 %v7241_v4, %v9864_v35  ;;  %v5503_v19 = vpop.f32.mrb[7].mxu1 }
 0x47b   : > { %v5647_v1 = vadd.f32 %v5615_v42, %v5501_v54  ;;  %v5504_v21 = vadd.f32 %v5503_v19, %v9858_v16  ;;  %v5627_v54 = vld [vmem:[%s7989_s17 + $0x80] sm:$0xff] }
 0x47c   : > { %5681 = vst [vmem:[%s9942_s24 + $0x30] sm:$0xff] %v5649_v18  ;;  %v5650_v10 = vadd.f32 %v5618_v37, %v5512_v17  ;;  %v5630_v37 = vld [vmem:[%s7989_s17 + $0x98] sm:$0xff] }
 0x47d   : > { %5679 = vst [vmem:[%s9942_s24 + $0x20] sm:$0xff] %v5647_v1  ;;  %v5648_v8 = vadd.f32 %v5616_v40, %v5504_v21  ;;  %v5628_v40 = vld [vmem:[%s7989_s17 + $0x88] sm:$0xff] }
 0x47e   : > { %5682 = vst [vmem:[%s9942_s24 + $0x38] sm:$0xff] %v5650_v10 }
 0x47f   : > { %5680 = vst [vmem:[%s9942_s24 + $0x28] sm:$0xff] %v5648_v8  ;;  %v7244_v61 = vpop.f32.mrb[8].mxu1  ;;  %v5633_v8 = vld [vmem:[%s7989_s17 + $0xb0] sm:$0xff] }
 0x480   : > { %v5525_v23 = vadd.f32 %v7244_v61, %v9873_v3  ;;  %v5516_v35 = vpop.f32.mrb[9].mxu1 }
 0x481   : > { %v5517_v25 = vadd.f32 %v5516_v35, %v9867_v15  ;;  %v7245_v16 = vpop.f32.mrb[10].mxu1  ;;  %v5634_v35 = vld [vmem:[%s7989_s17 + $0xb8] sm:$0xff] }
 0x482   : > { %v5653_v7 = vadd.f32 %v5621_v11, %v5525_v23  ;;  %v5528_v34 = vadd.f32 %v7245_v16, %v9876_v39  ;;  %v5519_v60 = vpop.f32.mrb[11].mxu1  ;;  %v5631_v11 = vld [vmem:[%s7989_s17 + $0xa0] sm:$0xff] }
 0x483   : > { %v5651_v0 = vadd.f32 %v5619_v28, %v5517_v25  ;;  %v5520_v36 = vadd.f32 %v5519_v60, %v9870_v59 }
 0x484   : > { %5685 = vst [vmem:[%s9942_s24 + $0x50] sm:$0xff] %v5653_v7  ;;  %v5654_v3 = vadd.f32 %v5622_v14, %v5528_v34  ;;  %v5632_v14 = vld [vmem:[%s7989_s17 + $0xa8] sm:$0xff] }
 0x485   : > { %5683 = vst [vmem:[%s9942_s24 + $0x40] sm:$0xff] %v5651_v0  ;;  %v5652_v57 = vadd.f32 %v5620_v45, %v5520_v36  ;;  %v5637_v45 = vld [vmem:[%s7989_s17 + $0xd0] sm:$0xff]  ;;  %v5635_v36 = vld [vmem:[%s7989_s17 + $0xc0] sm:$0xff] }
 0x486   : > { %5686 = vst [vmem:[%s9942_s24 + $0x58] sm:$0xff] %v5654_v3 }
 0x487   : > { %5684 = vst [vmem:[%s9942_s24 + $0x48] sm:$0xff] %v5652_v57  ;;  %v7248_v15 = vpop.f32.mrb[12].mxu1  ;;  %v5638_v57 = vld [vmem:[%s7989_s17 + $0xd8] sm:$0xff] }
 0x488   : > { %v5541_v53 = vadd.f32 %v7248_v15, %v9885_v62  ;;  %v5532_v39 = vpop.f32.mrb[13].mxu1 }
 0x489   : > { %v5533_v29 = vadd.f32 %v5532_v39, %v9879_v46  ;;  %v7249_v59 = vpop.f32.mrb[14].mxu1  ;;  %v5636_v39 = vld [vmem:[%s7989_s17 + $0xc8] sm:$0xff] }
 0x48a   : > { %v5657_v63 = vadd.f32 %v5625_v38, %v5541_v53  ;;  %v5544_v26 = vadd.f32 %v7249_v59, %v9888_v2  ;;  %v5535_v52 = vpop.f32.mrb[15].mxu1 }
 0x48b   : > { %v5655_v20 = vadd.f32 %v5623_v55, %v5533_v29  ;;  %v5536_v6 = vadd.f32 %v5535_v52, %v9882_v49 }
 0x48c   : > { %5689 = vst [vmem:[%s9942_s24 + $0x70] sm:$0xff] %v5657_v63  ;;  %v5658_v62 = vadd.f32 %v5626_v48, %v5544_v26  ;;  %v5641_v48 = vld [vmem:[%s7989_s17 + $0xf0] sm:$0xff]  ;;  %v5639_v26 = vld [vmem:[%s7989_s17 + $0xe0] sm:$0xff] }
 0x48d   : > { %5687 = vst [vmem:[%s9942_s24 + $0x60] sm:$0xff] %v5655_v20  ;;  %v5656_v13 = vadd.f32 %v5624_v31, %v5536_v6 }
 0x48e   : > { %5690 = vst [vmem:[%s9942_s24 + $0x78] sm:$0xff] %v5658_v62 }
 0x48f   : > { %5688 = vst [vmem:[%s9942_s24 + $0x68] sm:$0xff] %v5656_v13  ;;  %v7252_v46 = vpop.f32.mrb[16].mxu1  ;;  %v5640_v13 = vld [vmem:[%s7989_s17 + $0xe8] sm:$0xff] }
 0x490   : > { %v5557_v42 = vadd.f32 %v7252_v46, %v9897_v30  ;;  %v5548_v2 = vpop.f32.mrb[17].mxu1 }
 0x491   : > { %v5549_v4 = vadd.f32 %v5548_v2, %v9891_v41  ;;  %v7253_v49 = vpop.f32.mrb[18].mxu1 }
 0x492   : > { %v5661_v18 = vadd.f32 %v5629_v51, %v5557_v42  ;;  %v5560_v17 = vadd.f32 %v7253_v49, %v9900_v12  ;;  %v5551_v19 = vpop.f32.mrb[19].mxu1 }
 0x493   : > { %v5659_v1 = vadd.f32 %v5627_v54, %v5549_v4  ;;  %v5552_v21 = vadd.f32 %v5551_v19, %v9894_v44 }
 0x494   : > { %5693 = vst [vmem:[%s9942_s24 + $0x90] sm:$0xff] %v5661_v18  ;;  %v5662_v30 = vadd.f32 %v5630_v37, %v5560_v17 }
 0x495   : > { %5691 = vst [vmem:[%s9942_s24 + $0x80] sm:$0xff] %v5659_v1  ;;  %v5660_v10 = vadd.f32 %v5628_v40, %v5552_v21 }
 0x496   : > { %5694 = vst [vmem:[%s9942_s24 + $0x98] sm:$0xff] %v5662_v30 }
 0x497   : > { %5692 = vst [vmem:[%s9942_s24 + $0x88] sm:$0xff] %v5660_v10  ;;  %v7256_v41 = vpop.f32.mrb[20].mxu1 }
 0x498   : > { %v5573_v61 = vadd.f32 %v7256_v41, %v9909_v58  ;;  %v5564_v12 = vpop.f32.mrb[21].mxu1 }
 0x499   : > { %v5565_v23 = vadd.f32 %v5564_v12, %v9903_v43  ;;  %v7257_v44 = vpop.f32.mrb[22].mxu1 }
 0x49a   : > { %v5665_v28 = vadd.f32 %v5633_v8, %v5573_v61  ;;  %v5576_v25 = vadd.f32 %v7257_v44, %v9912_v24  ;;  %v5567_v16 = vpop.f32.mrb[23].mxu1 }
 0x49b   : > { %v5663_v7 = vadd.f32 %v5631_v11, %v5565_v23  ;;  %v5568_v34 = vadd.f32 %v5567_v16, %v9906_v27 }
 0x49c   : > { %5697 = vst [vmem:[%s9942_s24 + $0xb0] sm:$0xff] %v5665_v28  ;;  %v5666_v58 = vadd.f32 %v5634_v35, %v5576_v25 }
 0x49d   : > { %5695 = vst [vmem:[%s9942_s24 + $0xa0] sm:$0xff] %v5663_v7  ;;  %v5664_v60 = vadd.f32 %v5632_v14, %v5568_v34 }
 0x49e   : > { %5698 = vst [vmem:[%s9942_s24 + $0xb8] sm:$0xff] %v5666_v58 }
 0x49f   : > { %5696 = vst [vmem:[%s9942_s24 + $0xa8] sm:$0xff] %v5664_v60  ;;  %v7260_v43 = vpop.f32.mrb[24].mxu1 }
 0x4a0   : > { %v5589_v0 = vadd.f32 %v7260_v43, %v9921_v50  ;;  %v5580_v24 = vpop.f32.mrb[25].mxu1 }
 0x4a1   : > { %v5581_v3 = vadd.f32 %v5580_v24, %v9915_v47  ;;  %v7261_v27 = vpop.f32.mrb[26].mxu1 }
 0x4a2   : > { %v5669_v15 = vadd.f32 %v5637_v45, %v5589_v0  ;;  %v5592_v38 = vadd.f32 %v7261_v27, %v9924_v9  ;;  %v5583_v53 = vpop.f32.mrb[27].mxu1 }
 0x4a3   : > { %v5667_v55 = vadd.f32 %v5635_v36, %v5581_v3  ;;  %v5584_v50 = vadd.f32 %v5583_v53, %v9918_v22  ;;  %v5642_v22 = vld [vmem:[%s7989_s17 + $0xf8] sm:$0xff] }
 0x4a4   : > { %5701 = vst [vmem:[%s9942_s24 + $0xd0] sm:$0xff] %v5669_v15  ;;  %v5670_v29 = vadd.f32 %v5638_v57, %v5592_v38 }
 0x4a5   : > { %5699 = vst [vmem:[%s9942_s24 + $0xc0] sm:$0xff] %v5667_v55  ;;  %v5668_v59 = vadd.f32 %v5636_v39, %v5584_v50 }
 0x4a6   : > { %5702 = vst [vmem:[%s9942_s24 + $0xd8] sm:$0xff] %v5670_v29 }
 0x4a7   : > { %5700 = vst [vmem:[%s9942_s24 + $0xc8] sm:$0xff] %v5668_v59  ;;  %v7264_v47 = vpop.f32.mrb[28].mxu1 }
 0x4a8   : > { %v5605_v9 = vadd.f32 %v7264_v47, %v9945_v5  ;;  %v5596_v63 = vpop.f32.mrb[29].mxu1 }
 0x4a9   : > { %v5597_v52 = vadd.f32 %v5596_v63, %v9927_v32  ;;  %v7265_v31 = vpop.f32.mrb[30].mxu1 }
 0x4aa   : > { %v5673_v20 = vadd.f32 %v5641_v48, %v5605_v9  ;;  %v5608_v6 = vadd.f32 %v7265_v31, %v9949_v56  ;;  %v5599_v62 = vpop.f32.mrb[31].mxu1 }
 0x4ab   : > { %v5671_v46 = vadd.f32 %v5639_v26, %v5597_v52  ;;  %v5600_v5 = vadd.f32 %v5599_v62, %v9930_v33 }
 0x4ac   : > { %5705 = vst [vmem:[%s9942_s24 + $0xf0] sm:$0xff] %v5673_v20  ;;  %v5674_v51 = vadd.f32 %v5642_v22, %v5608_v6 }
 0x4ad   : > { %5703 = vst [vmem:[%s9942_s24 + $0xe0] sm:$0xff] %v5671_v46  ;;  %v5672_v32 = vadd.f32 %v5640_v13, %v5600_v5 }
 0x4ae   : > { %5706 = vst [vmem:[%s9942_s24 + $0xf8] sm:$0xff] %v5674_v51 }
 0x4af   : > { %5704 = vst [vmem:[%s9942_s24 + $0xe8] sm:$0xff] %v5672_v32 }
 0x4b0   : > { %7663 = shalt.err (!%p7660_p13)
}
 0x4b1   : > { %s7664_s16 = scalar_lea.hbm %s10038_s15, 4096  ;;  %s7668_s7 = scalar_lea.hbm %s10092_s5, 8192 }
 0x4b2   : > { %p7665_p9 = scmp.ne.s32.totalorder %s10038_s15, %s7664_s16  ;;  %p7669_p6 = scmp.lt.u32.totalorder %s10038_s15, %s10092_s5 }
 0x4b3   : > { %p7670_p4 = scmp.lt.u32.totalorder %s7668_s7, %s7664_s16  ;;  %p7672_p3 = scmp.lt.u32.totalorder %s7664_s16, %s10038_s15 }
 0x4b4   : > { %p7666_p0 = pnand %p7665_p9, %p7931_p10 }
 0x4b5   : > { %p7671_p8 = por %p7670_p4, %p7669_p6 }
 0x4b6   : > { %p7667_p11 = pneg %p7666_p0 }
 0x4b7   : > { %p7673_p5 = por %p7672_p3, %p7671_p8 }
 0x4b9   : > { %p7674_p7 = pnand %p7673_p5, %p7667_p11 }
 0x4bb   : > { %7677 = shalt.err (!%p7674_p7)
}
 0x4bc   : > { %s7740_s26 = smov 128   ;;  %s7741_s13 = smov 8  }
 0x4bd   : > { %7284 = dma.vmem_to_hbm [thread:$0]  (%p7931_p10), %s10040_s11, 4096, %s10038_s15, %s5708_s22, %s7740_s26, %s7740_s26, %s7741_s13  }
 0x4be PF: > { %s5736_s8 = sand.u32 1, %s7712_s18   ;;  %p10551_p12 = scmp.ne.s32.totalorder %s10245_s25, 0 }
 0x4bf   : > { %p10552_p2 = scmp.ge.s32.totalorder %s7724_s21, 2  ;;  %s5737_s30 = scalar_lea.sflag [#allocation6], %s5736_s8 }
 0x4c1   : > { %p7304_p1 = pnand %p10552_p2, %p10551_p12 }
 0x4c3   : > { %7707 = dma.done.wait (!%p7304_p1), %s5737_s30, 4096  }
 0x4c4   : > { %7709 = vsyncadd (!%p7304_p1), %s5737_s30, 4294963200  ;;  %p20_p13 = scmp.ge.s32.totalorder %s7921_s14, 4   ;;  %s10553_s18 = smov %s7716_s19 }
 0x4c5   : > { %s10554_s19 = smov %s7720_s20  ;;  %s10555_s20 = smov %s7937_s28 }
 0x4c6   : > { %s10556_s21 = smov %s7921_s14  ;;  %22 = sbr.rel (!%p20_p13) target bundleno = 7 (0x7), region = 101 }
 0x4cd   :  { %5742 = vsyncpa [#allocation5], 1 }
 0x4ce   :  { %5744 = vsyncpa [#allocation5 + $0x1], 1 }
 0x4cf   :  { %5745 = vsyncpa [#allocation8], 1 }
 0x4d0   :  { %5746 = vsyncpa [#allocation11], 1 }
 0x4d1   :  { %5747 = vsyncpa [#allocation6], 1 }
 0x4d2   :  { %5749 = vsyncpa [#allocation6 + $0x1], 1 }

</bundles_post_ra>
